<compile_context>
chip_gen: v6e
topology: v6e:2x2x1
jax: 0.10.0
libtpu: 0.0.40
codegen_flags: <defaults>
</compile_context>

<pallas_src>
import jax
import jax.numpy as jnp
from jax.experimental import pallas as pl
from jax.experimental.pallas import tpu as pltpu

K = 4        # ConvTranspose2d kernel size
STRIDE = 2
PAD = 1
LANE = 128       # vreg lane width: im2col column blocks padded to this
OUT_ALIGN = 64   # Cout padded so the 2*Cout output trailing dim is a multiple of 128


def _round_up(x, m):
    return (x + m - 1) // m * m


def _vmem_capacity_bytes():
    try:
        return int(pltpu.get_tpu_info().vmem_capacity_bytes)
    except Exception:
        return 64 * 1024 * 1024          # conservative fallback (v7x per-core VMEM)


def _vmem_footprint(th, H, W, Cin_p, Cout2_p):
    """Rough per-step VMEM bytes for a TH-row tile (double-buffering included)."""
    m = th * W
    return (2 * (H + 2) * (W + 2) * Cin_p * 2      # padded input (resident, double-buffered)
            + 2 * 2 * 6 * Cin_p * Cout2_p * 2      # packed weights (double-buffered)
            + 2 * Cout2_p * 4                      # bias
            + 2 * 2 * m * Cout2_p * 2              # bf16 output block (double-buffered)
            + m * 9 * Cin_p * 2                    # im2col scratch
            + 2 * m * Cout2_p * 4                  # f32 matmul accumulators
            + 3 * m * Cin_p * 2)                   # shifted-window temps


def _choose_tile_rows(H, W, Cin_p, Cout2_p, budget_bytes):
    """Largest row-tile TH dividing H whose VMEM footprint fits the budget."""
    cands = [th for th in range(H, 0, -1)
             if H % th == 0 and (th == H or (th * W) % 8 == 0)]
    for th in cands:
        if _vmem_footprint(th, H, W, Cin_p, Cout2_p) <= budget_bytes:
            return th
    return cands[-1]


def _deconv_kernel(xp_ref, w_ref, b_ref, o_ref, lhs_ref):
    # xp_ref : (H+2, W+2, Cin_p)      bf16 zero-padded image (halo + channel pad), one batch
    #                                 element, resident across the row-tile grid axis
    # w_ref  : (2, 6*Cin_p, 2*Cout_p) bf16 packed weights (row-phase major)
    # b_ref  : (1, 2*Cout_p)          f32 bias tiled for the two column phases
    # o_ref  : (2, TH*W, 2*Cout_p)    bf16 per row phase: [pixel, (col phase, channel)]
    # lhs_ref: (TH*W, 9*Cin_p)        bf16 im2col; tap blocks ordered [up|mid|dn] x [-1,0,+1]
    Hp, Wp, Cin = xp_ref.shape
    W = Wp - 2
    TH = o_ref.shape[1] // W
    r0 = pl.multiple_of(pl.program_id(1) * TH, TH)   # first input row of this tile
    bias = b_ref[...]                                 # (1, 2*Cout_p), loaded once

    # Row slabs for row offsets -1 / 0 / +1, each (TH, W+2, Cin_p).
    slabs = (xp_ref[pl.ds(r0, TH)],        # up  (row offset -1)
             xp_ref[pl.ds(r0 + 1, TH)],    # mid (row offset  0)
             xp_ref[pl.ds(r0 + 2, TH)])    # dn  (row offset +1)

    # Build the 9-tap im2col LHS.  Cin_p is a multiple of 128, so every store is a
    # lane-aligned full-width vst; all 9 blocks are disjoint, so the stores can overlap the
    # matmuls below (no WAR hazard).
    # TODO(synk): the +/-1 column shifts could be produced with pltpu.roll (XLU slot) from the
    # c=0 block instead of three separately sliced copies per row slab.
    for t, slab in enumerate(slabs):
        for ci, c in enumerate((-1, 0, 1)):
            blk = 3 * t + ci
            lhs_ref[:, blk * Cin:(blk + 1) * Cin] = \
                slab[:, 1 + c:1 + c + W, :].reshape(TH * W, Cin)

    # Row phase 0 contracts over [up|mid] (cols [0, 6*Cin)); row phase 1 over [mid|dn]
    # (cols [3*Cin, 9*Cin)).  One large-K bf16 MXU matmul per row phase produces both column
    # phases (lane-dense 2*Cout_p trailing dim), f32 accumulation, bf16 store.
    # TODO(synk): on v6e/v7x a single fused (TH*W,9*Cin_p)x(9*Cin_p,4*Cout_p) matmul would
    # fill the 256-wide MXU; kept the 2-matmul form so v5e (128-wide MXU) doesn't regress.
    for po in (0, 1):
        lo = po * 3 * Cin
        acc = jnp.dot(lhs_ref[:, lo:lo + 6 * Cin], w_ref[po],
                      preferred_element_type=jnp.float32)
        o_ref[po] = (acc + bias).astype(o_ref.dtype)


def pack_deconv_weights(weight, bias, cin_p, cout_p, compute_dtype=jnp.bfloat16):
    """Pack ConvTranspose2d params for the fused kernel (with channel zero-padding).

    weight: (Cin, Cout, K, K) PyTorch ConvTranspose2d layout; bias: (Cout,).
    Output pixel o = 2*i + p (per axis) receives x[i+off] * w[k] for (off, k) in:
      p == 0: (0, 1), (-1, 3)        p == 1: (0, 2), (+1, 0)
    Row-phase po's weight rows follow the lhs block order it reads: po=0 -> [up|mid],
    po=1 -> [mid|dn], each with col offsets (-1, 0, +1); RHS columns are
    [col-phase 0 | col-phase 1]; unused (coff, pw) combos and padded channels are zero.
    """
    Cin, Cout = weight.shape[0], weight.shape[1]
    wk = jnp.transpose(weight, (2, 3, 0, 1)).astype(compute_dtype)     # (KH, KW, Cin, Cout)
    wk = jnp.pad(wk, ((0, 0), (0, 0), (0, cin_p - Cin), (0, cout_p - Cout)))
    zero = jnp.zeros((cin_p, cout_p), compute_dtype)
    row_kh = {0: {-1: 3, 0: 1}, 1: {0: 2, 1: 0}}     # [po][roff] -> kernel row
    col_kw = ({-1: 3, 0: 1, 1: None},                # col phase 0: coff -> kernel col
              {-1: None, 0: 2, 1: 0})                # col phase 1 (None -> zero block)
    roffs_for_po = {0: (-1, 0), 1: (0, 1)}
    packed = []
    for po in (0, 1):
        blocks = []
        for roff in roffs_for_po[po]:
            kh = row_kh[po][roff]
            for coff in (-1, 0, 1):
                cols = [zero if col_kw[pw][coff] is None else wk[kh, col_kw[pw][coff]]
                        for pw in (0, 1)]
                blocks.append(jnp.concatenate(cols, axis=-1))    # (Cin_p, 2*Cout_p)
        packed.append(jnp.concatenate(blocks, axis=0))           # (6*Cin_p, 2*Cout_p)
    w_packed = jnp.stack(packed, axis=0)                          # (2, 6*Cin_p, 2*Cout_p)
    b_pad = jnp.pad(bias.astype(jnp.float32), (0, cout_p - Cout))
    bias2 = jnp.concatenate([b_pad, b_pad]).reshape(1, 2 * cout_p)
    return w_packed, bias2


def conv_transpose2d_pallas(xpad_nhwc, w_packed, bias2, tile_rows, vmem_limit_bytes):
    """ConvTranspose2d(k=4, s=2, p=1) on a 1px-zero-padded, channel-padded NHWC bf16 input.

    xpad_nhwc: (N, H+2, W+2, Cin_p).  Returns (N, 2, H*W, 2*Cout_p) bf16 where
    result[b, po, h*W + w, pw*Cout_p + c] is output pixel (2h+po, 2w+pw), channel c.
    """
    N, Hp, Wp, Cin_p = xpad_nhwc.shape
    H, W = Hp - 2, Wp - 2
    Cout2_p = w_packed.shape[-1]
    n_row_tiles = H // tile_rows
    return pl.pallas_call(
        _deconv_kernel,
        out_shape=jax.ShapeDtypeStruct((N, 2, H * W, Cout2_p), jnp.bfloat16),
        grid=(N, n_row_tiles),
        in_specs=[
            # Whole padded image: block index constant across the row-tile axis, so it is
            # DMA'd once per batch element and stays resident in VMEM.
            pl.BlockSpec((None, Hp, Wp, Cin_p), lambda b, i: (b, 0, 0, 0)),
            pl.BlockSpec((2, 6 * Cin_p, Cout2_p), lambda b, i: (0, 0, 0)),
            pl.BlockSpec((1, Cout2_p), lambda b, i: (0, 0)),
        ],
        out_specs=pl.BlockSpec((None, 2, tile_rows * W, Cout2_p),
                               lambda b, i: (b, 0, i, 0)),
        scratch_shapes=[pltpu.VMEM((tile_rows * W, 9 * Cin_p), jnp.bfloat16)],
        compiler_params=pltpu.CompilerParams(
            dimension_semantics=("parallel", "parallel"),
            vmem_limit_bytes=vmem_limit_bytes,
        ),
    )(xpad_nhwc, w_packed, bias2)


def unet_up_forward(inputs1, inputs2, weight, bias, tile_rows=None):
    """unetUp.forward ('deconv' branch).  inputs1/inputs2/output are NCHW (PyTorch)."""
    N, Cin, H, W = inputs1.shape
    Cout = weight.shape[1]
    Cin_p = _round_up(Cin, LANE)         # lane-aligned im2col column blocks
    Cout_p = _round_up(Cout, OUT_ALIGN)  # lane-dense output trailing dim (2*Cout_p % 128 == 0)
    Cout2_p = 2 * Cout_p

    cap = _vmem_capacity_bytes()
    if tile_rows is None:
        tile_rows = _choose_tile_rows(H, W, Cin_p, Cout2_p, int(cap * 0.55))
    else:
        assert H % tile_rows == 0 and (tile_rows == H or (tile_rows * W) % 8 == 0)
    need = _vmem_footprint(tile_rows, H, W, Cin_p, Cout2_p)
    vmem_limit = int(min(cap * 85 // 100, max(need * 2, 32 * 1024 * 1024)))

    # NCHW -> NHWC, 1px zero halo, channel pad to Cin_p, cast to MXU-native bf16:
    # one fused XLA pass over the (smallest) input tensor.
    xpad = jnp.pad(jnp.transpose(inputs1, (0, 2, 3, 1)),
                   ((0, 0), (1, 1), (1, 1), (0, Cin_p - Cin))).astype(jnp.bfloat16)
    w_packed, bias2 = pack_deconv_weights(weight, bias, Cin_p, Cout_p)
    raw = conv_transpose2d_pallas(xpad, w_packed, bias2, tile_rows, vmem_limit)

    # (b, po, h*W+w, pw*Cout_p+c) -> NCHW (b, c, 2h+po, 2w+pw): slice away channel padding and
    # de-interleave the phases in bf16 (one HBM pass at half the f32 cost).
    # TODO(synk): if the consuming UNet op is also ours, keep the layer NHWC end-to-end and
    # skip this NCHW epilogue transpose entirely.
    up = raw.reshape(N, 2, H, W, 2, Cout_p)[..., :Cout]
    in1_up = jnp.transpose(up, (0, 5, 2, 1, 3, 4)).reshape(N, Cout, 2 * H, 2 * W)

    # crop logic (static shapes; mirrors the PyTorch code exactly)
    H2, W2 = inputs2.shape[2], inputs2.shape[3]
    Hu, Wu = in1_up.shape[2], in1_up.shape[3]
    if H2 != Hu or W2 != Wu:
        # NOTE: like the PyTorch original, this only handles inputs2 spatially <= in1_up.
        diff2 = (H2 - Hu) if (H2 - Hu) < 0 else Hu
        diff3 = (W2 - Wu) if (W2 - Wu) < 0 else Wu
        inputs1_ = in1_up[:, :, :diff2, :diff3]
    else:
        inputs1_ = in1_up
    # Cast (fused into the concat copy) so the module output dtype matches PyTorch (f32).
    return jnp.concatenate([inputs1_.astype(inputs2.dtype), inputs2], axis=1)
    # TODO(synk): 'bilinear'/'nearest' upsample_mode branch (Upsample + norm_layer) not implemented.
    # TODO(synk): if even the resident padded input overflows VMEM (extreme H*W*Cin), halo-tile
    # the input too (pl.Element window or manual DMA with memory_space=pl.ANY).


if __name__ == "__main__":
    key = jax.random.PRNGKey(0)
    k1, k2, kw, kb = jax.random.split(key, 4)

    N, C, H, W = 2, 8, 16, 16
    out_size = C  # same_num_filt=True -> num_filt == out_size
    inputs1 = jax.random.normal(k1, (N, C, H, W), jnp.float32)
    inputs2 = jax.random.normal(k2, (N, out_size, 2 * H, 2 * W), jnp.float32)
    # ConvTranspose2d params: weight (Cin, Cout, KH, KW), bias (Cout,)
    weight = jax.random.normal(kw, (C, out_size, K, K), jnp.float32) * 0.1
    bias = jax.random.normal(kb, (out_size,), jnp.float32) * 0.1

    fwd = jax.jit(unet_up_forward, static_argnames=("tile_rows",))
    out = jax.block_until_ready(fwd(inputs1, inputs2, weight, bias))            # auto tile
    out_tiled = jax.block_until_ready(fwd(inputs1, inputs2, weight, bias,
                                          tile_rows=8))                         # 2 row tiles
    assert out.shape == (N, 2 * out_size, 2 * H, 2 * W), out.shape

    # Reference on bf16-rounded inputs (the kernel feeds the MXU bf16 operands, accumulates
    # f32, and stores bf16).  Transposed conv == dilated conv with flipped, IO-swapped kernel.
    x_q = inputs1.astype(jnp.bfloat16).astype(jnp.float32)
    w_q = weight.astype(jnp.bfloat16).astype(jnp.float32)
    w_flip = jnp.flip(w_q, axis=(2, 3)).transpose(1, 0, 2, 3)   # (Cout, Cin, KH, KW)
    up_ref = jax.lax.conv_general_dilated(
        x_q, w_flip, window_strides=(1, 1),
        padding=((K - 1 - PAD, K - 1 - PAD),) * 2,
        lhs_dilation=(STRIDE, STRIDE),
        dimension_numbers=('NCHW', 'OIHW', 'NCHW'),
        precision=jax.lax.Precision.HIGHEST) + bias[None, :, None, None]
    ref = jnp.concatenate([up_ref, inputs2], axis=1)

    err = float(jnp.max(jnp.abs(out - ref)))
    err_tiled = float(jnp.max(jnp.abs(out_tiled - ref)))
    assert err < 3e-2 and err_tiled < 3e-2, (err, err_tiled)

    print("KERNEL_OK")
</pallas_src>

<mosaic_0001>
module attributes {stable_mosaic.version = 11 : i64} {
  func.func @_deconv_kernel(%arg0: i32, %arg1: i32, %arg2: memref<1x18x18x128xbf16, #tpu.memory_space<vmem>>, %arg3: memref<2x768x128xbf16, #tpu.memory_space<vmem>>, %arg4: memref<1x128xf32, #tpu.memory_space<vmem>>, %arg5: memref<1x2x256x128xbf16, #tpu.memory_space<vmem>>, %arg6: memref<256x1152xbf16, #tpu.memory_space<vmem>>) attributes {dimension_semantics = [#tpu.dimension_semantics<parallel>, #tpu.dimension_semantics<parallel>], iteration_bounds = array<i64: 2, 1>, scalar_prefetch = 0 : i64, scratch_operands = 1 : i64, tpu.core_type = #tpu.core_type<tc>, window_params = [{transform_indices = @transform_0, window_bounds = array<i64: 1, 18, 18, 128>}, {pipeline_mode = #tpu.pipeline_mode<synchronous>, transform_indices = @transform_1, window_bounds = array<i64: 2, 768, 128>}, {pipeline_mode = #tpu.pipeline_mode<synchronous>, transform_indices = @transform_2, window_bounds = array<i64: 1, 128>}, {transform_indices = @transform_3, window_bounds = array<i64: 1, 2, 256, 128>}]} {
    %c16_i32 = arith.constant 16 : i32
    %0 = arith.muli %arg1, %c16_i32 : i32
    %1 = tpu.assume_multiple %0, 16 : i32
    %c0 = arith.constant 0 : index
    %c0_0 = arith.constant 0 : index
    %2 = vector.load %arg4[%c0, %c0_0] : memref<1x128xf32, #tpu.memory_space<vmem>>, vector<1x128xf32>
    %c0_1 = arith.constant 0 : index
    %3 = arith.index_cast %1 : i32 to index
    %c0_2 = arith.constant 0 : index
    %c0_3 = arith.constant 0 : index
    %4 = vector.load %arg2[%c0_1, %3, %c0_2, %c0_3] : memref<1x18x18x128xbf16, #tpu.memory_space<vmem>>, vector<1x16x18x128xbf16>
    %5 = vector.shape_cast %4 : vector<1x16x18x128xbf16> to vector<16x18x128xbf16>
    %c1_i32 = arith.constant 1 : i32
    %6 = arith.addi %1, %c1_i32 : i32
    %c0_4 = arith.constant 0 : index
    %7 = arith.index_cast %6 : i32 to index
    %c0_5 = arith.constant 0 : index
    %c0_6 = arith.constant 0 : index
    %8 = vector.load %arg2[%c0_4, %7, %c0_5, %c0_6] : memref<1x18x18x128xbf16, #tpu.memory_space<vmem>>, vector<1x16x18x128xbf16>
    %9 = vector.shape_cast %8 : vector<1x16x18x128xbf16> to vector<16x18x128xbf16>
    %c2_i32 = arith.constant 2 : i32
    %10 = arith.addi %1, %c2_i32 : i32
    %c0_7 = arith.constant 0 : index
    %11 = arith.index_cast %10 : i32 to index
    %c0_8 = arith.constant 0 : index
    %c0_9 = arith.constant 0 : index
    %12 = vector.load %arg2[%c0_7, %11, %c0_8, %c0_9] : memref<1x18x18x128xbf16, #tpu.memory_space<vmem>>, vector<1x16x18x128xbf16>
    %13 = vector.shape_cast %12 : vector<1x16x18x128xbf16> to vector<16x18x128xbf16>
    %14 = vector.extract_strided_slice %5 {offsets = [0, 0, 0], sizes = [16, 16, 128], strides = [1, 1, 1]} : vector<16x18x128xbf16> to vector<16x16x128xbf16>
    %15 = vector.shape_cast %14 : vector<16x16x128xbf16> to vector<256x128xbf16>
    %c0_10 = arith.constant 0 : index
    %c0_11 = arith.constant 0 : index
    %16 = vector.load %arg6[%c0_10, %c0_11] : memref<256x1152xbf16, #tpu.memory_space<vmem>>, vector<256x128xbf16>
    tpu.vector_store %arg6[%c0_10, %c0_11], %15 {strides = array<i32>} : memref<256x1152xbf16, #tpu.memory_space<vmem>>, vector<256x128xbf16>,
    %17 = vector.extract_strided_slice %5 {offsets = [0, 1, 0], sizes = [16, 16, 128], strides = [1, 1, 1]} : vector<16x18x128xbf16> to vector<16x16x128xbf16>
    %18 = vector.shape_cast %17 : vector<16x16x128xbf16> to vector<256x128xbf16>
    %c0_12 = arith.constant 0 : index
    %c128 = arith.constant 128 : index
    %19 = vector.load %arg6[%c0_12, %c128] : memref<256x1152xbf16, #tpu.memory_space<vmem>>, vector<256x128xbf16>
    tpu.vector_store %arg6[%c0_12, %c128], %18 {strides = array<i32>} : memref<256x1152xbf16, #tpu.memory_space<vmem>>, vector<256x128xbf16>,
    %20 = vector.extract_strided_slice %5 {offsets = [0, 2, 0], sizes = [16, 16, 128], strides = [1, 1, 1]} : vector<16x18x128xbf16> to vector<16x16x128xbf16>
    %21 = vector.shape_cast %20 : vector<16x16x128xbf16> to vector<256x128xbf16>
    %c0_13 = arith.constant 0 : index
    %c256 = arith.constant 256 : index
    %22 = vector.load %arg6[%c0_13, %c256] : memref<256x1152xbf16, #tpu.memory_space<vmem>>, vector<256x128xbf16>
    tpu.vector_store %arg6[%c0_13, %c256], %21 {strides = array<i32>} : memref<256x1152xbf16, #tpu.memory_space<vmem>>, vector<256x128xbf16>,
    %23 = vector.extract_strided_slice %9 {offsets = [0, 0, 0], sizes = [16, 16, 128], strides = [1, 1, 1]} : vector<16x18x128xbf16> to vector<16x16x128xbf16>
    %24 = vector.shape_cast %23 : vector<16x16x128xbf16> to vector<256x128xbf16>
    %c0_14 = arith.constant 0 : index
    %c384 = arith.constant 384 : index
    %25 = vector.load %arg6[%c0_14, %c384] : memref<256x1152xbf16, #tpu.memory_space<vmem>>, vector<256x128xbf16>
    tpu.vector_store %arg6[%c0_14, %c384], %24 {strides = array<i32>} : memref<256x1152xbf16, #tpu.memory_space<vmem>>, vector<256x128xbf16>,
    %26 = vector.extract_strided_slice %9 {offsets = [0, 1, 0], sizes = [16, 16, 128], strides = [1, 1, 1]} : vector<16x18x128xbf16> to vector<16x16x128xbf16>
    %27 = vector.shape_cast %26 : vector<16x16x128xbf16> to vector<256x128xbf16>
    %c0_15 = arith.constant 0 : index
    %c512 = arith.constant 512 : index
    %28 = vector.load %arg6[%c0_15, %c512] : memref<256x1152xbf16, #tpu.memory_space<vmem>>, vector<256x128xbf16>
    tpu.vector_store %arg6[%c0_15, %c512], %27 {strides = array<i32>} : memref<256x1152xbf16, #tpu.memory_space<vmem>>, vector<256x128xbf16>,
    %29 = vector.extract_strided_slice %9 {offsets = [0, 2, 0], sizes = [16, 16, 128], strides = [1, 1, 1]} : vector<16x18x128xbf16> to vector<16x16x128xbf16>
    %30 = vector.shape_cast %29 : vector<16x16x128xbf16> to vector<256x128xbf16>
    %c0_16 = arith.constant 0 : index
    %c640 = arith.constant 640 : index
    %31 = vector.load %arg6[%c0_16, %c640] : memref<256x1152xbf16, #tpu.memory_space<vmem>>, vector<256x128xbf16>
    tpu.vector_store %arg6[%c0_16, %c640], %30 {strides = array<i32>} : memref<256x1152xbf16, #tpu.memory_space<vmem>>, vector<256x128xbf16>,
    %32 = vector.extract_strided_slice %13 {offsets = [0, 0, 0], sizes = [16, 16, 128], strides = [1, 1, 1]} : vector<16x18x128xbf16> to vector<16x16x128xbf16>
    %33 = vector.shape_cast %32 : vector<16x16x128xbf16> to vector<256x128xbf16>
    %c0_17 = arith.constant 0 : index
    %c768 = arith.constant 768 : index
    %34 = vector.load %arg6[%c0_17, %c768] : memref<256x1152xbf16, #tpu.memory_space<vmem>>, vector<256x128xbf16>
    tpu.vector_store %arg6[%c0_17, %c768], %33 {strides = array<i32>} : memref<256x1152xbf16, #tpu.memory_space<vmem>>, vector<256x128xbf16>,
    %35 = vector.extract_strided_slice %13 {offsets = [0, 1, 0], sizes = [16, 16, 128], strides = [1, 1, 1]} : vector<16x18x128xbf16> to vector<16x16x128xbf16>
    %36 = vector.shape_cast %35 : vector<16x16x128xbf16> to vector<256x128xbf16>
    %c0_18 = arith.constant 0 : index
    %c896 = arith.constant 896 : index
    %37 = vector.load %arg6[%c0_18, %c896] : memref<256x1152xbf16, #tpu.memory_space<vmem>>, vector<256x128xbf16>
    tpu.vector_store %arg6[%c0_18, %c896], %36 {strides = array<i32>} : memref<256x1152xbf16, #tpu.memory_space<vmem>>, vector<256x128xbf16>,
    %38 = vector.extract_strided_slice %13 {offsets = [0, 2, 0], sizes = [16, 16, 128], strides = [1, 1, 1]} : vector<16x18x128xbf16> to vector<16x16x128xbf16>
    %39 = vector.shape_cast %38 : vector<16x16x128xbf16> to vector<256x128xbf16>
    %c0_19 = arith.constant 0 : index
    %c1024 = arith.constant 1024 : index
    %40 = vector.load %arg6[%c0_19, %c1024] : memref<256x1152xbf16, #tpu.memory_space<vmem>>, vector<256x128xbf16>
    tpu.vector_store %arg6[%c0_19, %c1024], %39 {strides = array<i32>} : memref<256x1152xbf16, #tpu.memory_space<vmem>>, vector<256x128xbf16>,
    %c0_20 = arith.constant 0 : index
    %c0_21 = arith.constant 0 : index
    %41 = vector.load %arg6[%c0_20, %c0_21] : memref<256x1152xbf16, #tpu.memory_space<vmem>>, vector<256x768xbf16>
    %c0_22 = arith.constant 0 : index
    %c0_23 = arith.constant 0 : index
    %c0_24 = arith.constant 0 : index
    %42 = vector.load %arg3[%c0_22, %c0_23, %c0_24] : memref<2x768x128xbf16, #tpu.memory_space<vmem>>, vector<1x768x128xbf16>
    %43 = vector.shape_cast %42 : vector<1x768x128xbf16> to vector<768x128xbf16>
    %cst = arith.constant dense<0.000000e+00> : vector<256x128xf32>
    %44 = tpu.matmul %41, %43, %cst {dimension_numbers = #tpu.dot_dimension_numbers<[1], [0], [0], [1], [0, 0, 1, 1], [], []>} : vector<256x768xbf16>, vector<768x128xbf16>, vector<256x128xf32> -> vector<256x128xf32>
    %45 = vector.broadcast %2 : vector<1x128xf32> to vector<256x128xf32>
    %46 = arith.addf %44, %45 : vector<256x128xf32>
    %47 = arith.truncf %46 : vector<256x128xf32> to vector<256x128xbf16>
    %c0_25 = arith.constant 0 : index
    %c0_26 = arith.constant 0 : index
    %c0_27 = arith.constant 0 : index
    %c0_28 = arith.constant 0 : index
    %48 = vector.load %arg5[%c0_25, %c0_26, %c0_27, %c0_28] : memref<1x2x256x128xbf16, #tpu.memory_space<vmem>>, vector<1x1x256x128xbf16>
    %49 = vector.shape_cast %48 : vector<1x1x256x128xbf16> to vector<256x128xbf16>
    %50 = vector.shape_cast %47 : vector<256x128xbf16> to vector<1x1x256x128xbf16>
    tpu.vector_store %arg5[%c0_25, %c0_26, %c0_27, %c0_28], %50 {strides = array<i32>} : memref<1x2x256x128xbf16, #tpu.memory_space<vmem>>, vector<1x1x256x128xbf16>,
    %c0_29 = arith.constant 0 : index
    %c384_30 = arith.constant 384 : index
    %51 = vector.load %arg6[%c0_29, %c384_30] : memref<256x1152xbf16, #tpu.memory_space<vmem>>, vector<256x768xbf16>
    %c1 = arith.constant 1 : index
    %c0_31 = arith.constant 0 : index
    %c0_32 = arith.constant 0 : index
    %52 = vector.load %arg3[%c1, %c0_31, %c0_32] : memref<2x768x128xbf16, #tpu.memory_space<vmem>>, vector<1x768x128xbf16>
    %53 = vector.shape_cast %52 : vector<1x768x128xbf16> to vector<768x128xbf16>
    %cst_33 = arith.constant dense<0.000000e+00> : vector<256x128xf32>
    %54 = tpu.matmul %51, %53, %cst_33 {dimension_numbers = #tpu.dot_dimension_numbers<[1], [0], [0], [1], [0, 0, 1, 1], [], []>} : vector<256x768xbf16>, vector<768x128xbf16>, vector<256x128xf32> -> vector<256x128xf32>
    %55 = vector.broadcast %2 : vector<1x128xf32> to vector<256x128xf32>
    %56 = arith.addf %54, %55 : vector<256x128xf32>
    %57 = arith.truncf %56 : vector<256x128xf32> to vector<256x128xbf16>
    %c0_34 = arith.constant 0 : index
    %c1_35 = arith.constant 1 : index
    %c0_36 = arith.constant 0 : index
    %c0_37 = arith.constant 0 : index
    %58 = vector.load %arg5[%c0_34, %c1_35, %c0_36, %c0_37] : memref<1x2x256x128xbf16, #tpu.memory_space<vmem>>, vector<1x1x256x128xbf16>
    %59 = vector.shape_cast %58 : vector<1x1x256x128xbf16> to vector<256x128xbf16>
    %60 = vector.shape_cast %57 : vector<256x128xbf16> to vector<1x1x256x128xbf16>
    tpu.vector_store %arg5[%c0_34, %c1_35, %c0_36, %c0_37], %60 {strides = array<i32>} : memref<1x2x256x128xbf16, #tpu.memory_space<vmem>>, vector<1x1x256x128xbf16>,
    return
  }
  func.func @transform_0(%arg0: i32, %arg1: i32) -> (i32, i32, i32, i32) {
    %c0_i32 = arith.constant 0 : i32
    %c0_i32_0 = arith.constant 0 : i32
    %c0_i32_1 = arith.constant 0 : i32
    %c0_i32_2 = arith.constant 0 : i32
    return %arg0, %c0_i32, %c0_i32_0, %c0_i32_1 : i32, i32, i32, i32
  }
  func.func @transform_1(%arg0: i32, %arg1: i32) -> (i32, i32, i32) {
    %c0_i32 = arith.constant 0 : i32
    %c0_i32_0 = arith.constant 0 : i32
    %c0_i32_1 = arith.constant 0 : i32
    %c0_i32_2 = arith.constant 0 : i32
    return %c0_i32, %c0_i32_0, %c0_i32_1 : i32, i32, i32
  }
  func.func @transform_2(%arg0: i32, %arg1: i32) -> (i32, i32) {
    %c0_i32 = arith.constant 0 : i32
    %c0_i32_0 = arith.constant 0 : i32
    %c0_i32_1 = arith.constant 0 : i32
    return %c0_i32, %c0_i32_0 : i32, i32
  }
  func.func @transform_3(%arg0: i32, %arg1: i32) -> (i32, i32, i32, i32) {
    %c0_i32 = arith.constant 0 : i32
    %c0_i32_0 = arith.constant 0 : i32
    %c0_i32_1 = arith.constant 0 : i32
    return %arg0, %c0_i32, %arg1, %c0_i32_0 : i32, i32, i32, i32
  }
}

</mosaic_0001>

<bundles_post_ra>
// kernel: unet_up_forward.1
= control target key start
LH: loop header
LB: loop body
LE: loop exit
PB: predicated region body
PF: predicated region fallthrough
CT: control target
= control target key end

     0   :  { %s7778_s12 = smov 0   ;;  %s7780_s13 = smov 0   ;;  %s9419_s0 = inlined_call_operand.vmem [shape: bf16[2,18,18,128], index: 0, kind: input, shape index: {}]   ;;  %s9420_s1 = inlined_call_operand.vmem [shape: bf16[2,768,128], index: 1, kind: input, shape index: {}]   ;;  %s9421_s2 = inlined_call_operand.vmem [shape: f32[1,128], index: 2, kind: input, shape index: {}]   ;;  %s9422_s3 = inlined_call_operand.vmem [shape: bf16[2,2,256,128], index: 3, kind: output, shape index: {}]  }
   0x1   :  { %s7782_s14 = smov 0  }
   0x2 LB: > { %s25_s15 = sadd.s32 1, %s7752_s13  ;;  %p5779_p0 = scmp.ge.s32.totalorder %s7756_s14, 1  ;;  %s7756_s14 = sphi %s7782_s14, %s13_s14   ;;  %s7752_s13 = sphi %s7780_s13, %s9436_s13   ;;  %s7748_s12 = sphi %s7778_s12, %s9435_s12  }
   0x3   : > { %p27_p1 = scmp.ge.s32.totalorder %s25_s15, 2  ;;  %p151_p2 = scmp.lt.s32.totalorder %s7756_s14, 3 }
   0x5   : > { %s9438_s15 = smov (%p27_p1, %s25_s15), 0  ;;  %p152_p3 = pnand %p5779_p0, %p151_p2 }
   0x7   : > { %155 = sbr.rel (%p152_p3) target bundleno = 643 (0x283), region = 32 }
   0xc   : > { %v7363_v0 = vld [vmem:[%s9420_s1 + $0x78] sm:$0xff]   ;;  %v7367_v4 = vld [vmem:[%s9420_s1 + $0x70] sm:$0xff]   ;;  %v7371_v8 = vld [vmem:[%s9420_s1 + $0x68] sm:$0xff]   ;;  %p179_p4 = scmp.lt.s32.totalorder %s7748_s12, 1  ;;  %vm883_vm0 = vcmask 1042432   ;;  %vm884_vm1 = vcmask 1046532  }
   0xd   : > { %v7364_v1 = vld [vmem:[%s9420_s1 + $0xf8] sm:$0xff]   ;;  %6666 = vmatprep.subr.bf16.mxu0 %v7363_v0  ;;  %v7368_v5 = vld [vmem:[%s9420_s1 + $0xf0] sm:$0xff]   ;;  %v7372_v9 = vld [vmem:[%s9420_s1 + $0xe8] sm:$0xff]   ;;  %vm384_vm2 = vsmask.f32 3328 }
   0xe   : > { %v7365_v2 = vld [vmem:[%s9420_s1 + $0x38] sm:$0xff]   ;;  %6778 = vmatprep.subr.bf16.mxu1 %v7364_v1  ;;  %v7369_v6 = vld [vmem:[%s9420_s1 + $0x30] sm:$0xff]   ;;  %v7373_v10 = vld [vmem:[%s9420_s1 + $0x28] sm:$0xff]   ;;  %s9440_s12 = smov (!%p179_p4, %s7748_s12), 1  ;;  %vm385_vm3 = vsmask.f32 7440 }
   0xf   : > { %v7366_v3 = vld [vmem:[%s9420_s1 + $0xb8] sm:$0xff]   ;;  %6667 = vmatpush3.bf16.msra.mxu0 %v7365_v2  ;;  %v7370_v7 = vld [vmem:[%s9420_s1 + $0xb0] sm:$0xff]   ;;  %v7374_v11 = vld [vmem:[%s9420_s1 + $0xa8] sm:$0xff]   ;;  %s7338_s22 = smul.u32 216, %s9440_s12  ;;  %s6410_s11 = sshll.u32 %s9440_s12, 8 }
  0x10   : > { %6779 = vmatpush3.bf16.msra.mxu1 %v7366_v3  ;;  %6668 = vmatprep.subr.bf16.mxu0 %v7367_v4  ;;  %v7375_v12 = vld [vmem:[%s9420_s1 + $0x60] sm:$0xff]   ;;  %v7379_v16 = vld [vmem:[%s9420_s1 + $0x58] sm:$0xff]   ;;  %v7383_v20 = vld [vmem:[%s9420_s1 + $0x50] sm:$0xff]   ;;  %s9206_s17 = scalar_lea.vmem %s9422_s3, %s6410_s11 }
  0x11   : > { %6780 = vmatprep.subr.bf16.mxu1 %v7368_v5  ;;  %v7376_v13 = vld [vmem:[%s9420_s1 + $0xe0] sm:$0xff]   ;;  %v7380_v17 = vld [vmem:[%s9420_s1 + $0xd8] sm:$0xff]   ;;  %v7384_v21 = vld [vmem:[%s9420_s1 + $0xd0] sm:$0xff]   ;;  %s7896_s6 = scalar_lea.vmem %s9419_s0, %s7338_s22 }
  0x12   : > { %v7377_v14 = vld [vmem:[%s9420_s1 + $0x20] sm:$0xff]   ;;  %v7381_v18 = vld [vmem:[%s9420_s1 + $0x18] sm:$0xff]   ;;  %v7385_v22 = vld [vmem:[%s9420_s1 + $0x10] sm:$0xff]  }
  0x13   : > { %6669 = vmatpush3.bf16.msra.mxu0 %v7369_v6  ;;  %v7378_v15 = vld [vmem:[%s9420_s1 + $0xa0] sm:$0xff]   ;;  %v7382_v19 = vld [vmem:[%s9420_s1 + $0x98] sm:$0xff]   ;;  %v7386_v23 = vld [vmem:[%s9420_s1 + $0x90] sm:$0xff]  }
  0x14   : > { %6781 = vmatpush3.bf16.msra.mxu1 %v7370_v7  ;;  %6670 = vmatprep.subr.bf16.mxu0 %v7371_v8  ;;  %v7387_v24 = vld [vmem:[%s9420_s1 + $0x48] sm:$0xff]   ;;  %v7391_v28 = vld [vmem:[%s9420_s1 + $0x40] sm:$0xff]   ;;  %vm7912_vm4 = vmor %vm883_vm0, %vm884_vm1 }
  0x15   : > { %6782 = vmatprep.subr.bf16.mxu1 %v7372_v9  ;;  %v7388_v25 = vld [vmem:[%s9420_s1 + $0xc8] sm:$0xff]   ;;  %v7392_v29 = vld [vmem:[%s9420_s1 + $0xc0] sm:$0xff]   ;;  %v7917_v45 = vld [vmem:[%s7896_s6 + $0x10] sm:$0xf] }
  0x16   : > { %v7389_v26 = vld [vmem:[%s9420_s1 + $0x8] sm:$0xff]   ;;  %v7393_v30 = vld [vmem:[%s9420_s1] sm:$0xff]   ;;  %1063 = vst [vmem:[#allocation2 + $0x30] sm:$0xf] %v7917_v45  ;;  %v7401_v56 = vld [vmem:[%s9420_s1 + $0x178] sm:$0xff]   ;;  %v1104_v60 = vshll.u32 %v7917_v45, 16 }
  0x17   : > { %6671 = vmatpush3.bf16.msra.mxu0 %v7373_v10  ;;  %v7390_v27 = vld [vmem:[%s9420_s1 + $0x88] sm:$0xff]   ;;  %v7394_v31 = vld [vmem:[%s9420_s1 + $0x80] sm:$0xff]   ;;  %vm7930_vm5 = vmor %vm384_vm2, %vm385_vm3  ;;  %v1108_v61 = vshrl.u32 %v7917_v45, 16  ;;  %v1592_v6 = vrot.slane %v7917_v45, 5 }
  0x18   : > { %6783 = vmatpush3.bf16.msra.mxu1 %v7374_v11  ;;  %6672 = vmatprep.subr.bf16.mxu0 %v7375_v12  ;;  %v200_v32 = vld [vmem:[%s7896_s6] sm:$0xf]  ;;  %v201_v33 = vld [vmem:[%s7896_s6 + $0x4] sm:$0xf]  ;;  %v202_v34 = vld [vmem:[%s7896_s6 + $0x8] sm:$0x1] }
  0x19   : > { %6784 = vmatprep.subr.bf16.mxu1 %v7376_v13  ;;  %352 = vst [vmem:[#allocation2] sm:$0xf] %v200_v32  ;;  %353 = vst [vmem:[#allocation2 + $0x24] sm:$0xf] %v201_v33  ;;  %v388_v35 = vshrl.u32 %v200_v32, 16  ;;  %v391_v36 = vshll.u32 %v200_v32, 16 }
  0x1a   : > { %v397_v37 = vshll.u32 %v201_v33, 16  ;;  %v401_v38 = vshrl.u32 %v201_v33, 16  ;;  %v407_v39 = vshll.u32 %v202_v34, 16  ;;  %v7908_v40 = vld [vmem:[%s7896_s6 + $0xc] sm:$0xf]  ;;  %v5879_v42 = vrot.slane %v200_v32, 9 }
  0x1b   : > { %6673 = vmatpush3.bf16.msra.mxu0 %v7377_v14  ;;  %v390_v43 = vrot.slane %v388_v35, 4  ;;  %v393_v44 = vrot.slane %v391_v36, 5  ;;  %v888_v46 = vrot.slane %v201_v33, 5  ;;  %v891_v47 = vrot.slane %v202_v34, 5  ;;  %1062 = vst [vmem:[#allocation2 + $0xc] sm:$0xf] %v7908_v40 }
  0x1c   : > { %6785 = vmatpush3.bf16.msra.mxu1 %v7378_v15  ;;  %6674 = vmatprep.subr.bf16.mxu0 %v7379_v16  ;;  %v399_v48 = vrot.slane %v397_v37, 5  ;;  %v403_v49 = vrot.slane %v401_v38, 4  ;;  %v409_v50 = vrot.slane %v407_v39, 5  ;;  %v1095_v51 = vshrl.u32 %v7908_v40, 16  ;;  %v7403_v62 = vld [vmem:[%s9420_s1 + $0x1f8] sm:$0xff]  }
  0x1d   : > { %6786 = vmatprep.subr.bf16.mxu1 %v7380_v17  ;;  %v394_v52 = vor.u32 %v393_v44, %v390_v43  ;;  %v889_v53 = vsel %vm7912_vm4, %v5879_v42, %v888_v46  ;;  %v890_v54 = vrot.slane %v888_v46, 4  ;;  %v1098_v55 = vshll.u32 %v7908_v40, 16  ;;  %v203_v9 = vld [vmem:[%s7896_s6 + $0xc] sm:$0xf]  ;;  %v204_v10 = vld [vmem:[%s7896_s6 + $0x10] sm:$0xf] }
  0x1e   : > { %v404_v58 = vor.u32 %v403_v49, %v399_v48  ;;  %1030 = vst [vmem:[#allocation2 + $0x8] sm:$0xf] %v889_v53  ;;  %v7934_v59 = vrot.slane %v1095_v51, 4  ;;  %v5895_v2 = vrot.slane %v7908_v40, 9  ;;  %v7946_v4 = vrot.slane %v1104_v60, 5  ;;  %v7402_v39 = vld [vmem:[%s9420_s1 + $0x138] sm:$0xff]  }
  0x1f   : > { %6675 = vmatpush3.bf16.msra.mxu0 %v7381_v18  ;;  %v395_v63 = vrot.slane %v394_v52, 4  ;;  %v892_v0 = vsel %vm7912_vm4, %v890_v54, %v891_v47  ;;  %v7943_v1 = vrot.slane %v1098_v55, 5  ;;  %v7948_v5 = vrot.slane %v1108_v61, 4  ;;  %v205_v11 = vld [vmem:[%s7896_s6 + $0x14] sm:$0x1] }
  0x20   : > { %6787 = vmatpush3.bf16.msra.mxu1 %v7382_v19  ;;  %6676 = vmatprep.subr.bf16.mxu0 %v7383_v20  ;;  %v405_v3 = vrot.slane %v404_v58, 4  ;;  %1031 = vst [vmem:[#allocation2 + $0x2c] sm:$0xf] %v892_v0  ;;  %354 = vst [vmem:[#allocation2 + $0x48] sm:$0xf] %v203_v9  ;;  %v412_v13 = vshrl.u32 %v203_v9, 16  ;;  %v1593_v33 = vsel %vm7912_vm4, %v5895_v2, %v1592_v6 }
  0x21   : > { %6788 = vmatprep.subr.bf16.mxu1 %v7384_v21  ;;  %v400_v7 = vsel %vm7930_vm5, %v395_v63, %v399_v48  ;;  %v1111_v12 = vor.u32 %v7948_v5, %v7946_v4  ;;  %355 = vst [vmem:[#allocation2 + $0x6c] sm:$0xf] %v204_v10  ;;  %v415_v14 = vshll.u32 %v203_v9, 16  ;;  %v421_v15 = vshll.u32 %v204_v10, 16  ;;  %v7961_v17 = vld [vmem:[%s7896_s6 + $0x18] sm:$0xf] }
  0x22   : > { %v410_v8 = vsel %vm7930_vm5, %v405_v3, %v409_v50  ;;  %803 = vst [vmem:[#allocation2 + $0x4] sm:$0xf] %v400_v7  ;;  %v425_v16 = vshrl.u32 %v204_v10, 16  ;;  %v431_v18 = vshll.u32 %v205_v11, 16  ;;  %v7964_v19 = vld [vmem:[%s7896_s6 + $0x1c] sm:$0xf] }
  0x23   : > { %6677 = vmatpush3.bf16.msra.mxu0 %v7385_v22  ;;  %804 = vst [vmem:[#allocation2 + $0x28] sm:$0xf] %v410_v8  ;;  %v5880_v20 = vrot.slane %v203_v9, 9  ;;  %v895_v21 = vrot.slane %v204_v10, 5  ;;  %v898_v22 = vrot.slane %v205_v11, 5  ;;  %v7415_v51 = vld [vmem:[%s9420_s1 + $0x170] sm:$0xff]   ;;  %v1101_v9 = vor.u32 %v7943_v1, %v7934_v59 }
  0x24   : > { %6789 = vmatpush3.bf16.msra.mxu1 %v7386_v23  ;;  %6678 = vmatprep.subr.bf16.mxu0 %v7387_v24  ;;  %1064 = vst [vmem:[#allocation2 + $0x54] sm:$0xf] %v7961_v17  ;;  %v7404_v23 = vld [vmem:[%s9420_s1 + $0x1b8] sm:$0xff]   ;;  %v414_v24 = vrot.slane %v412_v13, 4  ;;  %1065 = vst [vmem:[#allocation2 + $0x78] sm:$0xf] %v7964_v19 }
  0x25   : > { %6790 = vmatprep.subr.bf16.mxu1 %v7388_v25  ;;  %v417_v25 = vrot.slane %v415_v14, 5  ;;  %v207_v32 = vld [vmem:[%s7896_s6 + $0x1c] sm:$0xf]  ;;  %v7400_v35 = vld [vmem:[#allocation2 + $0xc] ss:$36 sps:$4 sm:$0xff]  }
  0x26   : > { %357 = vst [vmem:[#allocation2 + $0xb4] sm:$0xf] %v207_v32  ;;  %1734 = vst [vmem:[#allocation2 + $0x14] sm:$0xf] %v1593_v33  ;;  %v208_v42 = vld [vmem:[%s7896_s6 + $0x20] sm:$0x1]  ;;  %3629 = vmatprep.mubr.bf16.mxu1 %v7400_v35 }
  0x27   : > { %6679 = vmatpush3.bf16.msra.mxu0 %v7389_v26  ;;  %v423_v26 = vrot.slane %v421_v15, 5  ;;  %v7398_v34 = vld [vmem:[#allocation2 + $0x8] ss:$36 sps:$4 sm:$0xff]   ;;  %v418_v36 = vor.u32 %v417_v25, %v414_v24  ;;  %v445_v44 = vshll.u32 %v207_v32, 16  ;;  %v449_v46 = vshrl.u32 %v207_v32, 16  ;;  %v7417_v52 = vld [vmem:[%s9420_s1 + $0x1f0] sm:$0xff]  }
  0x28   : > { %6791 = vmatpush3.bf16.msra.mxu1 %v7390_v27  ;;  %6680 = vmatprep.subr.bf16.mxu0 %v7391_v28  ;;  %v427_v27 = vrot.slane %v425_v16, 4  ;;  %v433_v28 = vrot.slane %v431_v18, 5  ;;  %v455_v50 = vshll.u32 %v208_v42, 16  ;;  %v7395_v53 = vld [vmem:[#allocation2] ss:$36 sps:$4 sm:$0xff]   ;;  %v902_v3 = vrot.slane %v207_v32, 5 }
  0x29   : > { %6792 = vmatprep.subr.bf16.mxu1 %v7392_v29  ;;  %v896_v29 = vsel %vm7912_vm4, %v5880_v20, %v895_v21  ;;  %v419_v47 = vrot.slane %v418_v36, 4  ;;  %v447_v60 = vrot.slane %v445_v44, 5  ;;  %v451_v61 = vrot.slane %v449_v46, 4  ;;  %v7999_v63 = vld [vmem:[%s7896_s6 + $0x28] sm:$0xf]  ;;  %v7416_v7 = vld [vmem:[%s9420_s1 + $0x130] sm:$0xff]  }
  0x2a   : > { %v428_v37 = vor.u32 %v427_v27, %v423_v26  ;;  %1032 = vst [vmem:[#allocation2 + $0x50] sm:$0xf] %v896_v29  ;;  %v7397_v54 = vld [vmem:[#allocation2 + $0x4] ss:$36 sps:$4 sm:$0xff]   ;;  %1067 = vst [vmem:[#allocation2 + $0xc0] sm:$0xf] %v7999_v63 }
  0x2b   : > { %6681 = vmatpush3.bf16.msra.mxu0 %v7393_v30  ;;  %v897_v30 = vrot.slane %v895_v21, 4  ;;  %3468 = vmatprep.mubr.bf16.mxu0 %v7397_v54  ;;  %v7418_v8 = vld [vmem:[%s9420_s1 + $0x1b0] sm:$0xff]   ;;  %v452_v10 = vor.u32 %v451_v61, %v447_v60  ;;  %v457_v11 = vrot.slane %v455_v50, 5  ;;  %v905_v13 = vrot.slane %v208_v42, 5  ;;  %v7429_v18 = vld [vmem:[%s9420_s1 + $0x168] sm:$0xff]  }
  0x2c   : > { %6793 = vmatpush3.bf16.msra.mxu1 %v7394_v31  ;;  %6890 = vmatprep.subr.bf16.mxu0 %v7401_v56  ;;  %v206_v31 = vld [vmem:[%s7896_s6 + $0x18] sm:$0xf]  ;;  %v429_v48 = vrot.slane %v428_v37, 4  ;;  %v424_v56 = vsel %vm7930_vm5, %v419_v47, %v423_v26  ;;  %v904_v16 = vrot.slane %v902_v3, 4  ;;  %v7431_v59 = vld [vmem:[%s9420_s1 + $0x1e8] sm:$0xff]   ;;  %v1102_v24 = vrot.slane %v1101_v9, 4 }
  0x2d   : > { %7002 = vmatprep.subr.bf16.mxu1 %v7403_v62  ;;  %356 = vst [vmem:[#allocation2 + $0x90] sm:$0xf] %v206_v31  ;;  %v436_v38 = vshrl.u32 %v206_v31, 16  ;;  %v899_v40 = vsel %vm7912_vm4, %v897_v30, %v898_v22  ;;  %v439_v43 = vshll.u32 %v206_v31, 16  ;;  %v7996_v62 = vld [vmem:[%s7896_s6 + $0x24] sm:$0xf] }
  0x2e   : > { %1033 = vst [vmem:[#allocation2 + $0x74] sm:$0xf] %v899_v40  ;;  %v434_v58 = vsel %vm7930_vm5, %v429_v48, %v433_v28  ;;  %805 = vst [vmem:[#allocation2 + $0x4c] sm:$0xf] %v424_v56  ;;  %v5881_v2 = vrot.slane %v206_v31, 9  ;;  %3469 = vmatmul.mubr.bf16.vlgmr.msra.gmra.mxu0 %v7395_v53  ;;  %v453_v20 = vrot.slane %v452_v10, 4  ;;  %v1107_v32 = vsel %vm7930_vm5, %v1102_v24, %v7946_v4 }
  0x2f   : > { %v438_v49 = vrot.slane %v436_v38, 4  ;;  %3630 = vmatmul.mubr.bf16.vlgmr.msra.gmra.mxu1 %v7398_v34  ;;  %v441_v55 = vrot.slane %v439_v43, 5  ;;  %806 = vst [vmem:[#allocation2 + $0x70] sm:$0xf] %v434_v58  ;;  %1066 = vst [vmem:[#allocation2 + $0x9c] sm:$0xf] %v7996_v62  ;;  %6891 = vmatpush3.bf16.msra.mxu0 %v7402_v39 }
  0x30   : > { %7003 = vmatpush3.bf16.msra.mxu1 %v7404_v23  ;;  %v903_v15 = vsel %vm7912_vm4, %v5881_v2, %v902_v3  ;;  %6892 = vmatprep.subr.bf16.mxu0 %v7415_v51  ;;  %v7407_v1 = vld [vmem:[#allocation2 + $0x54] ss:$36 sps:$4 sm:$0xff]   ;;  %v906_v23 = vsel %vm7912_vm4, %v904_v16, %v905_v13  ;;  %v458_v25 = vsel %vm7930_vm5, %v453_v20, %v457_v11  ;;  %v209_v26 = vld [vmem:[%s7896_s6 + $0x24] sm:$0xf]  ;;  %v7430_v27 = vld [vmem:[%s9420_s1 + $0x128] sm:$0xff]  }
  0x31   : > { %v442_v0 = vor.u32 %v441_v55, %v438_v49  ;;  %7004 = vmatprep.subr.bf16.mxu1 %v7417_v52  ;;  %1034 = vst [vmem:[#allocation2 + $0x98] sm:$0xf] %v903_v15  ;;  %1035 = vst [vmem:[#allocation2 + $0xbc] sm:$0xf] %v906_v23  ;;  %3637 = vmatprep.mubr.bf16.mxu1 %v7407_v1  ;;  %v210_v28 = vld [vmem:[%s7896_s6 + $0x28] sm:$0xf] }
  0x32   : > { %808 = vst [vmem:[#allocation2 + $0xb8] sm:$0xf] %v458_v25  ;;  %v211_v29 = vld [vmem:[%s7896_s6 + $0x2c] sm:$0x1]  ;;  %358 = vst [vmem:[#allocation2 + $0xd8] sm:$0xf] %v209_v26 }
  0x33   : > { %v443_v14 = vrot.slane %v442_v0, 4  ;;  %6893 = vmatpush3.bf16.msra.mxu0 %v7416_v7  ;;  %v460_v30 = vshrl.u32 %v209_v26, 16  ;;  %v463_v31 = vshll.u32 %v209_v26, 16  ;;  %359 = vst [vmem:[#allocation2 + $0xfc] sm:$0xf] %v210_v28  ;;  %v469_v36 = vshll.u32 %v210_v28, 16 }
  0x34   : > { %7005 = vmatpush3.bf16.msra.mxu1 %v7418_v8  ;;  %v473_v37 = vshrl.u32 %v210_v28, 16  ;;  %6894 = vmatprep.subr.bf16.mxu0 %v7429_v18  ;;  %1510 = vst [vmem:[#allocation2 + $0x10] sm:$0xf] %v1107_v32  ;;  %v479_v42 = vshll.u32 %v211_v29, 16  ;;  %v8035_v43 = vld [vmem:[%s7896_s6 + $0x30] sm:$0xf] }
  0x35   : > { %v7409_v21 = vld [vmem:[#allocation2 + $0x50] ss:$36 sps:$4 sm:$0xff]   ;;  %v448_v22 = vsel %vm7930_vm5, %v443_v14, %v447_v60  ;;  %7006 = vmatprep.subr.bf16.mxu1 %v7431_v59  ;;  %v2476_v33 = vld [vmem:[#allocation2 + $0x48] sm:$0xff]  ;;  %v462_v39 = vrot.slane %v460_v30, 4  ;;  %v465_v40 = vrot.slane %v463_v31, 5  ;;  %v471_v46 = vrot.slane %v469_v36, 5 }
  0x36   : > { %807 = vst [vmem:[#allocation2 + $0x94] sm:$0xf] %v448_v22  ;;  %v2479_v34 = vld [vmem:[#allocation2 + $0x6c] sm:$0xff]  ;;  %v475_v47 = vrot.slane %v473_v37, 4  ;;  %v8041_v48 = vld [vmem:[%s7896_s6 + $0x34] sm:$0xf] }
  0x37   : > { %v7405_v35 = vld [vmem:[#allocation2 + $0x4c] ss:$36 sps:$4 sm:$0xff]   ;;  %3638 = vmatmul.mubr.bf16.gmra.mxu1 %v7409_v21  ;;  %v5934_v38 = vcombine.low %v2476_v33, %v2479_v34  ;;  %v5882_v49 = vrot.slane %v209_v26, 9  ;;  %v909_v50 = vrot.slane %v210_v28, 5  ;;  %1068 = vst [vmem:[#allocation2 + $0xe4] sm:$0xf] %v8035_v43  ;;  %v466_v51 = vor.u32 %v465_v40, %v462_v39  ;;  %6895 = vmatpush3.bf16.msra.mxu0 %v7430_v27 }
  0x38   : > { %v7432_v44 = vld [vmem:[%s9420_s1 + $0x1a8] sm:$0xff]   ;;  %3476 = vmatprep.mubr.bf16.mxu0 %v7405_v35  ;;  %v481_v52 = vrot.slane %v479_v42, 5  ;;  %v912_v53 = vrot.slane %v211_v29, 5  ;;  %1069 = vst [vmem:[#allocation2 + $0x108] sm:$0xf] %v8041_v48  ;;  %v7443_v55 = vld [vmem:[%s9420_s1 + $0x160] sm:$0xff]   ;;  %v476_v56 = vor.u32 %v475_v47, %v471_v46 }
  0x39   : > { %3477 = vmatmul.mubr.bf16.gmra.mxu0 %v5934_v38  ;;  %v212_v54 = vld [vmem:[%s7896_s6 + $0x30] sm:$0xf]  ;;  %7007 = vmatpush3.bf16.msra.mxu1 %v7432_v44  ;;  %v910_v58 = vsel %vm7912_vm4, %v5882_v49, %v909_v50  ;;  %v911_v60 = vrot.slane %v909_v50, 4  ;;  %v213_v61 = vld [vmem:[%s7896_s6 + $0x34] sm:$0xf]  ;;  %v467_v8 = vrot.slane %v466_v51, 4 }
  0x3a   : > { %v214_v0 = vld [vmem:[%s7896_s6 + $0x38] sm:$0x1]  ;;  %360 = vst [vmem:[#allocation2 + $0x120] sm:$0xf] %v212_v54  ;;  %v484_v2 = vshrl.u32 %v212_v54, 16  ;;  %v487_v9 = vshll.u32 %v212_v54, 16  ;;  %6896 = vmatprep.subr.bf16.mxu0 %v7443_v55 }
  0x3b   : > { %v7412_v7 = vld [vmem:[#allocation2 + $0x9c] ss:$36 sps:$4 sm:$0xff]   ;;  %1036 = vst [vmem:[#allocation2 + $0xe0] sm:$0xf] %v910_v58  ;;  %361 = vst [vmem:[#allocation2 + $0x144] sm:$0xf] %v213_v61  ;;  %v913_v15 = vsel %vm7912_vm4, %v911_v60, %v912_v53  ;;  %v472_v18 = vsel %vm7930_vm5, %v467_v8, %v471_v46 }
  0x3c   : > { %v2485_v10 = vld [vmem:[#allocation2 + $0xb4] sm:$0xff]  ;;  %v477_v14 = vrot.slane %v476_v56, 4  ;;  %3645 = vmatprep.mubr.bf16.mxu1 %v7412_v7  ;;  %1037 = vst [vmem:[#allocation2 + $0x104] sm:$0xf] %v913_v15  ;;  %v486_v20 = vrot.slane %v484_v2, 4  ;;  %v489_v59 = vrot.slane %v487_v9, 5 }
  0x3d   : > { %v2482_v3 = vld [vmem:[#allocation2 + $0x90] sm:$0xff]  ;;  %v7414_v13 = vld [vmem:[#allocation2 + $0x98] ss:$36 sps:$4 sm:$0xff]   ;;  %v8061_v21 = vld [vmem:[%s7896_s6 + $0x40] sm:$0xf]  ;;  %v493_v23 = vshll.u32 %v213_v61, 16 }
  0x3e   : > { %v7410_v11 = vld [vmem:[#allocation2 + $0x94] ss:$36 sps:$4 sm:$0xff]   ;;  %v5940_v16 = vcombine.low %v2482_v3, %v2485_v10  ;;  %v8058_v1 = vld [vmem:[%s7896_s6 + $0x3c] sm:$0xf]  ;;  %v482_v22 = vsel %vm7930_vm5, %v477_v14, %v481_v52  ;;  %809 = vst [vmem:[#allocation2 + $0xdc] sm:$0xf] %v472_v18  ;;  %v490_v27 = vor.u32 %v489_v59, %v486_v20 }
  0x3f   : > { %3484 = vmatprep.mubr.bf16.mxu0 %v7410_v11  ;;  %3646 = vmatmul.mubr.bf16.gmra.mxu1 %v7414_v13  ;;  %v497_v24 = vshrl.u32 %v213_v61, 16  ;;  %v503_v25 = vshll.u32 %v214_v0, 16  ;;  %1070 = vst [vmem:[#allocation2 + $0x12c] sm:$0xf] %v8058_v1  ;;  %1071 = vst [vmem:[#allocation2 + $0x150] sm:$0xf] %v8061_v21 }
  0x40   : > { %v7444_v26 = vld [vmem:[%s9420_s1 + $0x120] sm:$0xff]   ;;  %810 = vst [vmem:[#allocation2 + $0x100] sm:$0xf] %v482_v22  ;;  %v5883_v28 = vrot.slane %v212_v54, 9  ;;  %v916_v29 = vrot.slane %v213_v61, 5  ;;  %v919_v30 = vrot.slane %v214_v0, 5 }
  0x41   : > { %v7445_v31 = vld [vmem:[%s9420_s1 + $0x1e0] sm:$0xff]   ;;  %v495_v32 = vrot.slane %v493_v23, 5  ;;  %v499_v33 = vrot.slane %v497_v24, 4  ;;  %6897 = vmatpush3.bf16.msra.mxu0 %v7444_v26  ;;  %v491_v35 = vrot.slane %v490_v27, 4  ;;  %v505_v39 = vrot.slane %v503_v25, 5  ;;  %v7457_v11 = vld [vmem:[%s9420_s1 + $0x158] sm:$0xff]  }
  0x42   : > { %v7446_v34 = vld [vmem:[%s9420_s1 + $0x1a0] sm:$0xff]   ;;  %3485 = vmatmul.mubr.bf16.gmra.mxu0 %v5940_v16  ;;  %v917_v36 = vsel %vm7912_vm4, %v5883_v28, %v916_v29  ;;  %v918_v37 = vrot.slane %v916_v29, 4  ;;  %7008 = vmatprep.subr.bf16.mxu1 %v7445_v31  ;;  %v215_v44 = vld [vmem:[%s7896_s6 + $0x3c] sm:$0xf]  ;;  %v8088_v10 = vld [vmem:[%s7896_s6 + $0x48] sm:$0xf] }
  0x43   : > { %v500_v38 = vor.u32 %v499_v33, %v495_v32  ;;  %1038 = vst [vmem:[#allocation2 + $0x128] sm:$0xf] %v917_v36  ;;  %7009 = vmatpush3.bf16.msra.mxu1 %v7446_v34  ;;  %v496_v40 = vsel %vm7930_vm5, %v491_v35, %v495_v32  ;;  %v216_v46 = vld [vmem:[%s7896_s6 + $0x40] sm:$0xf]  ;;  %v7421_v47 = vld [vmem:[#allocation2 + $0xe4] ss:$36 sps:$4 sm:$0xff]   ;;  %6898 = vmatprep.subr.bf16.mxu0 %v7457_v11 }
  0x44   : > { %v920_v42 = vsel %vm7912_vm4, %v918_v37, %v919_v30  ;;  %v7423_v49 = vld [vmem:[#allocation2 + $0xe0] ss:$36 sps:$4 sm:$0xff]   ;;  %811 = vst [vmem:[#allocation2 + $0x124] sm:$0xf] %v496_v40  ;;  %362 = vst [vmem:[#allocation2 + $0x168] sm:$0xf] %v215_v44  ;;  %3653 = vmatprep.mubr.bf16.mxu1 %v7421_v47 }
  0x45   : > { %v501_v50 = vrot.slane %v500_v38, 4  ;;  %1039 = vst [vmem:[#allocation2 + $0x14c] sm:$0xf] %v920_v42  ;;  %363 = vst [vmem:[#allocation2 + $0x18c] sm:$0xf] %v216_v46  ;;  %v2488_v51 = vld [vmem:[#allocation2 + $0xd8] sm:$0xff] }
  0x46   : > { %v217_v52 = vld [vmem:[%s7896_s6 + $0x44] sm:$0x1]  ;;  %v508_v53 = vshrl.u32 %v215_v44, 16  ;;  %v511_v54 = vshll.u32 %v215_v44, 16  ;;  %v517_v55 = vshll.u32 %v216_v46, 16  ;;  %v521_v61 = vshrl.u32 %v216_v46, 16 }
  0x47   : > { %v2491_v56 = vld [vmem:[#allocation2 + $0xfc] sm:$0xff]  ;;  %v506_v60 = vsel %vm7930_vm5, %v501_v50, %v505_v39  ;;  %v527_v0 = vshll.u32 %v217_v52, 16  ;;  %v5884_v2 = vrot.slane %v215_v44, 9  ;;  %3654 = vmatmul.mubr.bf16.gmra.mxu1 %v7423_v49  ;;  %v8094_v14 = vld [vmem:[%s7896_s6 + $0x4c] sm:$0xf]  ;;  %v923_v15 = vrot.slane %v216_v46, 5 }
  0x48   : > { %v7419_v58 = vld [vmem:[#allocation2 + $0xdc] ss:$36 sps:$4 sm:$0xff]   ;;  %v5946_v3 = vcombine.low %v2488_v51, %v2491_v56  ;;  %812 = vst [vmem:[#allocation2 + $0x148] sm:$0xf] %v506_v60  ;;  %v510_v7 = vrot.slane %v508_v53, 4  ;;  %v513_v8 = vrot.slane %v511_v54, 5 }
  0x49   : > { %v519_v9 = vrot.slane %v517_v55, 5  ;;  %3492 = vmatprep.mubr.bf16.mxu0 %v7419_v58  ;;  %v523_v13 = vrot.slane %v521_v61, 4  ;;  %v926_v16 = vrot.slane %v217_v52, 5  ;;  %1072 = vst [vmem:[#allocation2 + $0x174] sm:$0xf] %v8088_v10  ;;  %v8100_v18 = vrot.slane %v1111_v12, 4 }
  0x4a   : > { %3493 = vmatmul.mubr.bf16.gmra.mxu0 %v5946_v3  ;;  %v514_v20 = vor.u32 %v513_v8, %v510_v7  ;;  %v529_v59 = vrot.slane %v527_v0, 5  ;;  %1073 = vst [vmem:[#allocation2 + $0x198] sm:$0xf] %v8094_v14  ;;  %v218_v22 = vld [vmem:[%s7896_s6 + $0x48] sm:$0xf]  ;;  %v924_v25 = vsel %vm7912_vm4, %v5884_v2, %v923_v15  ;;  %v925_v26 = vrot.slane %v923_v15, 4 }
  0x4b   : > { %v219_v23 = vld [vmem:[%s7896_s6 + $0x4c] sm:$0xf]  ;;  %v524_v24 = vor.u32 %v523_v13, %v519_v9  ;;  %v220_v27 = vld [vmem:[%s7896_s6 + $0x50] sm:$0x1]  ;;  %364 = vst [vmem:[#allocation2 + $0x1b0] sm:$0xf] %v218_v22 }
  0x4c   : > { %365 = vst [vmem:[#allocation2 + $0x1d4] sm:$0xf] %v219_v23  ;;  %v532_v4 = vshrl.u32 %v218_v22, 16  ;;  %v8109_v5 = vld [vmem:[%s7896_s6 + $0x54] sm:$0xf]  ;;  %v2494_v12 = vld [vmem:[#allocation2 + $0x120] sm:$0xff]  ;;  %v927_v33 = vsel %vm7912_vm4, %v925_v26, %v926_v16 }
  0x4d   : > { %v7426_v28 = vld [vmem:[#allocation2 + $0x12c] ss:$36 sps:$4 sm:$0xff]   ;;  %v515_v29 = vrot.slane %v514_v20, 4  ;;  %1040 = vst [vmem:[#allocation2 + $0x170] sm:$0xf] %v924_v25  ;;  %v535_v30 = vshll.u32 %v218_v22, 16 }
  0x4e   : > { %1074 = vst [vmem:[#allocation2 + $0x1bc] sm:$0xf] %v8109_v5  ;;  %v7428_v31 = vld [vmem:[#allocation2 + $0x128] ss:$36 sps:$4 sm:$0xff]   ;;  %v525_v32 = vrot.slane %v524_v24, 4  ;;  %v534_v34 = vrot.slane %v532_v4, 4  ;;  %3661 = vmatprep.mubr.bf16.mxu1 %v7426_v28 }
  0x4f   : > { %v541_v35 = vshll.u32 %v219_v23, 16  ;;  %v7458_v36 = vld [vmem:[%s9420_s1 + $0x118] sm:$0xff]   ;;  %v520_v37 = vsel %vm7930_vm5, %v515_v29, %v519_v9  ;;  %1041 = vst [vmem:[#allocation2 + $0x194] sm:$0xf] %v927_v33  ;;  %v537_v38 = vrot.slane %v535_v30, 5  ;;  %v545_v39 = vshrl.u32 %v219_v23, 16  ;;  %3662 = vmatmul.mubr.bf16.gmra.mxu1 %v7428_v31 }
  0x50   : > { %v551_v40 = vshll.u32 %v220_v27, 16  ;;  %v8120_v42 = vld [vmem:[%s7896_s6 + $0x58] sm:$0xf]  ;;  %v2497_v46 = vld [vmem:[#allocation2 + $0x144] sm:$0xff]  ;;  %v530_v49 = vsel %vm7930_vm5, %v525_v32, %v529_v59  ;;  %813 = vst [vmem:[#allocation2 + $0x16c] sm:$0xf] %v520_v37  ;;  %6899 = vmatpush3.bf16.msra.mxu0 %v7458_v36 }
  0x51   : > { %v7459_v44 = vld [vmem:[%s9420_s1 + $0x1d8] sm:$0xff]   ;;  %v7424_v47 = vld [vmem:[#allocation2 + $0x124] ss:$36 sps:$4 sm:$0xff]   ;;  %v543_v50 = vrot.slane %v541_v35, 5  ;;  %v5885_v51 = vrot.slane %v218_v22, 9  ;;  %v930_v52 = vrot.slane %v219_v23, 5  ;;  %v5952_v53 = vcombine.low %v2494_v12, %v2497_v46 }
  0x52   : > { %1075 = vst [vmem:[#allocation2 + $0x1e0] sm:$0xf] %v8120_v42  ;;  %814 = vst [vmem:[#allocation2 + $0x190] sm:$0xf] %v530_v49  ;;  %v538_v54 = vor.u32 %v537_v38, %v534_v34  ;;  %v547_v55 = vrot.slane %v545_v39, 4  ;;  %v553_v56 = vrot.slane %v551_v40, 5  ;;  %7010 = vmatprep.subr.bf16.mxu1 %v7459_v44  ;;  %3500 = vmatprep.mubr.bf16.mxu0 %v7424_v47 }
  0x53   : > { %v931_v58 = vsel %vm7912_vm4, %v5885_v51, %v930_v52  ;;  %v932_v60 = vrot.slane %v930_v52, 4  ;;  %v933_v61 = vrot.slane %v220_v27, 5  ;;  %3501 = vmatmul.mubr.bf16.gmra.mxu0 %v5952_v53  ;;  %v7460_v3 = vld [vmem:[%s9420_s1 + $0x198] sm:$0xff]   ;;  %v1119_v8 = vshrl.u32 %v7961_v17, 16  ;;  %v221_v13 = vld [vmem:[%s7896_s6 + $0x54] sm:$0xf] }
  0x54   : > { %v539_v0 = vrot.slane %v538_v54, 4  ;;  %v548_v2 = vor.u32 %v547_v55, %v543_v50  ;;  %1042 = vst [vmem:[#allocation2 + $0x1b8] sm:$0xf] %v931_v58  ;;  %v222_v15 = vld [vmem:[%s7896_s6 + $0x58] sm:$0xf]  ;;  %7011 = vmatpush3.bf16.msra.mxu1 %v7460_v3  ;;  %v7471_v16 = vld [vmem:[%s9420_s1 + $0x150] sm:$0xff]  }
  0x55   : > { %v934_v7 = vsel %vm7912_vm4, %v932_v60, %v933_v61  ;;  %v7435_v20 = vld [vmem:[#allocation2 + $0x174] ss:$36 sps:$4 sm:$0xff]   ;;  %366 = vst [vmem:[#allocation2 + $0x1f8] sm:$0xf] %v221_v13  ;;  %367 = vst [vmem:[#allocation2 + $0x21c] sm:$0xf] %v222_v15  ;;  %6900 = vmatprep.subr.bf16.mxu0 %v7471_v16 }
  0x56   : > { %v544_v9 = vsel %vm7930_vm5, %v539_v0, %v543_v50  ;;  %v549_v11 = vrot.slane %v548_v2, 4  ;;  %1043 = vst [vmem:[#allocation2 + $0x1dc] sm:$0xf] %v934_v7  ;;  %v7437_v59 = vld [vmem:[#allocation2 + $0x170] ss:$36 sps:$4 sm:$0xff]   ;;  %v556_v22 = vshrl.u32 %v221_v13, 16  ;;  %3669 = vmatprep.mubr.bf16.mxu1 %v7435_v20 }
  0x57   : > { %815 = vst [vmem:[#allocation2 + $0x1b4] sm:$0xf] %v544_v9  ;;  %v2500_v23 = vld [vmem:[#allocation2 + $0x168] sm:$0xff]  ;;  %v223_v25 = vld [vmem:[%s7896_s6 + $0x5c] sm:$0x1]  ;;  %v559_v26 = vshll.u32 %v221_v13, 16  ;;  %3670 = vmatmul.mubr.bf16.gmra.mxu1 %v7437_v59 }
  0x58   : > { %v554_v24 = vsel %vm7930_vm5, %v549_v11, %v553_v56  ;;  %v565_v27 = vshll.u32 %v222_v15, 16  ;;  %v569_v4 = vshrl.u32 %v222_v15, 16  ;;  %v558_v29 = vrot.slane %v556_v22, 4  ;;  %v8147_v36 = vld [vmem:[%s7896_s6 + $0x60] sm:$0xf]  ;;  %v7472_v37 = vld [vmem:[%s9420_s1 + $0x110] sm:$0xff]  }
  0x59   : > { %v2503_v12 = vld [vmem:[#allocation2 + $0x18c] sm:$0xff]  ;;  %816 = vst [vmem:[#allocation2 + $0x1d8] sm:$0xf] %v554_v24  ;;  %v575_v30 = vshll.u32 %v223_v25, 16  ;;  %v5886_v31 = vrot.slane %v221_v13, 9  ;;  %v561_v33 = vrot.slane %v559_v26, 5  ;;  %6901 = vmatpush3.bf16.msra.mxu0 %v7472_v37 }
  0x5a   : > { %v7433_v28 = vld [vmem:[#allocation2 + $0x16c] ss:$36 sps:$4 sm:$0xff]   ;;  %v5958_v32 = vcombine.low %v2500_v23, %v2503_v12  ;;  %v567_v34 = vrot.slane %v565_v27, 5  ;;  %v571_v35 = vrot.slane %v569_v4, 4  ;;  %v8153_v39 = vld [vmem:[%s7896_s6 + $0x64] sm:$0xf] }
  0x5b   : > { %3508 = vmatprep.mubr.bf16.mxu0 %v7433_v28  ;;  %v577_v38 = vrot.slane %v575_v30, 5  ;;  %v937_v40 = vrot.slane %v222_v15, 5  ;;  %v940_v44 = vrot.slane %v223_v25, 5  ;;  %1076 = vst [vmem:[#allocation2 + $0x204] sm:$0xf] %v8147_v36  ;;  %v562_v46 = vor.u32 %v561_v33, %v558_v29  ;;  %v7473_v2 = vld [vmem:[%s9420_s1 + $0x1d0] sm:$0xff]  }
  0x5c   : > { %3509 = vmatmul.mubr.bf16.gmra.mxu0 %v5958_v32  ;;  %v572_v47 = vor.u32 %v571_v35, %v567_v34  ;;  %1077 = vst [vmem:[#allocation2 + $0x228] sm:$0xf] %v8153_v39  ;;  %v224_v49 = vld [vmem:[%s7896_s6 + $0x60] sm:$0xf]  ;;  %v225_v50 = vld [vmem:[%s7896_s6 + $0x64] sm:$0xf]  ;;  %7012 = vmatprep.subr.bf16.mxu1 %v7473_v2 }
  0x5d   : > { %v226_v51 = vld [vmem:[%s7896_s6 + $0x68] sm:$0x1]  ;;  %v7440_v52 = vld [vmem:[#allocation2 + $0x1bc] ss:$36 sps:$4 sm:$0xff]   ;;  %v938_v54 = vsel %vm7912_vm4, %v5886_v31, %v937_v40  ;;  %v939_v55 = vrot.slane %v937_v40, 4  ;;  %v563_v58 = vrot.slane %v562_v46, 4 }
  0x5e   : > { %v7442_v53 = vld [vmem:[#allocation2 + $0x1b8] ss:$36 sps:$4 sm:$0xff]   ;;  %368 = vst [vmem:[#allocation2 + $0x240] sm:$0xf] %v224_v49  ;;  %369 = vst [vmem:[#allocation2 + $0x264] sm:$0xf] %v225_v50  ;;  %3677 = vmatprep.mubr.bf16.mxu1 %v7440_v52 }
  0x5f   : > { %v2506_v56 = vld [vmem:[#allocation2 + $0x1b0] sm:$0xff]  ;;  %v573_v60 = vrot.slane %v572_v47, 4  ;;  %1044 = vst [vmem:[#allocation2 + $0x200] sm:$0xf] %v938_v54  ;;  %v580_v61 = vshrl.u32 %v224_v49, 16  ;;  %v583_v0 = vshll.u32 %v224_v49, 16  ;;  %v941_v3 = vsel %vm7912_vm4, %v939_v55, %v940_v44  ;;  %3678 = vmatmul.mubr.bf16.gmra.mxu1 %v7442_v53 }
  0x60   : > { %v589_v7 = vshll.u32 %v225_v50, 16  ;;  %v593_v9 = vshrl.u32 %v225_v50, 16  ;;  %v599_v11 = vshll.u32 %v226_v51, 16  ;;  %v8168_v13 = vld [vmem:[%s7896_s6 + $0x6c] sm:$0xf]  ;;  %v7474_v15 = vld [vmem:[%s9420_s1 + $0x190] sm:$0xff]   ;;  %v568_v59 = vsel %vm7930_vm5, %v563_v58, %v567_v34 }
  0x61   : > { %v2509_v16 = vld [vmem:[#allocation2 + $0x1d4] sm:$0xff]  ;;  %v578_v22 = vsel %vm7930_vm5, %v573_v60, %v577_v38  ;;  %1045 = vst [vmem:[#allocation2 + $0x224] sm:$0xf] %v941_v3  ;;  %v582_v23 = vrot.slane %v580_v61, 4  ;;  %v585_v24 = vrot.slane %v583_v0, 5  ;;  %v7485_v25 = vld [vmem:[%s9420_s1 + $0x148] sm:$0xff]   ;;  %7013 = vmatpush3.bf16.msra.mxu1 %v7474_v15 }
  0x62   : > { %v7438_v20 = vld [vmem:[#allocation2 + $0x1b4] ss:$36 sps:$4 sm:$0xff]   ;;  %1078 = vst [vmem:[#allocation2 + $0x24c] sm:$0xf] %v8168_v13  ;;  %v5964_v26 = vcombine.low %v2506_v56, %v2509_v16  ;;  %817 = vst [vmem:[#allocation2 + $0x1fc] sm:$0xf] %v568_v59  ;;  %6902 = vmatprep.subr.bf16.mxu0 %v7485_v25 }
  0x63   : > { %818 = vst [vmem:[#allocation2 + $0x220] sm:$0xf] %v578_v22  ;;  %v591_v27 = vrot.slane %v589_v7, 5  ;;  %v595_v4 = vrot.slane %v593_v9, 4  ;;  %v601_v12 = vrot.slane %v599_v11, 5  ;;  %v7486_v29 = vld [vmem:[%s9420_s1 + $0x108] sm:$0xff]   ;;  %3516 = vmatprep.mubr.bf16.mxu0 %v7438_v20  ;;  %v586_v30 = vor.u32 %v585_v24, %v582_v23 }
  0x64   : > { %v8182_v28 = vld [vmem:[%s7896_s6 + $0x70] sm:$0xf]  ;;  %v5887_v31 = vrot.slane %v224_v49, 9  ;;  %v944_v32 = vrot.slane %v225_v50, 5  ;;  %v947_v33 = vrot.slane %v226_v51, 5  ;;  %v7487_v34 = vld [vmem:[%s9420_s1 + $0x1c8] sm:$0xff]   ;;  %3517 = vmatmul.mubr.bf16.gmra.mxu0 %v5964_v26 }
  0x65   : > { %1079 = vst [vmem:[#allocation2 + $0x270] sm:$0xf] %v8182_v28  ;;  %v596_v35 = vor.u32 %v595_v4, %v591_v27  ;;  %v587_v37 = vrot.slane %v586_v30, 4  ;;  %7014 = vmatprep.subr.bf16.mxu1 %v7487_v34  ;;  %6903 = vmatpush3.bf16.msra.mxu0 %v7486_v29  ;;  %v227_v49 = vld [vmem:[%s7896_s6 + $0x6c] sm:$0xf]  ;;  %v7499_v4 = vld [vmem:[%s9420_s1 + $0x140] sm:$0xff]  }
  0x66   : > { %v945_v38 = vsel %vm7912_vm4, %v5887_v31, %v944_v32  ;;  %v946_v40 = vrot.slane %v944_v32, 4  ;;  %v228_v50 = vld [vmem:[%s7896_s6 + $0x70] sm:$0xf]  ;;  %v229_v51 = vld [vmem:[%s7896_s6 + $0x74] sm:$0x1]  ;;  %v604_v55 = vshrl.u32 %v227_v49, 16  ;;  %6904 = vmatprep.subr.bf16.mxu0 %v7499_v4 }
  0x67   : > { %v597_v44 = vrot.slane %v596_v35, 4  ;;  %1046 = vst [vmem:[#allocation2 + $0x248] sm:$0xf] %v945_v38  ;;  %v592_v46 = vsel %vm7930_vm5, %v587_v37, %v591_v27  ;;  %v7449_v52 = vld [vmem:[#allocation2 + $0x204] ss:$36 sps:$4 sm:$0xff]   ;;  %v607_v61 = vshll.u32 %v227_v49, 16 }
  0x68   : > { %v948_v47 = vsel %vm7912_vm4, %v946_v40, %v947_v33  ;;  %v7451_v53 = vld [vmem:[#allocation2 + $0x200] ss:$36 sps:$4 sm:$0xff]   ;;  %819 = vst [vmem:[#allocation2 + $0x244] sm:$0xf] %v592_v46  ;;  %370 = vst [vmem:[#allocation2 + $0x288] sm:$0xf] %v227_v49  ;;  %3685 = vmatprep.mubr.bf16.mxu1 %v7449_v52 }
  0x69   : > { %v602_v54 = vsel %vm7930_vm5, %v597_v44, %v601_v12  ;;  %1047 = vst [vmem:[#allocation2 + $0x26c] sm:$0xf] %v948_v47  ;;  %371 = vst [vmem:[#allocation2 + $0x2ac] sm:$0xf] %v228_v50  ;;  %v2512_v56 = vld [vmem:[#allocation2 + $0x1f8] sm:$0xff]  ;;  %v613_v0 = vshll.u32 %v228_v50, 16  ;;  %3686 = vmatmul.mubr.bf16.gmra.mxu1 %v7451_v53 }
  0x6a   : > { %v2515_v58 = vld [vmem:[#allocation2 + $0x21c] sm:$0xff]  ;;  %820 = vst [vmem:[#allocation2 + $0x268] sm:$0xf] %v602_v54  ;;  %v606_v3 = vrot.slane %v604_v55, 4  ;;  %v617_v7 = vshrl.u32 %v228_v50, 16  ;;  %v623_v9 = vshll.u32 %v229_v51, 16 }
  0x6b   : > { %v7447_v60 = vld [vmem:[#allocation2 + $0x1fc] ss:$36 sps:$4 sm:$0xff]   ;;  %v5970_v2 = vcombine.low %v2512_v56, %v2515_v58  ;;  %v8203_v11 = vld [vmem:[%s7896_s6 + $0x78] sm:$0xf]  ;;  %v7488_v15 = vld [vmem:[%s9420_s1 + $0x188] sm:$0xff]   ;;  %v609_v16 = vrot.slane %v607_v61, 5 }
  0x6c   : > { %3524 = vmatprep.mubr.bf16.mxu0 %v7447_v60  ;;  %v615_v20 = vrot.slane %v613_v0, 5  ;;  %v8209_v59 = vld [vmem:[%s7896_s6 + $0x7c] sm:$0xf]  ;;  %v5888_v22 = vrot.slane %v227_v49, 9  ;;  %v951_v23 = vrot.slane %v228_v50, 5  ;;  %v619_v24 = vrot.slane %v617_v7, 4  ;;  %7015 = vmatpush3.bf16.msra.mxu1 %v7488_v15 }
  0x6d   : > { %1080 = vst [vmem:[#allocation2 + $0x294] sm:$0xf] %v8203_v11  ;;  %v625_v25 = vrot.slane %v623_v9, 5  ;;  %v954_v26 = vrot.slane %v229_v51, 5  ;;  %1081 = vst [vmem:[#allocation2 + $0x2b8] sm:$0xf] %v8209_v59  ;;  %3525 = vmatmul.mubr.bf16.gmra.mxu0 %v5970_v2  ;;  %v610_v12 = vor.u32 %v609_v16, %v606_v3 }
  0x6e   : > { %v230_v27 = vld [vmem:[%s7896_s6 + $0x78] sm:$0xf]  ;;  %v952_v29 = vsel %vm7912_vm4, %v5888_v22, %v951_v23  ;;  %v953_v30 = vrot.slane %v951_v23, 4  ;;  %v231_v31 = vld [vmem:[%s7896_s6 + $0x7c] sm:$0xf]  ;;  %v620_v33 = vor.u32 %v619_v24, %v615_v20  ;;  %v7500_v40 = vld [vmem:[%s9420_s1 + $0x100] sm:$0xff]  }
  0x6f   : > { %v232_v32 = vld [vmem:[%s7896_s6 + $0x80] sm:$0x1]  ;;  %372 = vst [vmem:[#allocation2 + $0x2d0] sm:$0xf] %v230_v27  ;;  %1048 = vst [vmem:[#allocation2 + $0x290] sm:$0xf] %v952_v29  ;;  %6905 = vmatpush3.bf16.msra.mxu0 %v7500_v40 }
  0x70   : > { %373 = vst [vmem:[#allocation2 + $0x2f4] sm:$0xf] %v231_v31  ;;  %v628_v34 = vshrl.u32 %v230_v27, 16  ;;  %v631_v35 = vshll.u32 %v230_v27, 16  ;;  %v637_v37 = vshll.u32 %v231_v31, 16  ;;  %v2518_v44 = vld [vmem:[#allocation2 + $0x240] sm:$0xff]  ;;  %v955_v49 = vsel %vm7912_vm4, %v953_v30, %v954_v26 }
  0x71   : > { %v8222_v38 = vld [vmem:[%s7896_s6 + $0x84] sm:$0xf]  ;;  %v7454_v46 = vld [vmem:[#allocation2 + $0x24c] ss:$36 sps:$4 sm:$0xff]   ;;  %v611_v47 = vrot.slane %v610_v12, 4  ;;  %v641_v50 = vshrl.u32 %v231_v31, 16 }
  0x72   : > { %1082 = vst [vmem:[#allocation2 + $0x2dc] sm:$0xf] %v8222_v38  ;;  %v2521_v51 = vld [vmem:[#allocation2 + $0x264] sm:$0xff]  ;;  %v621_v54 = vrot.slane %v620_v33, 4  ;;  %1049 = vst [vmem:[#allocation2 + $0x2b4] sm:$0xf] %v955_v49  ;;  %3693 = vmatprep.mubr.bf16.mxu1 %v7454_v46 }
  0x73   : > { %v7452_v52 = vld [vmem:[#allocation2 + $0x244] ss:$36 sps:$4 sm:$0xff]   ;;  %v5976_v55 = vcombine.low %v2518_v44, %v2521_v51  ;;  %v616_v56 = vsel %vm7930_vm5, %v611_v47, %v615_v20  ;;  %v630_v58 = vrot.slane %v628_v34, 4  ;;  %v633_v60 = vrot.slane %v631_v35, 5  ;;  %v7514_v29 = vld [vmem:[%s9420_s1 + $0x278] sm:$0xff]  }
  0x74   : > { %v7456_v53 = vld [vmem:[#allocation2 + $0x248] ss:$36 sps:$4 sm:$0xff]   ;;  %3532 = vmatprep.mubr.bf16.mxu0 %v7452_v52  ;;  %v626_v0 = vsel %vm7930_vm5, %v621_v54, %v625_v25  ;;  %821 = vst [vmem:[#allocation2 + $0x28c] sm:$0xf] %v616_v56  ;;  %v639_v2 = vrot.slane %v637_v37, 5  ;;  %v643_v3 = vrot.slane %v641_v50, 4  ;;  %7114 = vmatprep.subr.bf16.mxu0 %v7514_v29 }
  0x75   : > { %v8233_v61 = vld [vmem:[%s7896_s6 + $0x88] sm:$0xf]  ;;  %v647_v7 = vshll.u32 %v232_v32, 16  ;;  %v7501_v9 = vld [vmem:[%s9420_s1 + $0x1c0] sm:$0xff]   ;;  %3694 = vmatmul.mubr.bf16.gmra.mxu1 %v7456_v53  ;;  %822 = vst [vmem:[#allocation2 + $0x2b0] sm:$0xf] %v626_v0  ;;  %v634_v15 = vor.u32 %v633_v60, %v630_v58  ;;  %3533 = vmatmul.mubr.bf16.gmra.mxu0 %v5976_v55 }
  0x76   : > { %1083 = vst [vmem:[#allocation2 + $0x300] sm:$0xf] %v8233_v61  ;;  %v5889_v16 = vrot.slane %v230_v27, 9  ;;  %v958_v20 = vrot.slane %v231_v31, 5  ;;  %v961_v22 = vrot.slane %v232_v32, 5  ;;  %v7502_v23 = vld [vmem:[%s9420_s1 + $0x180] sm:$0xff]   ;;  %v644_v24 = vor.u32 %v643_v3, %v639_v2  ;;  %7016 = vmatprep.subr.bf16.mxu1 %v7501_v9 }
  0x77   : > { %v649_v25 = vrot.slane %v647_v7, 5  ;;  %v635_v26 = vrot.slane %v634_v15, 4  ;;  %7017 = vmatpush3.bf16.msra.mxu1 %v7502_v23  ;;  %v7463_v30 = vld [vmem:[#allocation2 + $0x294] ss:$36 sps:$4 sm:$0xff]   ;;  %v8255_v34 = vrot.slane %v1119_v8, 4 }
  0x78   : > { %v959_v4 = vsel %vm7912_vm4, %v5889_v16, %v958_v20  ;;  %v960_v12 = vrot.slane %v958_v20, 4  ;;  %v645_v27 = vrot.slane %v644_v24, 4  ;;  %v233_v37 = vld [vmem:[%s7896_s6 + $0x84] sm:$0xf]  ;;  %v234_v40 = vld [vmem:[%s7896_s6 + $0x88] sm:$0xf]  ;;  %3701 = vmatprep.mubr.bf16.mxu1 %v7463_v30 }
  0x79   : > { %1050 = vst [vmem:[#allocation2 + $0x2d8] sm:$0xf] %v959_v4  ;;  %v7465_v31 = vld [vmem:[#allocation2 + $0x290] ss:$36 sps:$4 sm:$0xff]   ;;  %v640_v32 = vsel %vm7930_vm5, %v635_v26, %v639_v2  ;;  %v235_v44 = vld [vmem:[%s7896_s6 + $0x8c] sm:$0x1] }
  0x7a   : > { %v962_v33 = vsel %vm7912_vm4, %v960_v12, %v961_v22  ;;  %v650_v35 = vsel %vm7930_vm5, %v645_v27, %v649_v25  ;;  %823 = vst [vmem:[#allocation2 + $0x2d4] sm:$0xf] %v640_v32  ;;  %374 = vst [vmem:[#allocation2 + $0x318] sm:$0xf] %v233_v37  ;;  %v652_v47 = vshrl.u32 %v233_v37, 16  ;;  %v655_v49 = vshll.u32 %v233_v37, 16 }
  0x7b   : > { %1051 = vst [vmem:[#allocation2 + $0x2fc] sm:$0xf] %v962_v33  ;;  %v2524_v46 = vld [vmem:[#allocation2 + $0x288] sm:$0xff]  ;;  %824 = vst [vmem:[#allocation2 + $0x2f8] sm:$0xf] %v650_v35  ;;  %v661_v8 = vshll.u32 %v234_v40, 16 }
  0x7c   : > { %375 = vst [vmem:[#allocation2 + $0x33c] sm:$0xf] %v234_v40  ;;  %v665_v50 = vshrl.u32 %v234_v40, 16  ;;  %v2527_v51 = vld [vmem:[#allocation2 + $0x2ac] sm:$0xff]  ;;  %v671_v53 = vshll.u32 %v235_v44, 16  ;;  %v654_v56 = vrot.slane %v652_v47, 4 }
  0x7d   : > { %v7461_v52 = vld [vmem:[#allocation2 + $0x28c] ss:$36 sps:$4 sm:$0xff]   ;;  %v5982_v55 = vcombine.low %v2524_v46, %v2527_v51  ;;  %3702 = vmatmul.mubr.bf16.gmra.mxu1 %v7465_v31  ;;  %v657_v58 = vrot.slane %v655_v49, 5  ;;  %v663_v60 = vrot.slane %v661_v8, 5  ;;  %v8266_v0 = vld [vmem:[%s7896_s6 + $0x94] sm:$0xf] }
  0x7e   : > { %v8263_v54 = vld [vmem:[%s7896_s6 + $0x90] sm:$0xf]  ;;  %v7516_v2 = vld [vmem:[%s9420_s1 + $0x2f8] sm:$0xff]   ;;  %3540 = vmatprep.mubr.bf16.mxu0 %v7461_v52  ;;  %v667_v3 = vrot.slane %v665_v50, 4  ;;  %v673_v7 = vrot.slane %v671_v53, 5  ;;  %v5890_v9 = vrot.slane %v233_v37, 9 }
  0x7f   : > { %1084 = vst [vmem:[#allocation2 + $0x324] sm:$0xf] %v8263_v54  ;;  %v965_v15 = vrot.slane %v234_v40, 5  ;;  %1085 = vst [vmem:[#allocation2 + $0x348] sm:$0xf] %v8266_v0  ;;  %3541 = vmatmul.mubr.bf16.gmra.mxu0 %v5982_v55  ;;  %v658_v20 = vor.u32 %v657_v58, %v654_v56  ;;  %v968_v22 = vrot.slane %v235_v44, 5  ;;  %7226 = vmatprep.subr.bf16.mxu1 %v7516_v2 }
  0x80   : > { %v236_v16 = vld [vmem:[%s7896_s6 + $0x90] sm:$0xf]  ;;  %v237_v23 = vld [vmem:[%s7896_s6 + $0x94] sm:$0xf]  ;;  %v238_v24 = vld [vmem:[%s7896_s6 + $0x98] sm:$0x1]  ;;  %v668_v25 = vor.u32 %v667_v3, %v663_v60 }
  0x81   : > { %376 = vst [vmem:[#allocation2 + $0x360] sm:$0xf] %v236_v16  ;;  %v966_v26 = vsel %vm7912_vm4, %v5890_v9, %v965_v15  ;;  %v967_v4 = vrot.slane %v965_v15, 4  ;;  %377 = vst [vmem:[#allocation2 + $0x384] sm:$0xf] %v237_v23  ;;  %v676_v12 = vshrl.u32 %v236_v16, 16 }
  0x82   : > { %v8279_v27 = vld [vmem:[%s7896_s6 + $0x9c] sm:$0xf]  ;;  %v8282_v29 = vld [vmem:[%s7896_s6 + $0xa0] sm:$0xf]  ;;  %v2530_v30 = vld [vmem:[#allocation2 + $0x2d0] sm:$0xff]  ;;  %v659_v32 = vrot.slane %v658_v20, 4 }
  0x83   : > { %v7468_v31 = vld [vmem:[#allocation2 + $0x2dc] ss:$36 sps:$4 sm:$0xff]   ;;  %1052 = vst [vmem:[#allocation2 + $0x320] sm:$0xf] %v966_v26  ;;  %v679_v33 = vshll.u32 %v236_v16, 16  ;;  %v2533_v35 = vld [vmem:[#allocation2 + $0x2f4] sm:$0xff]  ;;  %v969_v46 = vsel %vm7912_vm4, %v967_v4, %v968_v22 }
  0x84   : > { %1086 = vst [vmem:[#allocation2 + $0x36c] sm:$0xf] %v8279_v27  ;;  %1087 = vst [vmem:[#allocation2 + $0x390] sm:$0xf] %v8282_v29  ;;  %v7466_v37 = vld [vmem:[#allocation2 + $0x2d4] ss:$36 sps:$4 sm:$0xff]   ;;  %3709 = vmatprep.mubr.bf16.mxu1 %v7468_v31  ;;  %v5988_v47 = vcombine.low %v2530_v30, %v2533_v35  ;;  %v664_v49 = vsel %vm7930_vm5, %v659_v32, %v663_v60 }
  0x85   : > { %v7470_v40 = vld [vmem:[#allocation2 + $0x2d8] ss:$36 sps:$4 sm:$0xff]   ;;  %v669_v44 = vrot.slane %v668_v25, 4  ;;  %1053 = vst [vmem:[#allocation2 + $0x344] sm:$0xf] %v969_v46  ;;  %v678_v8 = vrot.slane %v676_v12, 4  ;;  %3548 = vmatprep.mubr.bf16.mxu0 %v7466_v37 }
  0x86   : > { %v681_v50 = vrot.slane %v679_v33, 5  ;;  %825 = vst [vmem:[#allocation2 + $0x31c] sm:$0xf] %v664_v49  ;;  %v685_v52 = vshll.u32 %v237_v23, 16  ;;  %v689_v53 = vshrl.u32 %v237_v23, 16  ;;  %v695_v55 = vshll.u32 %v238_v24, 16  ;;  %3710 = vmatmul.mubr.bf16.gmra.mxu1 %v7470_v40 }
  0x87   : > { %v674_v51 = vsel %vm7930_vm5, %v669_v44, %v673_v7  ;;  %v5891_v58 = vrot.slane %v236_v16, 9  ;;  %v972_v2 = vrot.slane %v237_v23, 5  ;;  %v975_v3 = vrot.slane %v238_v24, 5  ;;  %3549 = vmatmul.mubr.bf16.gmra.mxu0 %v5988_v47  ;;  %v239_v4 = vld [vmem:[%s7896_s6 + $0x9c] sm:$0xf] }
  0x88   : > { %826 = vst [vmem:[#allocation2 + $0x340] sm:$0xf] %v674_v51  ;;  %v682_v56 = vor.u32 %v681_v50, %v678_v8  ;;  %v687_v60 = vrot.slane %v685_v52, 5  ;;  %v691_v9 = vrot.slane %v689_v53, 4  ;;  %v697_v15 = vrot.slane %v695_v55, 5 }
  0x89   : > { %v1122_v20 = vshll.u32 %v7961_v17, 16  ;;  %v973_v22 = vsel %vm7912_vm4, %v5891_v58, %v972_v2  ;;  %v974_v25 = vrot.slane %v972_v2, 4  ;;  %v240_v24 = vld [vmem:[%s7896_s6 + $0xa0] sm:$0xf]  ;;  %v241_v30 = vld [vmem:[%s7896_s6 + $0xa4] sm:$0x1] }
  0x8a   : > { %v683_v7 = vrot.slane %v682_v56, 4  ;;  %v692_v26 = vor.u32 %v691_v9, %v687_v60  ;;  %1054 = vst [vmem:[#allocation2 + $0x368] sm:$0xf] %v973_v22  ;;  %378 = vst [vmem:[#allocation2 + $0x3a8] sm:$0xf] %v239_v4  ;;  %v700_v31 = vshrl.u32 %v239_v4, 16 }
  0x8b   : > { %v8296_v12 = vrot.slane %v1122_v20, 5  ;;  %v976_v23 = vsel %vm7912_vm4, %v974_v25, %v975_v3  ;;  %v703_v32 = vshll.u32 %v239_v4, 16  ;;  %v7477_v33 = vld [vmem:[#allocation2 + $0x324] ss:$36 sps:$4 sm:$0xff]   ;;  %379 = vst [vmem:[#allocation2 + $0x3cc] sm:$0xf] %v240_v24 }
  0x8c   : > { %v688_v16 = vsel %vm7930_vm5, %v683_v7, %v687_v60  ;;  %v7479_v35 = vld [vmem:[#allocation2 + $0x320] ss:$36 sps:$4 sm:$0xff]   ;;  %v693_v37 = vrot.slane %v692_v26, 4  ;;  %1055 = vst [vmem:[#allocation2 + $0x38c] sm:$0xf] %v976_v23  ;;  %v702_v44 = vrot.slane %v700_v31, 4  ;;  %3717 = vmatprep.mubr.bf16.mxu1 %v7477_v33 }
  0x8d   : > { %827 = vst [vmem:[#allocation2 + $0x364] sm:$0xf] %v688_v16  ;;  %v2536_v40 = vld [vmem:[#allocation2 + $0x318] sm:$0xff]  ;;  %v705_v46 = vrot.slane %v703_v32, 5  ;;  %v709_v47 = vshll.u32 %v240_v24, 16  ;;  %v713_v49 = vshrl.u32 %v240_v24, 16 }
  0x8e   : > { %v698_v51 = vsel %vm7930_vm5, %v693_v37, %v697_v15  ;;  %v719_v52 = vshll.u32 %v241_v30, 16  ;;  %v8307_v53 = vld [vmem:[%s7896_s6 + $0xa8] sm:$0xf]  ;;  %3718 = vmatmul.mubr.bf16.gmra.mxu1 %v7479_v35  ;;  %v8310_v3 = vld [vmem:[%s7896_s6 + $0xac] sm:$0xf]  ;;  %v5892_v20 = vrot.slane %v239_v4, 9 }
  0x8f   : > { %v2539_v8 = vld [vmem:[#allocation2 + $0x33c] sm:$0xff]  ;;  %828 = vst [vmem:[#allocation2 + $0x388] sm:$0xf] %v698_v51  ;;  %v706_v56 = vor.u32 %v705_v46, %v702_v44  ;;  %v711_v58 = vrot.slane %v709_v47, 5  ;;  %v715_v2 = vrot.slane %v713_v49, 4  ;;  %v979_v15 = vrot.slane %v240_v24, 5 }
  0x90   : > { %v7475_v50 = vld [vmem:[#allocation2 + $0x31c] ss:$36 sps:$4 sm:$0xff]   ;;  %v5994_v55 = vcombine.low %v2536_v40, %v2539_v8  ;;  %1088 = vst [vmem:[#allocation2 + $0x3b4] sm:$0xf] %v8307_v53  ;;  %v242_v60 = vld [vmem:[%s7896_s6 + $0xa8] sm:$0xf] }
  0x91   : > { %3556 = vmatprep.mubr.bf16.mxu0 %v7475_v50  ;;  %v721_v9 = vrot.slane %v719_v52, 5  ;;  %v982_v7 = vrot.slane %v241_v30, 5  ;;  %1089 = vst [vmem:[#allocation2 + $0x3d8] sm:$0xf] %v8310_v3  ;;  %v243_v22 = vld [vmem:[%s7896_s6 + $0xac] sm:$0xf]  ;;  %v716_v26 = vor.u32 %v715_v2, %v711_v58  ;;  %v980_v32 = vsel %vm7912_vm4, %v5892_v20, %v979_v15 }
  0x92   : > { %380 = vst [vmem:[#allocation2 + $0x3f0] sm:$0xf] %v242_v60  ;;  %3557 = vmatmul.mubr.bf16.gmra.mxu0 %v5994_v55  ;;  %v707_v25 = vrot.slane %v706_v56, 4  ;;  %v244_v16 = vld [vmem:[%s7896_s6 + $0xb0] sm:$0x1]  ;;  %v724_v23 = vshrl.u32 %v242_v60, 16 }
  0x93   : > { %381 = vst [vmem:[#allocation2 + $0x414] sm:$0xf] %v243_v22  ;;  %v727_v31 = vshll.u32 %v242_v60, 16  ;;  %v981_v33 = vrot.slane %v979_v15, 4  ;;  %v733_v35 = vshll.u32 %v243_v22, 16  ;;  %v737_v4 = vshrl.u32 %v243_v22, 16 }
  0x94   : > { %v8320_v24 = vld [vmem:[%s7896_s6 + $0xb4] sm:$0xf]  ;;  %v7482_v30 = vld [vmem:[#allocation2 + $0x36c] ss:$36 sps:$4 sm:$0xff]   ;;  %v712_v37 = vsel %vm7930_vm5, %v707_v25, %v711_v58  ;;  %v717_v40 = vrot.slane %v716_v26, 4  ;;  %v726_v44 = vrot.slane %v724_v23, 4 }
  0x95   : > { %1056 = vst [vmem:[#allocation2 + $0x3b0] sm:$0xf] %v980_v32  ;;  %1090 = vst [vmem:[#allocation2 + $0x3fc] sm:$0xf] %v8320_v24  ;;  %v8327_v46 = vrot.slane %v1592_v6, 4  ;;  %v2542_v47 = vld [vmem:[#allocation2 + $0x360] sm:$0xff]  ;;  %v983_v8 = vsel %vm7912_vm4, %v981_v33, %v982_v7  ;;  %3725 = vmatprep.mubr.bf16.mxu1 %v7482_v30  ;;  %v1125_v7 = vor.u32 %v8296_v12, %v8255_v34 }
  0x96   : > { %v7484_v49 = vld [vmem:[#allocation2 + $0x368] ss:$36 sps:$4 sm:$0xff]   ;;  %829 = vst [vmem:[#allocation2 + $0x3ac] sm:$0xf] %v712_v37  ;;  %v729_v50 = vrot.slane %v727_v31, 5  ;;  %v735_v51 = vrot.slane %v733_v35, 5  ;;  %v722_v55 = vsel %vm7930_vm5, %v717_v40, %v721_v9 }
  0x97   : > { %v739_v52 = vrot.slane %v737_v4, 4  ;;  %1057 = vst [vmem:[#allocation2 + $0x3d4] sm:$0xf] %v983_v8  ;;  %v743_v56 = vshll.u32 %v244_v16, 16  ;;  %v8334_v58 = vld [vmem:[%s7896_s6 + $0xb8] sm:$0xf]  ;;  %3726 = vmatmul.mubr.bf16.gmra.mxu1 %v7484_v49 }
  0x98   : > { %v5893_v45 = vrot.slane %v242_v60, 9  ;;  %v986_v6 = vrot.slane %v243_v22, 5  ;;  %v2545_v2 = vld [vmem:[#allocation2 + $0x384] sm:$0xff]  ;;  %830 = vst [vmem:[#allocation2 + $0x3d0] sm:$0xf] %v722_v55  ;;  %v730_v15 = vor.u32 %v729_v50, %v726_v44  ;;  %v989_v26 = vrot.slane %v244_v16, 5 }
  0x99   : > { %v7480_v20 = vld [vmem:[#allocation2 + $0x364] ss:$36 sps:$4 sm:$0xff]   ;;  %v740_v25 = vor.u32 %v739_v52, %v735_v51  ;;  %1091 = vst [vmem:[#allocation2 + $0x420] sm:$0xf] %v8334_v58  ;;  %v6000_v9 = vcombine.low %v2542_v47, %v2545_v2  ;;  %v745_v23 = vrot.slane %v743_v56, 5  ;;  %v8349_v4 = vrot.slane %v1125_v7, 4 }
  0x9a   : > { %v987_v60 = vsel %vm7912_vm4, %v5893_v45, %v986_v6  ;;  %v988_v22 = vrot.slane %v986_v6, 4  ;;  %3564 = vmatprep.mubr.bf16.mxu0 %v7480_v20  ;;  %v731_v31 = vrot.slane %v730_v15, 4  ;;  %v245_v33 = vld [vmem:[%s7896_s6 + $0xb4] sm:$0xf]  ;;  %v246_v35 = vld [vmem:[%s7896_s6 + $0xb8] sm:$0xf] }
  0x9b   : > { %v741_v32 = vrot.slane %v740_v25, 4  ;;  %1058 = vst [vmem:[#allocation2 + $0x3f8] sm:$0xf] %v987_v60  ;;  %3565 = vmatmul.mubr.bf16.gmra.mxu0 %v6000_v9  ;;  %v247_v37 = vld [vmem:[%s7896_s6 + $0xbc] sm:$0x1]  ;;  %v748_v40 = vshrl.u32 %v245_v33, 16 }
  0x9c   : > { %v990_v16 = vsel %vm7912_vm4, %v988_v22, %v989_v26  ;;  %v736_v34 = vsel %vm7930_vm5, %v731_v31, %v735_v51  ;;  %382 = vst [vmem:[#allocation2 + $0x438] sm:$0xf] %v245_v33  ;;  %383 = vst [vmem:[#allocation2 + $0x45c] sm:$0xf] %v246_v35  ;;  %v751_v44 = vshll.u32 %v245_v33, 16  ;;  %v757_v47 = vshll.u32 %v246_v35, 16 }
  0x9d   : > { %v746_v12 = vsel %vm7930_vm5, %v741_v32, %v745_v23  ;;  %1059 = vst [vmem:[#allocation2 + $0x41c] sm:$0xf] %v990_v16  ;;  %v2548_v30 = vld [vmem:[#allocation2 + $0x3a8] sm:$0xff]  ;;  %831 = vst [vmem:[#allocation2 + $0x3f4] sm:$0xf] %v736_v34  ;;  %v761_v50 = vshrl.u32 %v246_v35, 16 }
  0x9e   : > { %832 = vst [vmem:[#allocation2 + $0x418] sm:$0xf] %v746_v12  ;;  %v7491_v49 = vld [vmem:[#allocation2 + $0x3b4] ss:$36 sps:$4 sm:$0xff]   ;;  %v750_v55 = vrot.slane %v748_v40, 4  ;;  %v753_v56 = vrot.slane %v751_v44, 5 }
  0x9f   : > { %v7493_v8 = vld [vmem:[#allocation2 + $0x3b0] ss:$36 sps:$4 sm:$0xff]   ;;  %v759_v45 = vrot.slane %v757_v47, 5  ;;  %3733 = vmatprep.mubr.bf16.mxu1 %v7491_v49  ;;  %v763_v2 = vrot.slane %v761_v50, 4  ;;  %v767_v20 = vshll.u32 %v247_v37, 16  ;;  %v5894_v7 = vrot.slane %v245_v33, 9 }
  0xa0   : > { %v2551_v51 = vld [vmem:[#allocation2 + $0x3cc] sm:$0xff]  ;;  %v8353_v15 = vld [vmem:[%s7896_s6 + $0xc0] sm:$0xf]  ;;  %v8356_v25 = vld [vmem:[%s7896_s6 + $0xc4] sm:$0xf]  ;;  %3734 = vmatmul.mubr.bf16.gmra.mxu1 %v7493_v8  ;;  %v754_v26 = vor.u32 %v753_v56, %v750_v55  ;;  %v993_v9 = vrot.slane %v246_v35, 5 }
  0xa1   : > { %v7489_v52 = vld [vmem:[#allocation2 + $0x3ac] ss:$36 sps:$4 sm:$0xff]   ;;  %v6006_v6 = vcombine.low %v2548_v30, %v2551_v51  ;;  %v996_v23 = vrot.slane %v247_v37, 5  ;;  %1092 = vst [vmem:[#allocation2 + $0x444] sm:$0xf] %v8353_v15  ;;  %v764_v22 = vor.u32 %v763_v2, %v759_v45  ;;  %v769_v31 = vrot.slane %v767_v20, 5 }
  0xa2   : > { %3572 = vmatprep.mubr.bf16.mxu0 %v7489_v52  ;;  %1093 = vst [vmem:[#allocation2 + $0x468] sm:$0xf] %v8356_v25  ;;  %v5785_v60 = vld [vmem:[%s7896_s6 + $0x14] sm:$0x1]  ;;  %v7496_v34 = vld [vmem:[#allocation2 + $0x3fc] ss:$36 sps:$4 sm:$0xff]   ;;  %v994_v40 = vsel %vm7912_vm4, %v5894_v7, %v993_v9 }
  0xa3   : > { %v1114_v32 = vshll.u32 %v5785_v60, 16  ;;  %v1595_v16 = vrot.slane %v5785_v60, 5  ;;  %3573 = vmatmul.mubr.bf16.gmra.mxu0 %v6006_v6  ;;  %v755_v30 = vrot.slane %v754_v26, 4  ;;  %v765_v37 = vrot.slane %v764_v22, 4  ;;  %1060 = vst [vmem:[#allocation2 + $0x440] sm:$0xf] %v994_v40  ;;  %3741 = vmatprep.mubr.bf16.mxu1 %v7496_v34 }
  0xa4   : > { %v7498_v12 = vld [vmem:[#allocation2 + $0x3f8] ss:$36 sps:$4 sm:$0xff]   ;;  %v2554_v44 = vld [vmem:[#allocation2 + $0x3f0] sm:$0xff]  ;;  %v995_v47 = vrot.slane %v993_v9, 4  ;;  %v1128_v51 = vshll.u32 %v7964_v19, 16  ;;  %v1132_v2 = vshrl.u32 %v7964_v19, 16 }
  0xa5   : > { %v2557_v33 = vld [vmem:[#allocation2 + $0x414] sm:$0xff]  ;;  %v1596_v49 = vsel %vm7912_vm4, %v8327_v46, %v1595_v16  ;;  %v760_v8 = vsel %vm7930_vm5, %v755_v30, %v759_v45  ;;  %v1116_v50 = vrot.slane %v1114_v32, 5  ;;  %v770_v52 = vsel %vm7930_vm5, %v765_v37, %v769_v31  ;;  %v5788_v45 = vld [vmem:[%s7896_s6 + $0x20] sm:$0x1]  ;;  %v5791_v7 = vld [vmem:[%s7896_s6 + $0x2c] sm:$0x1] }
  0xa6   : > { %v7494_v35 = vld [vmem:[#allocation2 + $0x3f4] ss:$36 sps:$4 sm:$0xff]   ;;  %1735 = vst [vmem:[#allocation2 + $0x38] sm:$0xf] %v1596_v49  ;;  %833 = vst [vmem:[#allocation2 + $0x43c] sm:$0xf] %v760_v8  ;;  %v997_v55 = vsel %vm7912_vm4, %v995_v47, %v996_v23  ;;  %v6012_v56 = vcombine.low %v2554_v44, %v2557_v33 }
  0xa7   : > { %3580 = vmatprep.mubr.bf16.mxu0 %v7494_v35  ;;  %834 = vst [vmem:[#allocation2 + $0x460] sm:$0xf] %v770_v52  ;;  %1061 = vst [vmem:[#allocation2 + $0x464] sm:$0xf] %v997_v55  ;;  %v1117_v46 = vsel %vm7930_vm5, %v8100_v18, %v1116_v50  ;;  %v1130_v6 = vrot.slane %v1128_v51, 5  ;;  %v1138_v20 = vshll.u32 %v5788_v45, 16 }
  0xa8   : > { %1511 = vst [vmem:[#allocation2 + $0x34] sm:$0xf] %v1117_v46  ;;  %v5896_v26 = vrot.slane %v7961_v17, 9  ;;  %3742 = vmatmul.mubr.bf16.gmra.mxu1 %v7498_v12  ;;  %v1599_v9 = vrot.slane %v7964_v19, 5  ;;  %v1602_v23 = vrot.slane %v5788_v45, 5  ;;  %v1143_v60 = vshrl.u32 %v7996_v62, 16 }
  0xa9   : > { %v1146_v22 = vshll.u32 %v7996_v62, 16  ;;  %v1131_v18 = vsel %vm7930_vm5, %v8349_v4, %v1130_v6  ;;  %v1134_v31 = vrot.slane %v1132_v2, 4  ;;  %v1140_v32 = vrot.slane %v1138_v20, 5  ;;  %v7505_v55 = vld [vmem:[#allocation2 + $0x444] ss:$36 sps:$4 sm:$0xff]  }
  0xaa   : > { %v1152_v16 = vshll.u32 %v7999_v63, 16  ;;  %1512 = vst [vmem:[#allocation2 + $0x58] sm:$0xf] %v1131_v18  ;;  %v1600_v17 = vsel %vm7912_vm4, %v5896_v26, %v1599_v9  ;;  %v1601_v34 = vrot.slane %v1599_v9, 4  ;;  %v1145_v19 = vrot.slane %v1143_v60, 4  ;;  %3749 = vmatprep.mubr.bf16.mxu1 %v7505_v55 }
  0xab   : > { %3581 = vmatmul.mubr.bf16.gmra.mxu0 %v6012_v56  ;;  %v1148_v12 = vrot.slane %v1146_v22, 5  ;;  %v1135_v30 = vor.u32 %v1134_v31, %v1130_v6  ;;  %1736 = vst [vmem:[#allocation2 + $0x5c] sm:$0xf] %v1600_v17  ;;  %v1156_v44 = vshrl.u32 %v7999_v63, 16  ;;  %v1162_v33 = vshll.u32 %v5791_v7, 16 }
  0xac   : > { %v1154_v40 = vrot.slane %v1152_v16, 5  ;;  %v1603_v4 = vsel %vm7912_vm4, %v1601_v34, %v1602_v23  ;;  %v5897_v47 = vrot.slane %v7996_v62, 9  ;;  %v1606_v49 = vrot.slane %v7999_v63, 5  ;;  %v5794_v31 = vld [vmem:[%s7896_s6 + $0x38] sm:$0x1] }
  0xad   : > { %v2560_v35 = vld [vmem:[#allocation2 + $0x438] sm:$0xff]  ;;  %v1149_v37 = vor.u32 %v1148_v12, %v1145_v19  ;;  %v1136_v51 = vrot.slane %v1135_v30, 4  ;;  %1737 = vst [vmem:[#allocation2 + $0x80] sm:$0xf] %v1603_v4  ;;  %v1158_v52 = vrot.slane %v1156_v44, 4  ;;  %v1164_v63 = vrot.slane %v1162_v33, 5 }
  0xae   : > { %v2563_v8 = vld [vmem:[#allocation2 + $0x45c] sm:$0xff]  ;;  %v1607_v6 = vsel %vm7912_vm4, %v5897_v47, %v1606_v49  ;;  %v7510_v2 = vld [vmem:[#allocation2 + $0x14] ss:$36 sps:$4 sm:$0xff]   ;;  %v1608_v23 = vrot.slane %v1606_v49, 4  ;;  %v1609_v60 = vrot.slane %v5791_v7, 5  ;;  %v1170_v7 = vshll.u32 %v8035_v43, 16 }
  0xaf   : > { %v7503_v50 = vld [vmem:[#allocation2 + $0x43c] ss:$36 sps:$4 sm:$0xff]   ;;  %v6018_v56 = vcombine.low %v2560_v35, %v2563_v8  ;;  %v1150_v45 = vrot.slane %v1149_v37, 4  ;;  %v1141_v20 = vsel %vm7930_vm5, %v1136_v51, %v1140_v32  ;;  %v1159_v62 = vor.u32 %v1158_v52, %v1154_v40  ;;  %1738 = vst [vmem:[#allocation2 + $0xa4] sm:$0xf] %v1607_v6  ;;  %v7530_v51 = vld [vmem:[%s9420_s1 + $0x270] sm:$0xff]  }
  0xb0   : > { %v7507_v46 = vld [vmem:[#allocation2 + $0x440] ss:$36 sps:$4 sm:$0xff]   ;;  %3588 = vmatprep.mubr.bf16.mxu0 %v7503_v50  ;;  %v7513_v26 = vld [vmem:[#allocation2 + $0x10] ss:$36 sps:$4 sm:$0xff]   ;;  %1513 = vst [vmem:[#allocation2 + $0x7c] sm:$0xf] %v1141_v20  ;;  %v1610_v18 = vsel %vm7912_vm4, %v1608_v23, %v1609_v60 }
  0xb1   : > { %v1155_v9 = vsel %vm7930_vm5, %v1150_v45, %v1154_v40  ;;  %3750 = vmatmul.mubr.bf16.gmra.mxu1 %v7507_v46  ;;  %v1160_v22 = vrot.slane %v1159_v62, 4  ;;  %v1167_v32 = vshrl.u32 %v8035_v43, 16  ;;  %v7511_v16 = vld [vmem:[#allocation2 + $0xc] ss:$36 sps:$4 sm:$0xff]   ;;  %1739 = vst [vmem:[#allocation2 + $0xc8] sm:$0xf] %v1610_v18 }
  0xb2   : > { %1514 = vst [vmem:[#allocation2 + $0xa0] sm:$0xf] %v1155_v9  ;;  %5072 = vmatprep.mubr.bf16.mxu1 %v7513_v26  ;;  %v1176_v34 = vshll.u32 %v8041_v48, 16  ;;  %v1180_v19 = vshrl.u32 %v8041_v48, 16  ;;  %v7508_v12 = vld [vmem:[#allocation2 + $0x10] ss:$36 sps:$4 sm:$0xff]  }
  0xb3   : > { %3589 = vmatmul.mubr.bf16.gmra.mxu0 %v6018_v56  ;;  %v1165_v17 = vsel %vm7930_vm5, %v1160_v22, %v1164_v63  ;;  %v7517_v30 = vld [vmem:[%s9420_s1 + $0x2b8] sm:$0xff]   ;;  %v1169_v40 = vrot.slane %v1167_v32, 4  ;;  %v1186_v44 = vshll.u32 %v5794_v31, 16  ;;  %v5898_v33 = vrot.slane %v8035_v43, 9  ;;  %v8418_v50 = vld [vmem:[%s7896_s6 + $0x44] sm:$0x1] }
  0xb4   : > { %3790 = vmatprep.mubr.bf16.mxu0 %v7510_v2  ;;  %1515 = vst [vmem:[#allocation2 + $0xc4] sm:$0xf] %v1165_v17  ;;  %v1613_v35 = vrot.slane %v8041_v48, 5  ;;  %v7515_v4 = vld [vmem:[%s9420_s1 + $0x238] sm:$0xff]   ;;  %v1172_v37 = vrot.slane %v1170_v7, 5  ;;  %v1178_v47 = vrot.slane %v1176_v34, 5 }
  0xb5   : > { %v1182_v49 = vrot.slane %v1180_v19, 4  ;;  %v1616_v8 = vrot.slane %v5794_v31, 5  ;;  %v1188_v52 = vrot.slane %v1186_v44, 5  ;;  %v1191_v48 = vshrl.u32 %v8058_v1, 16  ;;  %v7518_v56 = vld [vmem:[#allocation2 + $0x5c] ss:$36 sps:$4 sm:$0xff]  }
  0xb6   : > { %v1614_v43 = vsel %vm7912_vm4, %v5898_v33, %v1613_v35  ;;  %v1615_v55 = vrot.slane %v1613_v35, 4  ;;  %v1173_v46 = vor.u32 %v1172_v37, %v1169_v40  ;;  %v1194_v6 = vshll.u32 %v8058_v1, 16  ;;  %v7532_v62 = vld [vmem:[%s9420_s1 + $0x2f0] sm:$0xff]   ;;  %v7548_v40 = vld [vmem:[%s9420_s1 + $0x2e8] sm:$0xff]  }
  0xb7   : > { %v1183_v45 = vor.u32 %v1182_v49, %v1178_v47  ;;  %1740 = vst [vmem:[#allocation2 + $0xec] sm:$0xf] %v1614_v43  ;;  %v1200_v2 = vshll.u32 %v8061_v21, 16  ;;  %v7520_v20 = vld [vmem:[#allocation2 + $0x58] ss:$36 sps:$4 sm:$0xff]   ;;  %v7533_v63 = vld [vmem:[%s9420_s1 + $0x2b0] sm:$0xff]  }
  0xb8   : > { %v1617_v26 = vsel %vm7912_vm4, %v1615_v55, %v1616_v8  ;;  %v7531_v9 = vld [vmem:[%s9420_s1 + $0x230] sm:$0xff]   ;;  %v1174_v23 = vrot.slane %v1173_v46, 4  ;;  %v1193_v22 = vrot.slane %v1191_v48, 4  ;;  %v1196_v18 = vrot.slane %v1194_v6, 5  ;;  %v7524_v35 = vld [vmem:[#allocation2 + $0xa4] ss:$36 sps:$4 sm:$0xff]  }
  0xb9   : > { %5073 = vmatmul.mubr.bf16.vlgmr.msra.gmra.mxu1 %v7511_v16  ;;  %v1184_v60 = vrot.slane %v1183_v45, 4  ;;  %1741 = vst [vmem:[#allocation2 + $0x110] sm:$0xf] %v1617_v26  ;;  %v1202_v31 = vrot.slane %v1200_v2, 5  ;;  %v1204_v32 = vshrl.u32 %v8061_v21, 16  ;;  %v1210_v17 = vshll.u32 %v8418_v50, 16 }
  0xba   : > { %7227 = vmatpush3.bf16.msra.mxu1 %v7517_v30  ;;  %v5899_v7 = vrot.slane %v8058_v1, 9  ;;  %v7546_v16 = vld [vmem:[%s9420_s1 + $0x268] sm:$0xff]   ;;  %v1179_v34 = vsel %vm7930_vm5, %v1174_v23, %v1178_v47  ;;  %v1620_v30 = vrot.slane %v8061_v21, 5  ;;  %5080 = vmatprep.mubr.bf16.mxu1 %v7520_v20  ;;  %v7522_v1 = vld [vmem:[#allocation2 + $0x58] ss:$36 sps:$4 sm:$0xff]   ;;  %v1215_v48 = vshrl.u32 %v8088_v10, 16 }
  0xbb   : > { %3791 = vmatmul.mubr.bf16.vlgmr.msra.gmra.mxu0 %v7508_v12  ;;  %v1189_v19 = vsel %vm7930_vm5, %v1184_v60, %v1188_v52  ;;  %v1197_v12 = vor.u32 %v1196_v18, %v1193_v22  ;;  %v7523_v44 = vld [vmem:[#allocation2 + $0x54] ss:$36 sps:$4 sm:$0xff]   ;;  %v7526_v33 = vld [vmem:[#allocation2 + $0xa0] ss:$36 sps:$4 sm:$0xff]   ;;  %1516 = vst [vmem:[#allocation2 + $0xe8] sm:$0xf] %v1179_v34  ;;  %7228 = vmatprep.subr.bf16.mxu1 %v7532_v62 }
  0xbc   : > { %7115 = vmatpush3.bf16.msra.mxu0 %v7515_v4  ;;  %3798 = vmatprep.mubr.bf16.mxu0 %v7518_v56  ;;  %1517 = vst [vmem:[#allocation2 + $0x10c] sm:$0xf] %v1189_v19  ;;  %v1206_v37 = vrot.slane %v1204_v32, 4  ;;  %v1212_v47 = vrot.slane %v1210_v17, 5  ;;  %v1621_v21 = vsel %vm7912_vm4, %v5899_v7, %v1620_v30  ;;  %v7547_v49 = vld [vmem:[%s9420_s1 + $0x228] sm:$0xff]   ;;  %v1622_v8 = vrot.slane %v1620_v30, 4 }
  0xbd   : > { %7116 = vmatprep.subr.bf16.mxu0 %v7530_v51  ;;  %v1198_v4 = vrot.slane %v1197_v12, 4  ;;  %v1623_v52 = vrot.slane %v8418_v50, 5  ;;  %1742 = vst [vmem:[#allocation2 + $0x134] sm:$0xf] %v1621_v21  ;;  %v5800_v55 = vld [vmem:[%s7896_s6 + $0x50] sm:$0x1] }
  0xbe   : > { %7229 = vmatpush3.bf16.msra.mxu1 %v7533_v63  ;;  %v1207_v43 = vor.u32 %v1206_v37, %v1202_v31  ;;  %v1218_v56 = vshll.u32 %v8088_v10, 16  ;;  %v7549_v50 = vld [vmem:[%s9420_s1 + $0x2a8] sm:$0xff]   ;;  %v1224_v45 = vshll.u32 %v8094_v14, 16  ;;  %v1228_v6 = vshrl.u32 %v8094_v14, 16  ;;  %v7562_v20 = vld [vmem:[%s9420_s1 + $0x260] sm:$0xff]  }
  0xbf   : > { %v1203_v51 = vsel %vm7930_vm5, %v1198_v4, %v1202_v31  ;;  %7230 = vmatprep.subr.bf16.mxu1 %v7548_v40  ;;  %v1624_v46 = vsel %vm7912_vm4, %v1622_v8, %v1623_v52  ;;  %v1234_v2 = vshll.u32 %v5800_v55, 16  ;;  %v7564_v62 = vld [vmem:[%s9420_s1 + $0x2e0] sm:$0xff]   ;;  %v1217_v26 = vrot.slane %v1215_v48, 4  ;;  %v5803_v19 = vld [vmem:[%s7896_s6 + $0x5c] sm:$0x1] }
  0xc0   : > { %7117 = vmatpush3.bf16.msra.mxu0 %v7531_v9  ;;  %1518 = vst [vmem:[#allocation2 + $0x130] sm:$0xf] %v1203_v51  ;;  %v1208_v63 = vrot.slane %v1207_v43, 4  ;;  %1743 = vst [vmem:[#allocation2 + $0x158] sm:$0xf] %v1624_v46  ;;  %v1220_v9 = vrot.slane %v1218_v56, 5 }
  0xc1   : > { %7118 = vmatprep.subr.bf16.mxu0 %v7546_v16  ;;  %5081 = vmatmul.mubr.bf16.gmra.mxu1 %v7523_v44  ;;  %v5900_v23 = vrot.slane %v8088_v10, 9  ;;  %v7563_v60 = vld [vmem:[%s9420_s1 + $0x220] sm:$0xff]   ;;  %v1226_v22 = vrot.slane %v1224_v45, 5  ;;  %v1230_v18 = vrot.slane %v1228_v6, 4  ;;  %v1236_v31 = vrot.slane %v1234_v2, 5  ;;  %v7579_v51 = vld [vmem:[%s9420_s1 + $0x218] sm:$0xff]  }
  0xc2   : > { %5088 = vmatprep.mubr.bf16.mxu1 %v7526_v33  ;;  %v1627_v32 = vrot.slane %v8094_v14, 5  ;;  %v7565_v17 = vld [vmem:[%s9420_s1 + $0x2a0] sm:$0xff]   ;;  %v1213_v10 = vsel %vm7930_vm5, %v1208_v63, %v1212_v47  ;;  %v1221_v16 = vor.u32 %v1220_v9, %v1217_v26  ;;  %v1630_v34 = vrot.slane %v5800_v55, 5  ;;  %7231 = vmatpush3.bf16.msra.mxu1 %v7549_v50  ;;  %v7578_v33 = vld [vmem:[%s9420_s1 + $0x258] sm:$0xff]  }
  0xc3   : > { %3799 = vmatmul.mubr.bf16.gmra.mxu0 %v7522_v1  ;;  %v7529_v7 = vld [vmem:[#allocation2 + $0x9c] ss:$36 sps:$4 sm:$0xff]   ;;  %v1239_v12 = vshrl.u32 %v8109_v5, 16  ;;  %1519 = vst [vmem:[#allocation2 + $0x154] sm:$0xf] %v1213_v10  ;;  %v1231_v40 = vor.u32 %v1230_v18, %v1226_v22  ;;  %v1242_v44 = vshll.u32 %v8109_v5, 16  ;;  %7232 = vmatprep.subr.bf16.mxu1 %v7564_v62 }
  0xc4   : > { %3806 = vmatprep.mubr.bf16.mxu0 %v7524_v35  ;;  %7119 = vmatpush3.bf16.msra.mxu0 %v7547_v49  ;;  %v7528_v30 = vld [vmem:[#allocation2 + $0xa0] ss:$36 sps:$4 sm:$0xff]   ;;  %v1628_v14 = vsel %vm7912_vm4, %v5900_v23, %v1627_v32  ;;  %v1629_v1 = vrot.slane %v1627_v32, 4  ;;  %v7534_v35 = vld [vmem:[#allocation2 + $0xec] ss:$36 sps:$4 sm:$0xff]   ;;  %v1222_v37 = vrot.slane %v1221_v16, 4 }
  0xc5   : > { %7120 = vmatprep.subr.bf16.mxu0 %v7562_v20  ;;  %v7536_v4 = vld [vmem:[#allocation2 + $0xe8] ss:$36 sps:$4 sm:$0xff]   ;;  %1744 = vst [vmem:[#allocation2 + $0x17c] sm:$0xf] %v1628_v14  ;;  %v1241_v47 = vrot.slane %v1239_v12, 4  ;;  %v1232_v21 = vrot.slane %v1231_v40, 4 }
  0xc6   : > { %v1631_v49 = vsel %vm7912_vm4, %v1629_v1, %v1630_v34  ;;  %v1244_v8 = vrot.slane %v1242_v44, 5  ;;  %v1248_v52 = vshll.u32 %v8120_v42, 16  ;;  %v1227_v43 = vsel %vm7930_vm5, %v1222_v37, %v1226_v22  ;;  %v7580_v46 = vld [vmem:[%s9420_s1 + $0x2d8] sm:$0xff]   ;;  %7233 = vmatpush3.bf16.msra.mxu1 %v7565_v17  ;;  %v7538_v18 = vld [vmem:[#allocation2 + $0xe8] ss:$36 sps:$4 sm:$0xff]  }
  0xc7   : > { %1745 = vst [vmem:[#allocation2 + $0x1a0] sm:$0xf] %v1631_v49  ;;  %v1252_v55 = vshrl.u32 %v8120_v42, 16  ;;  %v1258_v48 = vshll.u32 %v5803_v19, 16  ;;  %v5901_v56 = vrot.slane %v8109_v5, 9  ;;  %v1237_v50 = vsel %vm7930_vm5, %v1232_v21, %v1236_v31  ;;  %7234 = vmatprep.subr.bf16.mxu1 %v7580_v46 }
  0xc8   : > { %7121 = vmatpush3.bf16.msra.mxu0 %v7563_v60  ;;  %1520 = vst [vmem:[#allocation2 + $0x178] sm:$0xf] %v1227_v43  ;;  %v1245_v45 = vor.u32 %v1244_v8, %v1241_v47  ;;  %v1250_v6 = vrot.slane %v1248_v52, 5  ;;  %v1634_v2 = vrot.slane %v8120_v42, 5  ;;  %1521 = vst [vmem:[#allocation2 + $0x19c] sm:$0xf] %v1237_v50 }
  0xc9   : > { %7122 = vmatprep.subr.bf16.mxu0 %v7578_v33  ;;  %5089 = vmatmul.mubr.bf16.gmra.mxu1 %v7529_v7  ;;  %v1254_v20 = vrot.slane %v1252_v55, 4  ;;  %v1637_v62 = vrot.slane %v5803_v19, 5  ;;  %v1263_v5 = vshrl.u32 %v8147_v36, 16  ;;  %v1260_v42 = vrot.slane %v1258_v48, 5  ;;  %v7539_v31 = vld [vmem:[#allocation2 + $0xe4] ss:$36 sps:$4 sm:$0xff]  }
  0xca   : > { %5096 = vmatprep.mubr.bf16.mxu1 %v7536_v4  ;;  %v1246_v63 = vrot.slane %v1245_v45, 4  ;;  %v1635_v26 = vsel %vm7912_vm4, %v5901_v56, %v1634_v2  ;;  %v1636_v9 = vrot.slane %v1634_v2, 4  ;;  %v1266_v22 = vshll.u32 %v8147_v36, 16  ;;  %v7540_v7 = vld [vmem:[#allocation2 + $0x134] ss:$36 sps:$4 sm:$0xff]  }
  0xcb   : > { %3807 = vmatmul.mubr.bf16.gmra.mxu0 %v7528_v30  ;;  %v1255_v23 = vor.u32 %v1254_v20, %v1250_v6  ;;  %1746 = vst [vmem:[#allocation2 + $0x1c4] sm:$0xf] %v1635_v26  ;;  %v1265_v60 = vrot.slane %v1263_v5, 4  ;;  %v5806_v16 = vld [vmem:[%s7896_s6 + $0x68] sm:$0x1]  ;;  %v1272_v19 = vshll.u32 %v8153_v39, 16 }
  0xcc   : > { %3814 = vmatprep.mubr.bf16.mxu0 %v7534_v35  ;;  %7123 = vmatpush3.bf16.msra.mxu0 %v7579_v51  ;;  %v1251_v32 = vsel %vm7930_vm5, %v1246_v63, %v1250_v6  ;;  %v1638_v17 = vsel %vm7912_vm4, %v1636_v9, %v1637_v62  ;;  %v1268_v34 = vrot.slane %v1266_v22, 5  ;;  %v1276_v12 = vshrl.u32 %v8153_v39, 16  ;;  %v7542_v30 = vld [vmem:[#allocation2 + $0x130] ss:$36 sps:$4 sm:$0xff]   ;;  %v7581_v55 = vld [vmem:[%s9420_s1 + $0x298] sm:$0xff]  }
  0xcd   : > { %v1256_v10 = vrot.slane %v1255_v23, 4  ;;  %1522 = vst [vmem:[#allocation2 + $0x1c0] sm:$0xf] %v1251_v32  ;;  %1747 = vst [vmem:[#allocation2 + $0x1e8] sm:$0xf] %v1638_v17  ;;  %v1282_v40 = vshll.u32 %v5806_v16, 16  ;;  %7235 = vmatpush3.bf16.msra.mxu1 %v7581_v55 }
  0xce   : > { %v5902_v14 = vrot.slane %v8147_v36, 9  ;;  %v1641_v1 = vrot.slane %v8153_v39, 5  ;;  %v1644_v44 = vrot.slane %v5806_v16, 5  ;;  %v1269_v35 = vor.u32 %v1268_v34, %v1265_v60  ;;  %v5809_v49 = vld [vmem:[%s7896_s6 + $0x74] sm:$0x1] }
  0xcf   : > { %v1261_v33 = vsel %vm7930_vm5, %v1256_v10, %v1260_v42  ;;  %v1274_v4 = vrot.slane %v1272_v19, 5  ;;  %v1278_v37 = vrot.slane %v1276_v12, 4  ;;  %v1284_v52 = vrot.slane %v1282_v40, 5  ;;  %v7545_v48 = vld [vmem:[#allocation2 + $0x12c] ss:$36 sps:$4 sm:$0xff]  }
  0xd0   : > { %1523 = vst [vmem:[#allocation2 + $0x1e4] sm:$0xf] %v1261_v33  ;;  %v1642_v47 = vsel %vm7912_vm4, %v5902_v14, %v1641_v1  ;;  %v1643_v21 = vrot.slane %v1641_v1, 4  ;;  %v1270_v36 = vrot.slane %v1269_v35, 4  ;;  %v1287_v51 = vshrl.u32 %v8168_v13, 16  ;;  %v7594_v63 = vld [vmem:[%s9420_s1 + $0x250] sm:$0xff]  }
  0xd1   : > { %5097 = vmatmul.mubr.bf16.gmra.mxu1 %v7539_v31  ;;  %v1279_v8 = vor.u32 %v1278_v37, %v1274_v4  ;;  %1748 = vst [vmem:[#allocation2 + $0x20c] sm:$0xf] %v1642_v47  ;;  %v1290_v43 = vshll.u32 %v8168_v13, 16  ;;  %v1296_v46 = vshll.u32 %v8182_v28, 16  ;;  %v1300_v50 = vshrl.u32 %v8182_v28, 16  ;;  %v7595_v60 = vld [vmem:[%s9420_s1 + $0x210] sm:$0xff]   ;;  %7124 = vmatprep.subr.bf16.mxu0 %v7594_v63 }
  0xd2   : > { %5104 = vmatprep.mubr.bf16.mxu1 %v7542_v30  ;;  %v1645_v39 = vsel %vm7912_vm4, %v1643_v21, %v1644_v44  ;;  %v1306_v45 = vshll.u32 %v5809_v49, 16  ;;  %v7544_v6 = vld [vmem:[#allocation2 + $0x130] ss:$36 sps:$4 sm:$0xff]   ;;  %v1275_v2 = vsel %vm7930_vm5, %v1270_v36, %v1274_v4  ;;  %v1289_v20 = vrot.slane %v1287_v51, 4  ;;  %v7550_v26 = vld [vmem:[#allocation2 + $0x17c] ss:$36 sps:$4 sm:$0xff]   ;;  %7125 = vmatpush3.bf16.msra.mxu0 %v7595_v60 }
  0xd3   : > { %3815 = vmatmul.mubr.bf16.gmra.mxu0 %v7538_v18  ;;  %v1280_v56 = vrot.slane %v1279_v8, 4  ;;  %1749 = vst [vmem:[#allocation2 + $0x230] sm:$0xf] %v1645_v39  ;;  %v1292_v62 = vrot.slane %v1290_v43, 5  ;;  %v5903_v5 = vrot.slane %v8168_v13, 9  ;;  %v1298_v23 = vrot.slane %v1296_v46, 5 }
  0xd4   : > { %3822 = vmatprep.mubr.bf16.mxu0 %v7540_v7  ;;  %1524 = vst [vmem:[#allocation2 + $0x208] sm:$0xf] %v1275_v2  ;;  %v1302_v42 = vrot.slane %v1300_v50, 4  ;;  %v7552_v22 = vld [vmem:[#allocation2 + $0x178] ss:$36 sps:$4 sm:$0xff]   ;;  %v1308_v13 = vrot.slane %v1306_v45, 5 }
  0xd5   : > { %v1285_v9 = vsel %vm7930_vm5, %v1280_v56, %v1284_v52  ;;  %v1293_v18 = vor.u32 %v1292_v62, %v1289_v20  ;;  %v1648_v31 = vrot.slane %v8182_v28, 5  ;;  %v1651_v17 = vrot.slane %v5809_v49, 5  ;;  %v5812_v28 = vld [vmem:[%s7896_s6 + $0x80] sm:$0x1]  ;;  %v7555_v40 = vld [vmem:[#allocation2 + $0x174] ss:$36 sps:$4 sm:$0xff]  }
  0xd6   : > { %1525 = vst [vmem:[#allocation2 + $0x22c] sm:$0xf] %v1285_v9  ;;  %v1303_v32 = vor.u32 %v1302_v42, %v1298_v23  ;;  %v1311_v7 = vshrl.u32 %v8203_v11, 16  ;;  %v1314_v10 = vshll.u32 %v8203_v11, 16  ;;  %v7596_v35 = vld [vmem:[%s9420_s1 + $0x2d0] sm:$0xff]   ;;  %v1320_v37 = vshll.u32 %v8209_v59, 16 }
  0xd7   : > { %v1649_v16 = vsel %vm7912_vm4, %v5903_v5, %v1648_v31  ;;  %v1294_v34 = vrot.slane %v1293_v18, 4  ;;  %v1650_v12 = vrot.slane %v1648_v31, 4  ;;  %v7554_v4 = vld [vmem:[#allocation2 + $0x178] ss:$36 sps:$4 sm:$0xff]   ;;  %v1324_v47 = vshrl.u32 %v8209_v59, 16  ;;  %7236 = vmatprep.subr.bf16.mxu1 %v7596_v35  ;;  %v7610_v42 = vld [vmem:[%s9420_s1 + $0x248] sm:$0xff]  }
  0xd8   : > { %v1304_v19 = vrot.slane %v1303_v32, 4  ;;  %1750 = vst [vmem:[#allocation2 + $0x254] sm:$0xf] %v1649_v16  ;;  %v1313_v30 = vrot.slane %v1311_v7, 4  ;;  %v1316_v33 = vrot.slane %v1314_v10, 5  ;;  %v1330_v21 = vshll.u32 %v5812_v28, 16  ;;  %7126 = vmatprep.subr.bf16.mxu0 %v7610_v42 }
  0xd9   : > { %5105 = vmatmul.mubr.bf16.gmra.mxu1 %v7545_v48  ;;  %v1299_v14 = vsel %vm7930_vm5, %v1294_v34, %v1298_v23  ;;  %v1652_v44 = vsel %vm7912_vm4, %v1650_v12, %v1651_v17  ;;  %v5904_v49 = vrot.slane %v8203_v11, 9  ;;  %v7556_v8 = vld [vmem:[#allocation2 + $0x1c4] ss:$36 sps:$4 sm:$0xff]   ;;  %v1655_v36 = vrot.slane %v8209_v59, 5  ;;  %v5815_v43 = vld [vmem:[%s7896_s6 + $0x8c] sm:$0x1] }
  0xda   : > { %5112 = vmatprep.mubr.bf16.mxu1 %v7552_v22  ;;  %v1309_v1 = vsel %vm7930_vm5, %v1304_v19, %v1308_v13  ;;  %1526 = vst [vmem:[#allocation2 + $0x250] sm:$0xf] %v1299_v14  ;;  %1751 = vst [vmem:[#allocation2 + $0x278] sm:$0xf] %v1652_v44  ;;  %v1317_v52 = vor.u32 %v1316_v33, %v1313_v30  ;;  %v7558_v39 = vld [vmem:[#allocation2 + $0x1c0] ss:$36 sps:$4 sm:$0xff]  }
  0xdb   : > { %3823 = vmatmul.mubr.bf16.gmra.mxu0 %v7544_v6  ;;  %1527 = vst [vmem:[#allocation2 + $0x274] sm:$0xf] %v1309_v1  ;;  %v1658_v51 = vrot.slane %v5812_v28, 5  ;;  %v1322_v48 = vrot.slane %v1320_v37, 5  ;;  %v1326_v56 = vrot.slane %v1324_v47, 4  ;;  %v1332_v46 = vrot.slane %v1330_v21, 5 }
  0xdc   : > { %3830 = vmatprep.mubr.bf16.mxu0 %v7550_v26  ;;  %v1318_v55 = vrot.slane %v1317_v52, 4  ;;  %v1656_v50 = vsel %vm7912_vm4, %v5904_v49, %v1655_v36  ;;  %v1657_v45 = vrot.slane %v1655_v36, 4  ;;  %v1335_v6 = vshrl.u32 %v8222_v38, 16  ;;  %v7597_v59 = vld [vmem:[%s9420_s1 + $0x290] sm:$0xff]   ;;  %v7560_v18 = vld [vmem:[#allocation2 + $0x1c0] ss:$36 sps:$4 sm:$0xff]  }
  0xdd   : > { %v1338_v11 = vshll.u32 %v8222_v38, 16  ;;  %v1327_v20 = vor.u32 %v1326_v56, %v1322_v48  ;;  %1752 = vst [vmem:[#allocation2 + $0x29c] sm:$0xf] %v1656_v50  ;;  %v1344_v62 = vshll.u32 %v8233_v61, 16  ;;  %v1348_v5 = vshrl.u32 %v8233_v61, 16  ;;  %7237 = vmatpush3.bf16.msra.mxu1 %v7597_v59  ;;  %v7611_v35 = vld [vmem:[%s9420_s1 + $0x208] sm:$0xff]  }
  0xde   : > { %v1323_v2 = vsel %vm7930_vm5, %v1318_v55, %v1322_v48  ;;  %v1659_v63 = vsel %vm7912_vm4, %v1657_v45, %v1658_v51  ;;  %v1337_v26 = vrot.slane %v1335_v6, 4  ;;  %v1354_v23 = vshll.u32 %v5815_v43, 16  ;;  %v7561_v13 = vld [vmem:[#allocation2 + $0x1bc] ss:$36 sps:$4 sm:$0xff]   ;;  %v7566_v17 = vld [vmem:[#allocation2 + $0x20c] ss:$36 sps:$4 sm:$0xff]   ;;  %7127 = vmatpush3.bf16.msra.mxu0 %v7611_v35 }
  0xdf   : > { %1528 = vst [vmem:[#allocation2 + $0x298] sm:$0xf] %v1323_v2  ;;  %v1340_v9 = vrot.slane %v1338_v11, 5  ;;  %v1328_v60 = vrot.slane %v1327_v20, 4  ;;  %1753 = vst [vmem:[#allocation2 + $0x2c0] sm:$0xf] %v1659_v63 }
  0xe0   : > { %v1346_v22 = vrot.slane %v1344_v62, 5  ;;  %v1350_v32 = vrot.slane %v1348_v5, 4  ;;  %v7568_v7 = vld [vmem:[#allocation2 + $0x208] ss:$36 sps:$4 sm:$0xff]   ;;  %v1356_v16 = vrot.slane %v1354_v23, 5  ;;  %v5905_v34 = vrot.slane %v8222_v38, 9 }
  0xe1   : > { %5113 = vmatmul.mubr.bf16.gmra.mxu1 %v7555_v40  ;;  %v1341_v31 = vor.u32 %v1340_v9, %v1337_v26  ;;  %v1333_v10 = vsel %vm7930_vm5, %v1328_v60, %v1332_v46  ;;  %v1662_v19 = vrot.slane %v8233_v61, 5  ;;  %v1665_v28 = vrot.slane %v5815_v43, 5  ;;  %v5818_v1 = vld [vmem:[%s7896_s6 + $0x98] sm:$0x1]  ;;  %v7612_v47 = vld [vmem:[%s9420_s1 + $0x2c8] sm:$0xff]   ;;  %v7626_v48 = vld [vmem:[%s9420_s1 + $0x240] sm:$0xff]  }
  0xe2   : > { %5120 = vmatprep.mubr.bf16.mxu1 %v7558_v39  ;;  %1529 = vst [vmem:[#allocation2 + $0x2bc] sm:$0xf] %v1333_v10  ;;  %v1351_v30 = vor.u32 %v1350_v32, %v1346_v22  ;;  %v1359_v44 = vshrl.u32 %v8263_v54, 16  ;;  %v1362_v33 = vshll.u32 %v8263_v54, 16  ;;  %v1372_v37 = vshrl.u32 %v8266_v0, 16  ;;  %v7613_v36 = vld [vmem:[%s9420_s1 + $0x288] sm:$0xff]   ;;  %7238 = vmatprep.subr.bf16.mxu1 %v7612_v47 }
  0xe3   : > { %3831 = vmatmul.mubr.bf16.gmra.mxu0 %v7554_v4  ;;  %v1342_v12 = vrot.slane %v1341_v31, 4  ;;  %v1663_v40 = vsel %vm7912_vm4, %v5905_v34, %v1662_v19  ;;  %v1664_v14 = vrot.slane %v1662_v19, 4  ;;  %v1368_v4 = vshll.u32 %v8266_v0, 16  ;;  %v7571_v56 = vld [vmem:[#allocation2 + $0x204] ss:$36 sps:$4 sm:$0xff]   ;;  %7239 = vmatpush3.bf16.msra.mxu1 %v7613_v36 }
  0xe4   : > { %3838 = vmatprep.mubr.bf16.mxu0 %v7556_v8  ;;  %v1352_v61 = vrot.slane %v1351_v30, 4  ;;  %1754 = vst [vmem:[#allocation2 + $0x2e4] sm:$0xf] %v1663_v40  ;;  %v1361_v49 = vrot.slane %v1359_v44, 4  ;;  %v1364_v8 = vrot.slane %v1362_v33, 5  ;;  %v1378_v52 = vshll.u32 %v5818_v1, 16  ;;  %7128 = vmatprep.subr.bf16.mxu0 %v7626_v48 }
  0xe5   : > { %v1347_v38 = vsel %vm7930_vm5, %v1342_v12, %v1346_v22  ;;  %v1666_v21 = vsel %vm7912_vm4, %v1664_v14, %v1665_v28  ;;  %v1370_v51 = vrot.slane %v1368_v4, 5  ;;  %v1374_v43 = vrot.slane %v1372_v37, 4  ;;  %v8617_v6 = vld [vmem:[%s7896_s6 + $0xa4] sm:$0x1]  ;;  %v7570_v9 = vld [vmem:[#allocation2 + $0x208] ss:$36 sps:$4 sm:$0xff]  }
  0xe6   : > { %1530 = vst [vmem:[#allocation2 + $0x2e0] sm:$0xf] %v1347_v38  ;;  %v1357_v39 = vsel %vm7930_vm5, %v1352_v61, %v1356_v16  ;;  %1755 = vst [vmem:[#allocation2 + $0x308] sm:$0xf] %v1666_v21  ;;  %v5906_v55 = vrot.slane %v8263_v54, 9  ;;  %v1365_v46 = vor.u32 %v1364_v8, %v1361_v49  ;;  %v1669_v50 = vrot.slane %v8266_v0, 5 }
  0xe7   : > { %1531 = vst [vmem:[#allocation2 + $0x304] sm:$0xf] %v1357_v39  ;;  %v1672_v45 = vrot.slane %v5818_v1, 5  ;;  %v7627_v11 = vld [vmem:[%s9420_s1 + $0x200] sm:$0xff]   ;;  %v1375_v59 = vor.u32 %v1374_v43, %v1370_v51  ;;  %v1383_v54 = vshrl.u32 %v8279_v27, 16  ;;  %v1386_v2 = vshll.u32 %v8279_v27, 16 }
  0xe8   : > { %v1392_v20 = vshll.u32 %v8282_v29, 16  ;;  %v7628_v0 = vld [vmem:[%s9420_s1 + $0x2c0] sm:$0xff]   ;;  %v1366_v62 = vrot.slane %v1365_v46, 4  ;;  %v1380_v5 = vrot.slane %v1378_v52, 5  ;;  %v1670_v63 = vsel %vm7912_vm4, %v5906_v55, %v1669_v50  ;;  %7129 = vmatpush3.bf16.msra.mxu0 %v7627_v11  ;;  %v7572_v23 = vld [vmem:[#allocation2 + $0x254] ss:$36 sps:$4 sm:$0xff]  }
  0xe9   : > { %5121 = vmatmul.mubr.bf16.gmra.mxu1 %v7561_v13  ;;  %v1671_v26 = vrot.slane %v1669_v50, 4  ;;  %v7574_v42 = vld [vmem:[#allocation2 + $0x250] ss:$36 sps:$4 sm:$0xff]   ;;  %1756 = vst [vmem:[#allocation2 + $0x32c] sm:$0xf] %v1670_v63  ;;  %7240 = vmatprep.subr.bf16.mxu1 %v7628_v0  ;;  %v1376_v22 = vrot.slane %v1375_v59, 4 }
  0xea   : > { %5128 = vmatprep.mubr.bf16.mxu1 %v7568_v7  ;;  %v1371_v60 = vsel %vm7930_vm5, %v1366_v62, %v1370_v51  ;;  %v1385_v13 = vrot.slane %v1383_v54, 4  ;;  %v1388_v31 = vrot.slane %v1386_v2, 5  ;;  %v1394_v32 = vrot.slane %v1392_v20, 5  ;;  %v7629_v19 = vld [vmem:[%s9420_s1 + $0x280] sm:$0xff]   ;;  %v7577_v40 = vld [vmem:[#allocation2 + $0x24c] ss:$36 sps:$4 sm:$0xff]  }
  0xeb   : > { %3839 = vmatmul.mubr.bf16.gmra.mxu0 %v7560_v18  ;;  %v1673_v18 = vsel %vm7912_vm4, %v1671_v26, %v1672_v45  ;;  %1532 = vst [vmem:[#allocation2 + $0x328] sm:$0xf] %v1371_v60  ;;  %v1402_v7 = vshll.u32 %v8617_v6, 16  ;;  %v1381_v10 = vsel %vm7930_vm5, %v1376_v22, %v1380_v5  ;;  %v5907_v16 = vrot.slane %v8279_v27, 9  ;;  %7241 = vmatpush3.bf16.msra.mxu1 %v7629_v19  ;;  %v7582_v35 = vld [vmem:[#allocation2 + $0x29c] ss:$36 sps:$4 sm:$0xff]  }
  0xec   : > { %3846 = vmatprep.mubr.bf16.mxu0 %v7566_v17  ;;  %1757 = vst [vmem:[#allocation2 + $0x350] sm:$0xf] %v1673_v18  ;;  %v1396_v17 = vshrl.u32 %v8282_v29, 16  ;;  %v1676_v34 = vrot.slane %v8282_v29, 5  ;;  %1533 = vst [vmem:[#allocation2 + $0x34c] sm:$0xf] %v1381_v10  ;;  %v1389_v12 = vor.u32 %v1388_v31, %v1385_v13 }
  0xed   : > { %v1679_v28 = vrot.slane %v8617_v6, 5  ;;  %v1404_v14 = vrot.slane %v1402_v7, 5  ;;  %v7576_v29 = vld [vmem:[#allocation2 + $0x250] ss:$36 sps:$4 sm:$0xff]   ;;  %v1407_v61 = vshrl.u32 %v8307_v53, 16  ;;  %v1410_v4 = vshll.u32 %v8307_v53, 16 }
  0xee   : > { %v1398_v30 = vrot.slane %v1396_v17, 4  ;;  %v1677_v27 = vsel %vm7912_vm4, %v5907_v16, %v1676_v34  ;;  %v1390_v1 = vrot.slane %v1389_v12, 4  ;;  %v1678_v33 = vrot.slane %v1676_v34, 4  ;;  %v5824_v38 = vld [vmem:[%s7896_s6 + $0xb0] sm:$0x1]  ;;  %v6682_v11 = vpop.f32.mrf.mxu0 }
  0xef   : > { %1758 = vst [vmem:[#allocation2 + $0x374] sm:$0xf] %v1677_v27  ;;  %v1416_v37 = vshll.u32 %v8310_v3, 16  ;;  %v1420_v47 = vshrl.u32 %v8310_v3, 16  ;;  %v6794_v21 = vpop.f32.mrf.mxu1  ;;  %v7584_v49 = vld [vmem:[#allocation2 + $0x298] ss:$36 sps:$4 sm:$0xff]  }
  0xf0   : > { %v1399_v44 = vor.u32 %v1398_v30, %v1394_v32  ;;  %v1395_v8 = vsel %vm7930_vm5, %v1390_v1, %v1394_v32  ;;  %v1680_v36 = vsel %vm7912_vm4, %v1678_v33, %v1679_v28  ;;  %v1426_v39 = vshll.u32 %v5824_v38, 16  ;;  %v8662_v0 = vld [vmem:[%s9421_s2] ss:$0 sm:$0xff]  ;;  %v8667_v5 = vld [vmem:[%s7896_s6 + $0xbc] sm:$0x1] }
  0xf1   : > { %5129 = vmatmul.mubr.bf16.gmra.mxu1 %v7571_v56  ;;  %1534 = vst [vmem:[#allocation2 + $0x370] sm:$0xf] %v1395_v8  ;;  %1759 = vst [vmem:[#allocation2 + $0x398] sm:$0xf] %v1680_v36  ;;  %v1409_v51 = vrot.slane %v1407_v61, 4  ;;  %v1412_v43 = vrot.slane %v1410_v4, 5  ;;  %v6795_v56 = vpop.f32.mrf.mxu1 }
  0xf2   : > { %5136 = vmatprep.mubr.bf16.mxu1 %v7574_v42  ;;  %v1400_v52 = vrot.slane %v1399_v44, 4  ;;  %v1418_v55 = vrot.slane %v1416_v37, 5  ;;  %v1422_v48 = vrot.slane %v1420_v47, 4  ;;  %v1428_v50 = vrot.slane %v1426_v39, 5  ;;  %v7587_v63 = vld [vmem:[#allocation2 + $0x294] ss:$36 sps:$4 sm:$0xff]  }
  0xf3   : > { %3847 = vmatmul.mubr.bf16.gmra.mxu0 %v7570_v9  ;;  %v5908_v45 = vrot.slane %v8307_v53, 9  ;;  %v1683_v6 = vrot.slane %v8310_v3, 5  ;;  %v6796_v59 = vadd.f32 %v6795_v56, %v6794_v21  ;;  %v1413_v54 = vor.u32 %v1412_v43, %v1409_v51  ;;  %v6797_v62 = vpop.f32.mrf.mxu1  ;;  %v6683_v3 = vpop.f32.mrf.mxu0  ;;  %v7586_v18 = vld [vmem:[#allocation2 + $0x298] ss:$36 sps:$4 sm:$0xff]   ;;  %v7590_v13 = vld [vmem:[#allocation2 + $0x2e0] ss:$36 sps:$4 sm:$0xff]  }
  0xf4   : > { %3854 = vmatprep.mubr.bf16.mxu0 %v7572_v23  ;;  %v1405_v46 = vsel %vm7930_vm5, %v1400_v52, %v1404_v14  ;;  %v1423_v2 = vor.u32 %v1422_v48, %v1418_v55  ;;  %v1686_v20 = vrot.slane %v5824_v38, 5  ;;  %v1431_v42 = vshrl.u32 %v8320_v24, 16  ;;  %v7588_v16 = vld [vmem:[#allocation2 + $0x2e4] ss:$36 sps:$4 sm:$0xff]   ;;  %v8690_v51 = vld [vmem:[%s7896_s6 + $0x18] sm:$0xf] }
  0xf5   : > { %1535 = vst [vmem:[#allocation2 + $0x394] sm:$0xf] %v1405_v46  ;;  %v1684_v53 = vsel %vm7912_vm4, %v5908_v45, %v1683_v6  ;;  %v1414_v26 = vrot.slane %v1413_v54, 4  ;;  %v1685_v23 = vrot.slane %v1683_v6, 4  ;;  %v6684_v60 = vadd.f32 %v6683_v3, %v6682_v11  ;;  %v6798_v22 = vpop.f32.mrf.mxu1  ;;  %v6685_v7 = vpop.f32.mrf.mxu0  ;;  %1766 = vst [vmem:[#allocation2 + $0x18] sm:$0xf] %v8690_v51 }
  0xf6   : > { %v1424_v9 = vrot.slane %v1423_v2, 4  ;;  %1760 = vst [vmem:[#allocation2 + $0x3bc] sm:$0xf] %v1684_v53  ;;  %v1434_v31 = vshll.u32 %v8320_v24, 16  ;;  %v1440_v32 = vshll.u32 %v8334_v58, 16  ;;  %v1444_v17 = vshrl.u32 %v8334_v58, 16 }
  0xf7   : > { %v6799_v10 = vadd.f32 %v6798_v22, %v6797_v62  ;;  %v1419_v34 = vsel %vm7930_vm5, %v1414_v26, %v1418_v55  ;;  %v1687_v12 = vsel %vm7912_vm4, %v1685_v23, %v1686_v20  ;;  %v3471_v30 = vadd.f32 %v6684_v60, %v8662_v0  ;;  %v6686_v27 = vpop.f32.mrf.mxu0  ;;  %v7592_v11 = vld [vmem:[#allocation2 + $0x2e0] ss:$36 sps:$4 sm:$0xff]   ;;  %v5830_v2 = vld [vmem:[%s7896_s6 + $0xc8] sm:$0x1] }
  0xf8   : > { %v1429_v19 = vsel %vm7930_vm5, %v1424_v9, %v1428_v50  ;;  %1536 = vst [vmem:[#allocation2 + $0x3b8] sm:$0xf] %v1419_v34  ;;  %1761 = vst [vmem:[#allocation2 + $0x3e0] sm:$0xf] %v1687_v12  ;;  %v1433_v28 = vrot.slane %v1431_v42, 4  ;;  %v1442_v14 = vrot.slane %v1440_v32, 5  ;;  %v6687_v61 = vadd.f32 %v6686_v27, %v6685_v7 }
  0xf9   : > { %5137 = vmatmul.mubr.bf16.gmra.mxu1 %v7577_v40  ;;  %1537 = vst [vmem:[#allocation2 + $0x3dc] sm:$0xf] %v1429_v19  ;;  %v1436_v40 = vrot.slane %v1434_v31, 5  ;;  %v1446_v1 = vrot.slane %v1444_v17, 4  ;;  %v1450_v44 = vshll.u32 %v8667_v5, 16  ;;  %v5909_v33 = vrot.slane %v8320_v24, 9  ;;  %v6688_v24 = vpop.f32.mrf.mxu0 }
  0xfa   : > { %5144 = vmatprep.mubr.bf16.mxu1 %v7584_v49  ;;  %v8683_v38 = vadd.f32 %v6796_v59, %v3471_v30  ;;  %v1693_v37 = vrot.slane %v8667_v5, 5  ;;  %v3474_v52 = vadd.f32 %v6687_v61, %v8662_v0  ;;  %v1455_v48 = vshrl.u32 %v8353_v15, 16  ;;  %v8696_v50 = vld [vmem:[%s7896_s6 + $0x1c] sm:$0xf]  ;;  %v8709_v62 = vld [vmem:[%s7896_s6 + $0x24] sm:$0xf] }
  0xfb   : > { %3855 = vmatmul.mubr.bf16.gmra.mxu0 %v7576_v29  ;;  %v6800_v29 = vpop.f32.mrf.mxu1  ;;  %v1437_v4 = vor.u32 %v1436_v40, %v1433_v28  ;;  %v1447_v21 = vor.u32 %v1446_v1, %v1442_v14  ;;  %v1452_v49 = vrot.slane %v1450_v44, 5  ;;  %v1458_v56 = vshll.u32 %v8353_v15, 16  ;;  %v6689_v6 = vpop.f32.mrf.mxu0  ;;  %1767 = vst [vmem:[#allocation2 + $0x3c] sm:$0xf] %v8696_v50  ;;  %v7593_v3 = vld [vmem:[#allocation2 + $0x2dc] ss:$36 sps:$4 sm:$0xff]  }
  0xfc   : > { %3862 = vmatprep.mubr.bf16.mxu0 %v7582_v35  ;;  %v1690_v35 = vrot.slane %v8334_v58, 5  ;;  %v1464_v46 = vshll.u32 %v8356_v25, 16  ;;  %v8699_v45 = vadd.f32 %v6799_v10, %v3474_v52  ;;  %v1468_v20 = vshrl.u32 %v8356_v25, 16  ;;  %1768 = vst [vmem:[#allocation2 + $0x60] sm:$0xf] %v8709_v62 }
  0xfd   : > { %v6801_v47 = vpop.f32.mrf.mxu1  ;;  %v1438_v36 = vrot.slane %v1437_v4, 4  ;;  %v1448_v55 = vrot.slane %v1447_v21, 4  ;;  %v6690_v53 = vadd.f32 %v6689_v6, %v6688_v24  ;;  %v1457_v26 = vrot.slane %v1455_v48, 4  ;;  %v6691_v23 = vpop.f32.mrf.mxu0  ;;  %v7600_v60 = vld [vmem:[#allocation2 + $0x328] ss:$36 sps:$4 sm:$0xff]  }
  0xfe   : > { %v1691_v8 = vsel %vm7912_vm4, %v5909_v33, %v1690_v35  ;;  %v6802_v58 = vadd.f32 %v6801_v47, %v6800_v29  ;;  %v1692_v39 = vrot.slane %v1690_v35, 4  ;;  %v1460_v9 = vrot.slane %v1458_v56, 5  ;;  %v7598_v32 = vld [vmem:[#allocation2 + $0x32c] ss:$36 sps:$4 sm:$0xff]   ;;  %v8719_v28 = vld [vmem:[%s7896_s6 + $0x28] sm:$0xf] }
  0xff   : > { %1762 = vst [vmem:[#allocation2 + $0x404] sm:$0xf] %v1691_v8  ;;  %v6803_v43 = vpop.f32.mrf.mxu1  ;;  %v1443_v59 = vsel %vm7930_vm5, %v1438_v36, %v1442_v14  ;;  %v1466_v22 = vrot.slane %v1464_v46, 5  ;;  %v1474_v7 = vshll.u32 %v5830_v2, 16  ;;  %v5910_v10 = vrot.slane %v8353_v15, 9 }
 0x100   : > { %v1694_v54 = vsel %vm7912_vm4, %v1692_v39, %v1693_v37  ;;  %1538 = vst [vmem:[#allocation2 + $0x400] sm:$0xf] %v1443_v59  ;;  %v1461_v17 = vor.u32 %v1460_v9, %v1457_v26  ;;  %v1697_v19 = vrot.slane %v8356_v25, 5  ;;  %v1700_v12 = vrot.slane %v5830_v2, 5  ;;  %1769 = vst [vmem:[#allocation2 + $0x84] sm:$0xf] %v8719_v28 }
 0x101   : > { %5145 = vmatmul.mubr.bf16.gmra.mxu1 %v7587_v63  ;;  %v6804_v5 = vpop.f32.mrf.mxu1  ;;  %v1453_v63 = vsel %vm7930_vm5, %v1448_v55, %v1452_v49  ;;  %1763 = vst [vmem:[#allocation2 + $0x428] sm:$0xf] %v1694_v54  ;;  %v1799_v30 = vshrl.u32 %v8690_v51, 16  ;;  %v1476_v1 = vrot.slane %v1474_v7, 5  ;;  %v8725_v15 = vld [vmem:[%s7896_s6 + $0x30] sm:$0xf] }
 0x102   : > { %5152 = vmatprep.mubr.bf16.mxu1 %v7590_v13  ;;  %v6805_v42 = vadd.f32 %v6804_v5, %v6803_v43  ;;  %1539 = vst [vmem:[#allocation2 + $0x424] sm:$0xf] %v1453_v63  ;;  %v3479_v13 = vadd.f32 %v6690_v53, %v8662_v0  ;;  %v1462_v29 = vrot.slane %v1461_v17, 4  ;;  %v1698_v35 = vsel %vm7912_vm4, %v5910_v10, %v1697_v19  ;;  %v8730_v4 = vld [vmem:[%s7896_s6 + $0x34] sm:$0xf] }
 0x103   : > { %3863 = vmatmul.mubr.bf16.gmra.mxu0 %v7586_v18  ;;  %v1470_v18 = vrot.slane %v1468_v20, 4  ;;  %v6806_v31 = vpop.f32.mrf.mxu1  ;;  %v1699_v61 = vrot.slane %v1697_v19, 4  ;;  %1770 = vst [vmem:[#allocation2 + $0xa8] sm:$0xf] %v8725_v15  ;;  %1764 = vst [vmem:[#allocation2 + $0x44c] sm:$0xf] %v1698_v35 }
 0x104   : > { %3870 = vmatprep.mubr.bf16.mxu0 %v7588_v16  ;;  %v6692_v16 = vpop.f32.mrf.mxu0  ;;  %v8721_v40 = vadd.f32 %v6802_v58, %v3479_v13  ;;  %v1467_v21 = vsel %vm7930_vm5, %v1462_v29, %v1466_v22  ;;  %v5833_v49 = vld [vmem:[%s7896_s6 + $0x20] sm:$0x1]  ;;  %v1801_v8 = vrot.slane %v1799_v30, 4  ;;  %1771 = vst [vmem:[#allocation2 + $0xcc] sm:$0xf] %v8730_v4  ;;  %v1802_v36 = vshll.u32 %v8690_v51, 16 }
 0x105   : > { %v1471_v34 = vor.u32 %v1470_v18, %v1466_v22  ;;  %v6693_v14 = vadd.f32 %v6692_v16, %v6691_v23  ;;  %v6807_v27 = vpop.f32.mrf.mxu1  ;;  %1540 = vst [vmem:[#allocation2 + $0x448] sm:$0xf] %v1467_v21  ;;  %v1701_v58 = vsel %vm7912_vm4, %v1699_v61, %v1700_v12  ;;  %v1808_v39 = vshll.u32 %v8696_v50, 16  ;;  %v7603_v56 = vld [vmem:[#allocation2 + $0x324] ss:$36 sps:$4 sm:$0xff]  }
 0x106   : > { %v6694_v44 = vpop.f32.mrf.mxu0  ;;  %v6808_v25 = vadd.f32 %v6807_v27, %v6806_v31  ;;  %1765 = vst [vmem:[#allocation2 + $0x470] sm:$0xf] %v1701_v58  ;;  %v1812_v46 = vshrl.u32 %v8696_v50, 16  ;;  %v7602_v59 = vld [vmem:[#allocation2 + $0x328] ss:$36 sps:$4 sm:$0xff]   ;;  %v1804_v2 = vrot.slane %v1802_v36, 5 }
 0x107   : > { %v1472_v33 = vrot.slane %v1471_v34, 4  ;;  %v3482_v37 = vadd.f32 %v6693_v14, %v8662_v0  ;;  %v6809_v47 = vpop.f32.mrf.mxu1  ;;  %v7609_v54 = vld [vmem:[#allocation2 + $0x370] ss:$36 sps:$4 sm:$0xff]   ;;  %v1810_v5 = vrot.slane %v1808_v39, 5  ;;  %v1818_v63 = vshll.u32 %v5833_v49, 16 }
 0x108   : > { %v6695_v52 = vpop.f32.mrf.mxu0  ;;  %v7606_v53 = vld [vmem:[#allocation2 + $0x374] ss:$36 sps:$4 sm:$0xff]   ;;  %v1805_v23 = vor.u32 %v1804_v2, %v1801_v8  ;;  %v2299_v22 = vrot.slane %v5833_v49, 5  ;;  %v8753_v17 = vld [vmem:[%s7896_s6 + $0x3c] sm:$0xf]  ;;  %v1826_v27 = vshll.u32 %v8709_v62, 16 }
 0x109   : > { %5153 = vmatmul.mubr.bf16.gmra.mxu1 %v7593_v3  ;;  %v1477_v24 = vsel %vm7930_vm5, %v1472_v33, %v1476_v1  ;;  %v8744_v43 = vadd.f32 %v6805_v42, %v3482_v37  ;;  %v6696_v55 = vadd.f32 %v6695_v52, %v6694_v44  ;;  %v6810_v48 = vpop.f32.mrf.mxu1  ;;  %v1814_v3 = vrot.slane %v1812_v46, 4  ;;  %1772 = vst [vmem:[#allocation2 + $0xf0] sm:$0xf] %v8753_v17  ;;  %v8761_v14 = vld [vmem:[%s7896_s6 + $0x2c] sm:$0x1] }
 0x10a   : > { %5160 = vmatprep.mubr.bf16.mxu1 %v7600_v60  ;;  %1541 = vst [vmem:[#allocation2 + $0x46c] sm:$0xf] %v1477_v24  ;;  %v6697_v6 = vpop.f32.mrf.mxu0  ;;  %v5911_v42 = vrot.slane %v8690_v51, 9  ;;  %v2296_v60 = vrot.slane %v8696_v50, 5  ;;  %v1806_v16 = vrot.slane %v1805_v23, 4  ;;  %v1823_v50 = vshrl.u32 %v8709_v62, 16 }
 0x10b   : > { %3871 = vmatmul.mubr.bf16.gmra.mxu0 %v7592_v11  ;;  %v6811_v11 = vadd.f32 %v6810_v48, %v6809_v47  ;;  %v3487_v20 = vadd.f32 %v6696_v55, %v8662_v0  ;;  %v6812_v9 = vpop.f32.mrf.mxu1  ;;  %v1815_v31 = vor.u32 %v1814_v3, %v1810_v5  ;;  %v7604_v44 = vld [vmem:[#allocation2 + $0x370] ss:$36 sps:$4 sm:$0xff]   ;;  %v7619_v21 = vld [vmem:[#allocation2 + $0x3b8] ss:$36 sps:$4 sm:$0xff]   ;;  %v1828_v8 = vrot.slane %v1826_v27, 5 }
 0x10c   : > { %3878 = vmatprep.mubr.bf16.mxu0 %v7598_v32  ;;  %v6698_v26 = vpop.f32.mrf.mxu0  ;;  %v1820_v32 = vrot.slane %v1818_v63, 5  ;;  %v2297_v51 = vsel %vm7912_vm4, %v5911_v42, %v2296_v60  ;;  %v2298_v34 = vrot.slane %v2296_v60, 4  ;;  %v1825_v35 = vrot.slane %v1823_v50, 4  ;;  %v7607_v47 = vld [vmem:[#allocation2 + $0x36c] ss:$36 sps:$4 sm:$0xff]  }
 0x10d   : > { %v8750_v18 = vadd.f32 %v6808_v25, %v3487_v20  ;;  %v6699_v13 = vadd.f32 %v6698_v26, %v6697_v6  ;;  %v6813_v10 = vpop.f32.mrf.mxu1  ;;  %v1816_v30 = vrot.slane %v1815_v31, 4  ;;  %2438 = vst [vmem:[#allocation2 + $0x20] sm:$0xf] %v2297_v51  ;;  %v1811_v25 = vsel %vm7930_vm5, %v1806_v16, %v1810_v5  ;;  %v8777_v48 = vld [vmem:[%s7896_s6 + $0x40] sm:$0xf] }
 0x10e   : > { %v6700_v7 = vpop.f32.mrf.mxu0  ;;  %v6814_v12 = vadd.f32 %v6813_v10, %v6812_v9  ;;  %v2300_v33 = vsel %vm7912_vm4, %v2298_v34, %v2299_v22  ;;  %2214 = vst [vmem:[#allocation2 + $0x1c] sm:$0xf] %v1811_v25  ;;  %v1832_v58 = vshll.u32 %v8719_v28, 16  ;;  %v1836_v36 = vshrl.u32 %v8719_v28, 16  ;;  %v7616_v6 = vld [vmem:[#allocation2 + $0x3bc] ss:$36 sps:$4 sm:$0xff]  }
 0x10f   : > { %v3490_v19 = vadd.f32 %v6699_v13, %v8662_v0  ;;  %v6815_v1 = vpop.f32.mrf.mxu1  ;;  %v1821_v49 = vsel %vm7930_vm5, %v1816_v30, %v1820_v32  ;;  %2439 = vst [vmem:[#allocation2 + $0x44] sm:$0xf] %v2300_v33  ;;  %v1842_v39 = vshll.u32 %v8761_v14, 16  ;;  %v5912_v55 = vrot.slane %v8709_v62, 9  ;;  %1773 = vst [vmem:[#allocation2 + $0x114] sm:$0xf] %v8777_v48 }
 0x110   : > { %v6701_v29 = vpop.f32.mrf.mxu0  ;;  %2215 = vst [vmem:[#allocation2 + $0x40] sm:$0xf] %v1821_v49  ;;  %v1838_v5 = vrot.slane %v1836_v36, 4  ;;  %v2306_v62 = vrot.slane %v8761_v14, 5  ;;  %v8787_v63 = vld [vmem:[%s7896_s6 + $0x4c] sm:$0xf] }
 0x111   : > { %5161 = vmatmul.mubr.bf16.gmra.mxu1 %v7603_v56  ;;  %v8768_v61 = vadd.f32 %v6811_v11, %v3490_v19  ;;  %v6702_v37 = vadd.f32 %v6701_v29, %v6700_v7  ;;  %v6816_v24 = vpop.f32.mrf.mxu1  ;;  %v1829_v11 = vor.u32 %v1828_v8, %v1825_v35  ;;  %v1844_v3 = vrot.slane %v1842_v39, 5  ;;  %1775 = vst [vmem:[#allocation2 + $0x15c] sm:$0xf] %v8787_v63  ;;  %v8796_v42 = vld [vmem:[%s7896_s6 + $0x54] sm:$0xf] }
 0x112   : > { %5168 = vmatprep.mubr.bf16.mxu1 %v7609_v54  ;;  %v6703_v52 = vpop.f32.mrf.mxu0  ;;  %v6817_v46 = vadd.f32 %v6816_v24, %v6815_v1  ;;  %v8783_v54 = vld [vmem:[%s7896_s6 + $0x48] sm:$0xf]  ;;  %v1847_v32 = vshrl.u32 %v8725_v15, 16  ;;  %v1850_v7 = vshll.u32 %v8725_v15, 16  ;;  %v8801_v10 = vld [vmem:[%s7896_s6 + $0x58] sm:$0xf] }
 0x113   : > { %3879 = vmatmul.mubr.bf16.gmra.mxu0 %v7602_v59  ;;  %v3495_v56 = vadd.f32 %v6702_v37, %v8662_v0  ;;  %v2303_v59 = vrot.slane %v8719_v28, 5  ;;  %v6818_v20 = vpop.f32.mrf.mxu1  ;;  %1774 = vst [vmem:[#allocation2 + $0x138] sm:$0xf] %v8783_v54  ;;  %v1830_v9 = vrot.slane %v1829_v11, 4  ;;  %1776 = vst [vmem:[#allocation2 + $0x180] sm:$0xf] %v8796_v42 }
 0x114   : > { %3886 = vmatprep.mubr.bf16.mxu0 %v7606_v53  ;;  %v6704_v2 = vpop.f32.mrf.mxu0  ;;  %v1834_v53 = vrot.slane %v1832_v58, 5  ;;  %v5839_v50 = vld [vmem:[%s7896_s6 + $0x38] sm:$0x1]  ;;  %v1856_v19 = vshll.u32 %v8730_v4, 16  ;;  %1777 = vst [vmem:[#allocation2 + $0x1a4] sm:$0xf] %v8801_v10 }
 0x115   : > { %v8790_v26 = vadd.f32 %v6814_v12, %v3495_v56  ;;  %v6705_v28 = vadd.f32 %v6704_v2, %v6703_v52  ;;  %v2304_v23 = vsel %vm7912_vm4, %v5912_v55, %v2303_v59  ;;  %v6819_v22 = vpop.f32.mrf.mxu1  ;;  %v2305_v31 = vrot.slane %v2303_v59, 4  ;;  %v8811_v12 = vld [vmem:[%s7896_s6 + $0x60] sm:$0xf]  ;;  %v8816_v25 = vld [vmem:[%s7896_s6 + $0x64] sm:$0xf] }
 0x116   : > { %v6706_v60 = vpop.f32.mrf.mxu0  ;;  %v1839_v13 = vor.u32 %v1838_v5, %v1834_v53  ;;  %2440 = vst [vmem:[#allocation2 + $0x68] sm:$0xf] %v2304_v23  ;;  %v6820_v51 = vadd.f32 %v6819_v22, %v6818_v20  ;;  %v1835_v34 = vsel %vm7930_vm5, %v1830_v9, %v1834_v53  ;;  %v1849_v1 = vrot.slane %v1847_v32, 4  ;;  %1778 = vst [vmem:[#allocation2 + $0x1c8] sm:$0xf] %v8811_v12 }
 0x117   : > { %v3498_v16 = vadd.f32 %v6705_v28, %v8662_v0  ;;  %v6821_v14 = vpop.f32.mrf.mxu1  ;;  %2216 = vst [vmem:[#allocation2 + $0x64] sm:$0xf] %v1835_v34  ;;  %v2307_v29 = vsel %vm7912_vm4, %v2305_v31, %v2306_v62  ;;  %v7614_v37 = vld [vmem:[#allocation2 + $0x3b8] ss:$36 sps:$4 sm:$0xff]   ;;  %1779 = vst [vmem:[#allocation2 + $0x1ec] sm:$0xf] %v8816_v25 }
 0x118   : > { %v6707_v30 = vpop.f32.mrf.mxu0  ;;  %v1840_v27 = vrot.slane %v1839_v13, 4  ;;  %2441 = vst [vmem:[#allocation2 + $0x8c] sm:$0xf] %v2307_v29  ;;  %v7625_v52 = vld [vmem:[#allocation2 + $0x400] ss:$36 sps:$4 sm:$0xff]   ;;  %v1860_v36 = vshrl.u32 %v8730_v4, 16 }
 0x119   : > { %5169 = vmatmul.mubr.bf16.gmra.mxu1 %v7607_v47  ;;  %v8819_v33 = vadd.f32 %v6817_v46, %v3498_v16  ;;  %v6708_v35 = vadd.f32 %v6707_v30, %v6706_v60  ;;  %v7617_v47 = vld [vmem:[#allocation2 + $0x3b4] ss:$36 sps:$4 sm:$0xff]   ;;  %v6822_v8 = vpop.f32.mrf.mxu1  ;;  %v1866_v39 = vshll.u32 %v5839_v50, 16  ;;  %v7622_v46 = vld [vmem:[#allocation2 + $0x404] ss:$36 sps:$4 sm:$0xff]   ;;  %v2310_v11 = vrot.slane %v8730_v4, 5 }
 0x11a   : > { %5176 = vmatprep.mubr.bf16.mxu1 %v7619_v21  ;;  %v1858_v21 = vrot.slane %v1856_v19, 5  ;;  %v6709_v49 = vpop.f32.mrf.mxu0  ;;  %v1845_v24 = vsel %vm7930_vm5, %v1840_v27, %v1844_v3  ;;  %v6823_v56 = vadd.f32 %v6822_v8, %v6821_v14  ;;  %v1862_v53 = vrot.slane %v1860_v36, 4  ;;  %v8835_v13 = vld [vmem:[%s7896_s6 + $0x44] sm:$0x1] }
 0x11b   : > { %3887 = vmatmul.mubr.bf16.gmra.mxu0 %v7604_v44  ;;  %v1852_v44 = vrot.slane %v1850_v7, 5  ;;  %v3503_v55 = vadd.f32 %v6708_v35, %v8662_v0  ;;  %2217 = vst [vmem:[#allocation2 + $0x88] sm:$0xf] %v1845_v24  ;;  %v6824_v2 = vpop.f32.mrf.mxu1  ;;  %v1868_v5 = vrot.slane %v1866_v39, 5  ;;  %v2313_v3 = vrot.slane %v5839_v50, 5 }
 0x11c   : > { %3894 = vmatprep.mubr.bf16.mxu0 %v7616_v6  ;;  %v5913_v6 = vrot.slane %v8725_v15, 9  ;;  %v6710_v59 = vpop.f32.mrf.mxu0  ;;  %v2312_v23 = vrot.slane %v2310_v11, 4  ;;  %v1863_v22 = vor.u32 %v1862_v53, %v1858_v21  ;;  %v1871_v31 = vshrl.u32 %v8753_v17, 16  ;;  %v7623_v35 = vld [vmem:[#allocation2 + $0x3fc] ss:$36 sps:$4 sm:$0xff]  }
 0x11d   : > { %v1853_v58 = vor.u32 %v1852_v44, %v1849_v1  ;;  %v8828_v62 = vadd.f32 %v6820_v51, %v3503_v55  ;;  %v6711_v28 = vadd.f32 %v6710_v59, %v6709_v49  ;;  %v6825_v15 = vpop.f32.mrf.mxu1  ;;  %v1874_v32 = vshll.u32 %v8753_v17, 16  ;;  %v7620_v8 = vld [vmem:[#allocation2 + $0x400] ss:$36 sps:$4 sm:$0xff]  }
 0x11e   : > { %v2311_v9 = vsel %vm7912_vm4, %v5913_v6, %v2310_v11  ;;  %v6712_v60 = vpop.f32.mrf.mxu0  ;;  %v6826_v16 = vadd.f32 %v6825_v15, %v6824_v2  ;;  %v2314_v51 = vsel %vm7912_vm4, %v2312_v23, %v2313_v3  ;;  %v1880_v34 = vshll.u32 %v8777_v48, 16  ;;  %v8852_v11 = vld [vmem:[%s7896_s6 + $0x6c] sm:$0xf] }
 0x11f   : > { %v1854_v20 = vrot.slane %v1853_v58, 4  ;;  %2442 = vst [vmem:[#allocation2 + $0xb0] sm:$0xf] %v2311_v9  ;;  %v3506_v7 = vadd.f32 %v6711_v28, %v8662_v0  ;;  %v6827_v19 = vpop.f32.mrf.mxu1  ;;  %v1864_v30 = vrot.slane %v1863_v22, 4  ;;  %2443 = vst [vmem:[#allocation2 + $0xd4] sm:$0xf] %v2314_v51 }
 0x120   : > { %v6713_v50 = vpop.f32.mrf.mxu0  ;;  %v1873_v14 = vrot.slane %v1871_v31, 4  ;;  %v1876_v27 = vrot.slane %v1874_v32, 5  ;;  %v1884_v29 = vshrl.u32 %v8777_v48, 16  ;;  %v5914_v6 = vrot.slane %v8753_v17, 9  ;;  %v8857_v28 = vld [vmem:[%s7896_s6 + $0x70] sm:$0xf] }
 0x121   : > { %5177 = vmatmul.mubr.bf16.gmra.mxu1 %v7617_v47  ;;  %v1859_v4 = vsel %vm7930_vm5, %v1854_v20, %v1858_v21  ;;  %v8844_v1 = vadd.f32 %v6823_v56, %v3506_v7  ;;  %v6714_v44 = vadd.f32 %v6713_v50, %v6712_v60  ;;  %v1890_v47 = vshll.u32 %v8835_v13, 16  ;;  %v6828_v49 = vpop.f32.mrf.mxu1  ;;  %v7632_v56 = vld [vmem:[#allocation2 + $0x44c] ss:$36 sps:$4 sm:$0xff]   ;;  %1780 = vst [vmem:[#allocation2 + $0x210] sm:$0xf] %v8852_v11 }
 0x122   : > { %5184 = vmatprep.mubr.bf16.mxu1 %v7625_v52  ;;  %2218 = vst [vmem:[#allocation2 + $0xac] sm:$0xf] %v1859_v4  ;;  %v6715_v21 = vpop.f32.mrf.mxu0  ;;  %v7635_v52 = vld [vmem:[#allocation2 + $0x448] ss:$36 sps:$4 sm:$0xff]   ;;  %v1869_v24 = vsel %vm7930_vm5, %v1864_v30, %v1868_v5  ;;  %v1877_v58 = vor.u32 %v1876_v27, %v1873_v14  ;;  %v1886_v36 = vrot.slane %v1884_v29, 4  ;;  %v6829_v55 = vadd.f32 %v6828_v49, %v6827_v19 }
 0x123   : > { %3895 = vmatmul.mubr.bf16.gmra.mxu0 %v7614_v37  ;;  %v1882_v37 = vrot.slane %v1880_v34, 5  ;;  %v3511_v39 = vadd.f32 %v6714_v44, %v8662_v0  ;;  %2219 = vst [vmem:[#allocation2 + $0xd0] sm:$0xf] %v1869_v24  ;;  %v6830_v2 = vpop.f32.mrf.mxu1  ;;  %v2317_v5 = vrot.slane %v8777_v48, 5  ;;  %v2320_v3 = vrot.slane %v8835_v13, 5 }
 0x124   : > { %3902 = vmatprep.mubr.bf16.mxu0 %v7622_v46  ;;  %v1892_v46 = vrot.slane %v1890_v47, 5  ;;  %v6716_v59 = vpop.f32.mrf.mxu0  ;;  %v1878_v20 = vrot.slane %v1877_v58, 4  ;;  %v8863_v17 = vld [vmem:[%s7896_s6 + $0x50] sm:$0x1]  ;;  %v1895_v60 = vshrl.u32 %v8783_v54, 16  ;;  %v1898_v15 = vshll.u32 %v8783_v54, 16 }
 0x125   : > { %v1887_v53 = vor.u32 %v1886_v36, %v1882_v37  ;;  %v8860_v9 = vadd.f32 %v6826_v16, %v3511_v39  ;;  %v6717_v23 = vadd.f32 %v6716_v59, %v6715_v21  ;;  %1781 = vst [vmem:[#allocation2 + $0x234] sm:$0xf] %v8857_v28  ;;  %v8869_v48 = vld [vmem:[%s7896_s6 + $0x78] sm:$0xf]  ;;  %v6831_v22 = vpop.f32.mrf.mxu1  ;;  %v2318_v32 = vsel %vm7912_vm4, %v5914_v6, %v2317_v5  ;;  %v8876_v16 = vld [vmem:[%s7896_s6 + $0x7c] sm:$0xf] }
 0x126   : > { %v6718_v4 = vpop.f32.mrf.mxu0  ;;  %v1883_v13 = vsel %vm7930_vm5, %v1878_v20, %v1882_v37  ;;  %v2319_v7 = vrot.slane %v2317_v5, 4  ;;  %1782 = vst [vmem:[#allocation2 + $0x258] sm:$0xf] %v8869_v48  ;;  %v6832_v34 = vadd.f32 %v6831_v22, %v6830_v2  ;;  %2444 = vst [vmem:[#allocation2 + $0xf8] sm:$0xf] %v2318_v32  ;;  %v1897_v50 = vrot.slane %v1895_v60, 4 }
 0x127   : > { %v1888_v31 = vrot.slane %v1887_v53, 4  ;;  %v3514_v51 = vadd.f32 %v6717_v23, %v8662_v0  ;;  %2220 = vst [vmem:[#allocation2 + $0xf4] sm:$0xf] %v1883_v13  ;;  %v1900_v19 = vrot.slane %v1898_v15, 5  ;;  %1783 = vst [vmem:[#allocation2 + $0x27c] sm:$0xf] %v8876_v16  ;;  %v6833_v27 = vpop.f32.mrf.mxu1 }
 0x128   : > { %v8882_v30 = vld [vmem:[%s7896_s6 + $0x84] sm:$0xf]  ;;  %v6719_v14 = vpop.f32.mrf.mxu0  ;;  %v1904_v37 = vshll.u32 %v8787_v63, 16  ;;  %v1908_v47 = vshrl.u32 %v8787_v63, 16  ;;  %v8891_v21 = vld [vmem:[%s7896_s6 + $0x88] sm:$0xf] }
 0x129   : > { %5185 = vmatmul.mubr.bf16.gmra.mxu1 %v7623_v35  ;;  %v7633_v29 = vld [vmem:[#allocation2 + $0x444] ss:$36 sps:$4 sm:$0xff]   ;;  %v1893_v44 = vsel %vm7930_vm5, %v1888_v31, %v1892_v46  ;;  %v2321_v35 = vsel %vm7912_vm4, %v2319_v7, %v2320_v3  ;;  %1784 = vst [vmem:[#allocation2 + $0x2a0] sm:$0xf] %v8882_v30  ;;  %v8894_v49 = vadd.f32 %v6829_v55, %v3514_v51  ;;  %v1914_v24 = vshll.u32 %v8863_v17, 16 }
 0x12a   : > { %5192 = vmatprep.mubr.bf16.mxu1 %v7635_v52  ;;  %2221 = vst [vmem:[#allocation2 + $0x118] sm:$0xf] %v1893_v44  ;;  %2445 = vst [vmem:[#allocation2 + $0x11c] sm:$0xf] %v2321_v35  ;;  %v1901_v52 = vor.u32 %v1900_v19, %v1897_v50  ;;  %v8899_v58 = vld [vmem:[%s7896_s6 + $0x90] sm:$0xf]  ;;  %v6721_v39 = vpop.f32.mrf.mxu0 }
 0x12b   : > { %3903 = vmatmul.mubr.bf16.gmra.mxu0 %v7620_v8  ;;  %v6720_v8 = vadd.f32 %v6719_v14, %v6718_v4  ;;  %1785 = vst [vmem:[#allocation2 + $0x2c4] sm:$0xf] %v8891_v21  ;;  %v8902_v36 = vld [vmem:[%s7896_s6 + $0x94] sm:$0xf]  ;;  %v7630_v46 = vld [vmem:[#allocation2 + $0x448] ss:$36 sps:$4 sm:$0xff]  }
 0x12c   : > { %3910 = vmatprep.mubr.bf16.mxu0 %v7632_v56  ;;  %v6834_v56 = vpop.f32.mrf.mxu1  ;;  %v7641_v6 = vld [vmem:[#allocation2 + $0x20] ss:$36 sps:$4 sm:$0xff]   ;;  %v1906_v59 = vrot.slane %v1904_v37, 5  ;;  %1786 = vst [vmem:[#allocation2 + $0x2e8] sm:$0xf] %v8899_v58  ;;  %v1902_v53 = vrot.slane %v1901_v52, 4  ;;  %v6722_v3 = vpop.f32.mrf.mxu0 }
 0x12d   : > { %1787 = vst [vmem:[#allocation2 + $0x30c] sm:$0xf] %v8902_v36  ;;  %v3519_v55 = vadd.f32 %v6720_v8, %v8662_v0  ;;  %v6835_v2 = vadd.f32 %v6834_v56, %v6833_v27  ;;  %v7638_v20 = vld [vmem:[#allocation2 + $0x18] ss:$36 sps:$4 sm:$0xff]   ;;  %v1910_v5 = vrot.slane %v1908_v47, 4  ;;  %v1916_v60 = vrot.slane %v1914_v24, 5 }
 0x12e   : > { %v6836_v23 = vpop.f32.mrf.mxu1  ;;  %v5915_v15 = vrot.slane %v8783_v54, 9  ;;  %v2324_v4 = vrot.slane %v8787_v63, 5  ;;  %v2327_v22 = vrot.slane %v8863_v17, 5  ;;  %v6723_v31 = vadd.f32 %v6722_v3, %v6721_v39  ;;  %v6724_v51 = vpop.f32.mrf.mxu0  ;;  %v7636_v47 = vld [vmem:[#allocation2 + $0x14] ss:$36 sps:$4 sm:$0xff]  }
 0x12f   : > { %v8910_v13 = vadd.f32 %v6832_v34, %v3519_v55  ;;  %v1907_v32 = vsel %vm7930_vm5, %v1902_v53, %v1906_v59  ;;  %v1911_v7 = vor.u32 %v1910_v5, %v1906_v59  ;;  %v1919_v17 = vshrl.u32 %v8796_v42, 16  ;;  %v7639_v56 = vld [vmem:[#allocation2 + $0x1c] ss:$36 sps:$4 sm:$0xff]  }
 0x130   : > { %v6837_v50 = vpop.f32.mrf.mxu1  ;;  %2222 = vst [vmem:[#allocation2 + $0x13c] sm:$0xf] %v1907_v32  ;;  %v2325_v54 = vsel %vm7912_vm4, %v5915_v15, %v2324_v4  ;;  %v2326_v63 = vrot.slane %v2324_v4, 4  ;;  %v1922_v34 = vshll.u32 %v8796_v42, 16  ;;  %v3522_v19 = vadd.f32 %v6723_v31, %v8662_v0  ;;  %v6725_v35 = vpop.f32.mrf.mxu0  ;;  %v7644_v4 = vld [vmem:[#allocation2 + $0x60] ss:$36 sps:$4 sm:$0xff]  }
 0x131   : > { %5193 = vmatmul.mubr.bf16.gmra.mxu1 %v7633_v29  ;;  %v6838_v14 = vadd.f32 %v6837_v50, %v6836_v23  ;;  %v1912_v27 = vrot.slane %v1911_v7, 4  ;;  %2446 = vst [vmem:[#allocation2 + $0x140] sm:$0xf] %v2325_v54  ;;  %v8920_v29 = vld [vmem:[%s7896_s6 + $0x5c] sm:$0x1]  ;;  %v1928_v44 = vshll.u32 %v8801_v10, 16  ;;  %v6726_v39 = vadd.f32 %v6725_v35, %v6724_v51 }
 0x132   : > { %5394 = vmatprep.mubr.bf16.mxu1 %v7641_v6  ;;  %v6839_v37 = vpop.f32.mrf.mxu1  ;;  %v2328_v8 = vsel %vm7912_vm4, %v2326_v63, %v2327_v22  ;;  %v1921_v52 = vrot.slane %v1919_v17, 4  ;;  %v8925_v24 = vadd.f32 %v6835_v2, %v3522_v19  ;;  %v1924_v6 = vrot.slane %v1922_v34, 5  ;;  %v6727_v59 = vpop.f32.mrf.mxu0  ;;  %v8941_v34 = vld [vmem:[%s7896_s6 + $0x9c] sm:$0xf] }
 0x133   : > { %3911 = vmatmul.mubr.bf16.gmra.mxu0 %v7630_v46  ;;  %v1917_v46 = vsel %vm7930_vm5, %v1912_v27, %v1916_v60  ;;  %2447 = vst [vmem:[#allocation2 + $0x164] sm:$0xf] %v2328_v8  ;;  %v1930_v53 = vrot.slane %v1928_v44, 5  ;;  %v1932_v5 = vshrl.u32 %v8801_v10, 16  ;;  %v1938_v3 = vshll.u32 %v8920_v29, 16 }
 0x134   : > { %5233 = vmatprep.mubr.bf16.mxu0 %v7638_v20  ;;  %v6840_v55 = vpop.f32.mrf.mxu1  ;;  %v7647_v20 = vld [vmem:[#allocation2 + $0x68] ss:$36 sps:$4 sm:$0xff]   ;;  %2223 = vst [vmem:[#allocation2 + $0x160] sm:$0xf] %v1917_v46  ;;  %v5916_v23 = vrot.slane %v8796_v42, 9  ;;  %v3527_v2 = vadd.f32 %v6726_v39, %v8662_v0  ;;  %v1925_v60 = vor.u32 %v1924_v6, %v1921_v52  ;;  %v2331_v22 = vrot.slane %v8801_v10, 5  ;;  %v6728_v31 = vpop.f32.mrf.mxu0 }
 0x135   : > { %v6841_v15 = vadd.f32 %v6840_v55, %v6839_v37  ;;  %v1934_v7 = vrot.slane %v1932_v5, 4  ;;  %v1940_v51 = vrot.slane %v1938_v3, 5  ;;  %v2334_v50 = vrot.slane %v8920_v29, 5  ;;  %v8944_v10 = vld [vmem:[%s7896_s6 + $0xa0] sm:$0xf] }
 0x136   : > { %v6842_v32 = vpop.f32.mrf.mxu1  ;;  %v1943_v54 = vshrl.u32 %v8811_v12, 16  ;;  %v8936_v63 = vadd.f32 %v6838_v14, %v3527_v2  ;;  %v6729_v42 = vadd.f32 %v6728_v31, %v6727_v59  ;;  %v1926_v0 = vrot.slane %v1925_v60, 4  ;;  %v6730_v19 = vpop.f32.mrf.mxu0  ;;  %v8947_v14 = vld [vmem:[%s7896_s6 + $0x68] sm:$0x1]  ;;  %1788 = vst [vmem:[#allocation2 + $0x330] sm:$0xf] %v8941_v34 }
 0x137   : > { %v2332_v17 = vsel %vm7912_vm4, %v5916_v23, %v2331_v22  ;;  %v1935_v29 = vor.u32 %v1934_v7, %v1930_v53  ;;  %v2333_v44 = vrot.slane %v2331_v22, 4  ;;  %v1946_v37 = vshll.u32 %v8811_v12, 16  ;;  %1789 = vst [vmem:[#allocation2 + $0x354] sm:$0xf] %v8944_v10  ;;  %v8962_v46 = vld [vmem:[%s7896_s6 + $0xa8] sm:$0xf] }
 0x138   : > { %v6843_v27 = vpop.f32.mrf.mxu1  ;;  %2448 = vst [vmem:[#allocation2 + $0x188] sm:$0xf] %v2332_v17  ;;  %v1945_v35 = vrot.slane %v1943_v54, 4  ;;  %v1931_v39 = vsel %vm7930_vm5, %v1926_v0, %v1930_v53  ;;  %v8965_v6 = vld [vmem:[%s7896_s6 + $0xac] sm:$0xf]  ;;  %v6731_v59 = vpop.f32.mrf.mxu0  ;;  %v1956_v2 = vshrl.u32 %v8816_v25, 16 }
 0x139   : > { %5395 = vmatmul.mubr.bf16.vlgmr.msra.gmra.mxu1 %v7639_v56  ;;  %v6844_v52 = vadd.f32 %v6843_v27, %v6842_v32  ;;  %v1952_v56 = vshll.u32 %v8816_v25, 16  ;;  %v1936_v5 = vrot.slane %v1935_v29, 4  ;;  %2224 = vst [vmem:[#allocation2 + $0x184] sm:$0xf] %v1931_v39  ;;  %v2335_v3 = vsel %vm7912_vm4, %v2333_v44, %v2334_v50  ;;  %1790 = vst [vmem:[#allocation2 + $0x378] sm:$0xf] %v8962_v46 }
 0x13a   : > { %5402 = vmatprep.mubr.bf16.mxu1 %v7647_v20  ;;  %v6845_v55 = vpop.f32.mrf.mxu1  ;;  %v7642_v20 = vld [vmem:[#allocation2 + $0x5c] ss:$36 sps:$4 sm:$0xff]   ;;  %v1948_v23 = vrot.slane %v1946_v37, 5  ;;  %1791 = vst [vmem:[#allocation2 + $0x39c] sm:$0xf] %v8965_v6  ;;  %v6733_v32 = vpop.f32.mrf.mxu0  ;;  %v1962_v0 = vshll.u32 %v8947_v14, 16 }
 0x13b   : > { %5234 = vmatmul.mubr.bf16.vlgmr.msra.gmra.mxu0 %v7636_v47  ;;  %v8955_v47 = vld [vmem:[%s9421_s2] ss:$0 sm:$0xff]  ;;  %v7645_v60 = vld [vmem:[#allocation2 + $0x64] ss:$36 sps:$4 sm:$0xff]   ;;  %v7653_v22 = vld [vmem:[#allocation2 + $0xb0] ss:$36 sps:$4 sm:$0xff]   ;;  %v1941_v50 = vsel %vm7930_vm5, %v1936_v5, %v1940_v51 }
 0x13c   : > { %v3530_v8 = vadd.f32 %v8955_v47, %v6729_v42  ;;  %5241 = vmatprep.mubr.bf16.mxu0 %v7644_v4  ;;  %v6732_v4 = vadd.f32 %v6731_v59, %v6730_v19  ;;  %2449 = vst [vmem:[#allocation2 + $0x1ac] sm:$0xf] %v2335_v3  ;;  %v1954_v31 = vrot.slane %v1952_v56, 5  ;;  %v6846_v7 = vpop.f32.mrf.mxu1  ;;  %v1949_v54 = vor.u32 %v1948_v23, %v1945_v35  ;;  %v8978_v17 = vld [vmem:[%s7896_s6 + $0xb4] sm:$0xf]  ;;  %v6734_v35 = vpop.f32.mrf.mxu0 }
 0x13d   : > { %v1958_v42 = vrot.slane %v1956_v2, 4  ;;  %v8981_v27 = vld [vmem:[%s7896_s6 + $0xb8] sm:$0xf]  ;;  %v6847_v19 = vadd.f32 %v6846_v7, %v6845_v55  ;;  %v7650_v29 = vld [vmem:[#allocation2 + $0xa8] ss:$36 sps:$4 sm:$0xff]   ;;  %v5917_v44 = vrot.slane %v8811_v12, 9 }
 0x13e   : > { %v8972_v53 = vadd.f32 %v6841_v15, %v3530_v8  ;;  %v3535_v15 = vadd.f32 %v8955_v47, %v6732_v4  ;;  %2225 = vst [vmem:[#allocation2 + $0x1a8] sm:$0xf] %v1941_v50  ;;  %v2338_v37 = vrot.slane %v8816_v25, 5  ;;  %1792 = vst [vmem:[#allocation2 + $0x3c0] sm:$0xf] %v8978_v17  ;;  %v6848_v8 = vpop.f32.mrf.mxu1  ;;  %v1950_v39 = vrot.slane %v1949_v54, 4 }
 0x13f   : > { %1793 = vst [vmem:[#allocation2 + $0x3e4] sm:$0xf] %v8981_v27  ;;  %v8989_v51 = vld [vmem:[%s7896_s6 + $0xc0] sm:$0xf]  ;;  %v1959_v56 = vor.u32 %v1958_v42, %v1954_v31  ;;  %v1964_v59 = vrot.slane %v1962_v0, 5  ;;  %v2341_v5 = vrot.slane %v8947_v14, 5  ;;  %v6735_v25 = vadd.f32 %v6734_v35, %v6733_v32  ;;  %v6736_v2 = vpop.f32.mrf.mxu0 }
 0x140   : > { %v8993_v55 = vld [vmem:[%s7896_s6 + $0xc4] sm:$0xf]  ;;  %1794 = vst [vmem:[#allocation2 + $0x408] sm:$0xf] %v8989_v51  ;;  %v8996_v12 = vadd.f32 %v6844_v52, %v3535_v15  ;;  %v2339_v3 = vsel %vm7912_vm4, %v5917_v44, %v2338_v37  ;;  %v2340_v23 = vrot.slane %v2338_v37, 4  ;;  %v6849_v4 = vpop.f32.mrf.mxu1  ;;  %v1955_v14 = vsel %vm7930_vm5, %v1950_v39, %v1954_v31 }
 0x141   : > { %5403 = vmatmul.mubr.bf16.gmra.mxu1 %v7645_v60  ;;  %1795 = vst [vmem:[#allocation2 + $0x42c] sm:$0xf] %v8993_v55  ;;  %v1960_v7 = vrot.slane %v1959_v56, 4  ;;  %2450 = vst [vmem:[#allocation2 + $0x1d0] sm:$0xf] %v2339_v3  ;;  %v1967_v52 = vshrl.u32 %v8852_v11, 16  ;;  %v3538_v32 = vadd.f32 %v8955_v47, %v6735_v25  ;;  %v6850_v54 = vadd.f32 %v6849_v4, %v6848_v8  ;;  %v6737_v42 = vpop.f32.mrf.mxu0 }
 0x142   : > { %5410 = vmatprep.mubr.bf16.mxu1 %v7653_v22  ;;  %v9004_v50 = vld [vmem:[%s7896_s6 + $0x74] sm:$0x1]  ;;  %v1970_v60 = vshll.u32 %v8852_v11, 16  ;;  %2226 = vst [vmem:[#allocation2 + $0x1cc] sm:$0xf] %v1955_v14  ;;  %v1976_v22 = vshll.u32 %v8857_v28, 16  ;;  %v6851_v31 = vpop.f32.mrf.mxu1  ;;  %v6738_v8 = vadd.f32 %v6737_v42, %v6736_v2 }
 0x143   : > { %5242 = vmatmul.mubr.bf16.gmra.mxu0 %v7642_v20  ;;  %v2342_v20 = vsel %vm7912_vm4, %v2340_v23, %v2341_v5  ;;  %v1965_v0 = vsel %vm7930_vm5, %v1960_v7, %v1964_v59  ;;  %v1969_v15 = vrot.slane %v1967_v52, 4  ;;  %v1980_v37 = vshrl.u32 %v8857_v28, 16  ;;  %v6739_v5 = vpop.f32.mrf.mxu0  ;;  %v7648_v3 = vld [vmem:[#allocation2 + $0xa4] ss:$36 sps:$4 sm:$0xff]   ;;  %v7659_v23 = vld [vmem:[#allocation2 + $0xf8] ss:$36 sps:$4 sm:$0xff]  }
 0x144   : > { %5249 = vmatprep.mubr.bf16.mxu0 %v7650_v29  ;;  %2451 = vst [vmem:[#allocation2 + $0x1f4] sm:$0xf] %v2342_v20  ;;  %v1972_v44 = vrot.slane %v1970_v60, 5  ;;  %v9015_v35 = vadd.f32 %v6847_v19, %v3538_v32  ;;  %v7651_v29 = vld [vmem:[#allocation2 + $0xac] ss:$36 sps:$4 sm:$0xff]   ;;  %v1978_v39 = vrot.slane %v1976_v22, 5  ;;  %v6852_v25 = vpop.f32.mrf.mxu1  ;;  %v3543_v59 = vadd.f32 %v8955_v47, %v6738_v8 }
 0x145   : > { %2227 = vst [vmem:[#allocation2 + $0x1f0] sm:$0xf] %v1965_v0  ;;  %v1986_v56 = vshll.u32 %v9004_v50, 16  ;;  %v1982_v14 = vrot.slane %v1980_v37, 4  ;;  %v6853_v7 = vadd.f32 %v6852_v25, %v6851_v31  ;;  %v7656_v52 = vld [vmem:[#allocation2 + $0xf0] ss:$36 sps:$4 sm:$0xff]   ;;  %v6740_v32 = vpop.f32.mrf.mxu0 }
 0x146   : > { %9427 = vst [vmem:[#allocation3_spill] sm:$0xff] %v9015_v35  ;;  %v1973_v4 = vor.u32 %v1972_v44, %v1969_v15  ;;  %v5918_v19 = vrot.slane %v8852_v11, 9  ;;  %v6854_v2 = vpop.f32.mrf.mxu1  ;;  %v2345_v22 = vrot.slane %v8857_v28, 5  ;;  %v2348_v0 = vrot.slane %v9004_v50, 5 }
 0x147   : > { %v1988_v60 = vrot.slane %v1986_v56, 5  ;;  %v1983_v42 = vor.u32 %v1982_v14, %v1978_v39  ;;  %v9022_v35 = vadd.f32 %v6850_v54, %v3543_v59  ;;  %v6741_v15 = vadd.f32 %v6740_v32, %v6739_v5  ;;  %v6742_v37 = vpop.f32.mrf.mxu0  ;;  %v5857_v56 = vld [vmem:[%s7896_s6 + $0x80] sm:$0x1] }
 0x148   : > { %v1974_v20 = vrot.slane %v1973_v4, 4  ;;  %v1991_v44 = vshrl.u32 %v8869_v48, 16  ;;  %v1994_v31 = vshll.u32 %v8869_v48, 16  ;;  %v6855_v11 = vpop.f32.mrf.mxu1  ;;  %v2346_v50 = vsel %vm7912_vm4, %v5918_v19, %v2345_v22  ;;  %v9033_v4 = vld [vmem:[%s7896_s6 + $0xcc] sm:$0xf] }
 0x149   : > { %9428 = vst [vmem:[#allocation4_spill] sm:$0xff] %v9022_v35  ;;  %5411 = vmatmul.mubr.bf16.gmra.mxu1 %v7651_v29  ;;  %v1984_v28 = vrot.slane %v1983_v42, 4  ;;  %v2347_v54 = vrot.slane %v2345_v22, 4  ;;  %v3546_v29 = vadd.f32 %v8955_v47, %v6741_v15  ;;  %v6856_v5 = vadd.f32 %v6855_v11, %v6854_v2  ;;  %2452 = vst [vmem:[#allocation2 + $0x218] sm:$0xf] %v2346_v50  ;;  %v6743_v14 = vpop.f32.mrf.mxu0 }
 0x14a   : > { %5418 = vmatprep.mubr.bf16.mxu1 %v7659_v23  ;;  %v1979_v8 = vsel %vm7930_vm5, %v1974_v20, %v1978_v39  ;;  %v1993_v25 = vrot.slane %v1991_v44, 4  ;;  %v9036_v23 = vld [vmem:[%s7896_s6 + $0xd0] sm:$0xf]  ;;  %v6857_v39 = vpop.f32.mrf.mxu1  ;;  %v2000_v32 = vshll.u32 %v8876_v16, 16  ;;  %1796 = vst [vmem:[#allocation2 + $0x450] sm:$0xf] %v9033_v4  ;;  %v6744_v2 = vadd.f32 %v6743_v14, %v6742_v37 }
 0x14b   : > { %5250 = vmatmul.mubr.bf16.gmra.mxu0 %v7648_v3  ;;  %2228 = vst [vmem:[#allocation2 + $0x214] sm:$0xf] %v1979_v8  ;;  %v1996_v3 = vrot.slane %v1994_v31, 5  ;;  %v1989_v59 = vsel %vm7930_vm5, %v1984_v28, %v1988_v60  ;;  %v2349_v19 = vsel %vm7912_vm4, %v2347_v54, %v2348_v0  ;;  %1797 = vst [vmem:[#allocation2 + $0x474] sm:$0xf] %v9036_v23  ;;  %v2004_v15 = vshrl.u32 %v8876_v16, 16  ;;  %v6745_v60 = vpop.f32.mrf.mxu0 }
 0x14c   : > { %5257 = vmatprep.mubr.bf16.mxu0 %v7656_v52  ;;  %v9045_v52 = vadd.f32 %v6853_v7, %v3546_v29  ;;  %v7654_v20 = vld [vmem:[#allocation2 + $0xec] ss:$36 sps:$4 sm:$0xff]   ;;  %v7657_v42 = vld [vmem:[#allocation2 + $0xf4] ss:$36 sps:$4 sm:$0xff]   ;;  %2229 = vst [vmem:[#allocation2 + $0x238] sm:$0xf] %v1989_v59  ;;  %v6858_v44 = vpop.f32.mrf.mxu1  ;;  %v3551_v7 = vadd.f32 %v8955_v47, %v6744_v2 }
 0x14d   : > { %2453 = vst [vmem:[#allocation2 + $0x23c] sm:$0xf] %v2349_v19  ;;  %v1997_v22 = vor.u32 %v1996_v3, %v1993_v25  ;;  %v7665_v31 = vld [vmem:[#allocation2 + $0x140] ss:$36 sps:$4 sm:$0xff]   ;;  %v2002_v0 = vrot.slane %v2000_v32, 5  ;;  %v2010_v11 = vshll.u32 %v5857_v56, 16  ;;  %v6859_v50 = vadd.f32 %v6858_v44, %v6857_v39  ;;  %v6746_v14 = vpop.f32.mrf.mxu0 }
 0x14e   : > { %9429 = vst [vmem:[#allocation5_spill] sm:$0xff] %v9045_v52  ;;  %v5919_v8 = vrot.slane %v8869_v48, 9  ;;  %v2352_v28 = vrot.slane %v8876_v16, 5  ;;  %v7662_v37 = vld [vmem:[#allocation2 + $0x138] ss:$36 sps:$4 sm:$0xff]   ;;  %v2006_v29 = vrot.slane %v2004_v15, 4  ;;  %v6860_v59 = vpop.f32.mrf.mxu1  ;;  %v9053_v32 = vadd.f32 %v6856_v5, %v3551_v7 }
 0x14f   : > { %v1998_v54 = vrot.slane %v1997_v22, 4  ;;  %v2012_v25 = vrot.slane %v2010_v11, 5  ;;  %v2355_v52 = vrot.slane %v5857_v56, 5  ;;  %v6747_v35 = vadd.f32 %v6746_v14, %v6745_v60  ;;  %v7660_v7 = vld [vmem:[#allocation2 + $0x134] ss:$36 sps:$4 sm:$0xff]  }
 0x150   : > { %v2353_v3 = vsel %vm7912_vm4, %v5919_v8, %v2352_v28  ;;  %v2354_v19 = vrot.slane %v2352_v28, 4  ;;  %v2007_v16 = vor.u32 %v2006_v29, %v2002_v0  ;;  %v6861_v2 = vpop.f32.mrf.mxu1  ;;  %v2015_v56 = vshrl.u32 %v8882_v30, 16 }
 0x151   : > { %5419 = vmatmul.mubr.bf16.gmra.mxu1 %v7657_v42  ;;  %v2003_v48 = vsel %vm7930_vm5, %v1998_v54, %v2002_v0  ;;  %2454 = vst [vmem:[#allocation2 + $0x260] sm:$0xf] %v2353_v3  ;;  %v2018_v5 = vshll.u32 %v8882_v30, 16  ;;  %v2024_v42 = vshll.u32 %v8891_v21, 16  ;;  %v3554_v15 = vadd.f32 %v8955_v47, %v6747_v35  ;;  %v5860_v0 = vld [vmem:[%s7896_s6 + $0x8c] sm:$0x1] }
 0x152   : > { %v6748_v39 = vpop.f32.mrf.mxu0  ;;  %5426 = vmatprep.mubr.bf16.mxu1 %v7665_v31  ;;  %2230 = vst [vmem:[#allocation2 + $0x25c] sm:$0xf] %v2003_v48  ;;  %v2356_v22 = vsel %vm7912_vm4, %v2354_v19, %v2355_v52  ;;  %v6862_v60 = vadd.f32 %v6861_v2, %v6860_v59  ;;  %v2008_v44 = vrot.slane %v2007_v16, 4  ;;  %v6863_v11 = vpop.f32.mrf.mxu1  ;;  %v2017_v8 = vrot.slane %v2015_v56, 4  ;;  %v7663_v54 = vld [vmem:[#allocation2 + $0x13c] ss:$36 sps:$4 sm:$0xff]  }
 0x153   : > { %5258 = vmatmul.mubr.bf16.gmra.mxu0 %v7654_v20  ;;  %2455 = vst [vmem:[#allocation2 + $0x284] sm:$0xf] %v2356_v22  ;;  %v2028_v20 = vshrl.u32 %v8891_v21, 16  ;;  %v9065_v28 = vadd.f32 %v6859_v50, %v3554_v15  ;;  %v2020_v14 = vrot.slane %v2018_v5, 5  ;;  %v2026_v3 = vrot.slane %v2024_v42, 5 }
 0x154   : > { %5265 = vmatprep.mubr.bf16.mxu0 %v7662_v37  ;;  %v6749_v31 = vpop.f32.mrf.mxu0  ;;  %v2013_v29 = vsel %vm7930_vm5, %v2008_v44, %v2012_v25  ;;  %v6864_v59 = vpop.f32.mrf.mxu1  ;;  %v7671_v37 = vld [vmem:[#allocation2 + $0x188] ss:$36 sps:$4 sm:$0xff]   ;;  %v2034_v48 = vshll.u32 %v5860_v0, 16  ;;  %v5920_v16 = vrot.slane %v8882_v30, 9  ;;  %v7668_v22 = vld [vmem:[#allocation2 + $0x180] ss:$36 sps:$4 sm:$0xff]  }
 0x155   : > { %9430 = vst [vmem:[#allocation6_spill] sm:$0xff] %v9065_v28  ;;  %v6750_v52 = vadd.f32 %v6749_v31, %v6748_v39  ;;  %2231 = vst [vmem:[#allocation2 + $0x280] sm:$0xf] %v2013_v29  ;;  %v2030_v19 = vrot.slane %v2028_v20, 4  ;;  %v6865_v50 = vadd.f32 %v6864_v59, %v6863_v11  ;;  %v2021_v39 = vor.u32 %v2020_v14, %v2017_v8 }
 0x156   : > { %v6751_v35 = vpop.f32.mrf.mxu0  ;;  %v2359_v56 = vrot.slane %v8891_v21, 5  ;;  %v2036_v5 = vrot.slane %v2034_v48, 5  ;;  %v2362_v44 = vrot.slane %v5860_v0, 5  ;;  %v2039_v28 = vshrl.u32 %v8899_v58, 16 }
 0x157   : > { %v3559_v2 = vadd.f32 %v8955_v47, %v6750_v52  ;;  %v6866_v31 = vpop.f32.mrf.mxu1  ;;  %v2031_v25 = vor.u32 %v2030_v19, %v2026_v3  ;;  %v2022_v30 = vrot.slane %v2021_v39, 4  ;;  %v2042_v0 = vshll.u32 %v8899_v58, 16 }
 0x158   : > { %v6752_v15 = vpop.f32.mrf.mxu0  ;;  %v2360_v20 = vsel %vm7912_vm4, %v5920_v16, %v2359_v56  ;;  %v2361_v52 = vrot.slane %v2359_v56, 4  ;;  %v2041_v14 = vrot.slane %v2039_v28, 4  ;;  %v2048_v19 = vshll.u32 %v8902_v36, 16  ;;  %v7666_v56 = vld [vmem:[#allocation2 + $0x17c] ss:$36 sps:$4 sm:$0xff]  }
 0x159   : > { %v9073_v29 = vadd.f32 %v6862_v60, %v3559_v2  ;;  %v6753_v42 = vadd.f32 %v6752_v15, %v6751_v35  ;;  %5427 = vmatmul.mubr.bf16.gmra.mxu1 %v7663_v54  ;;  %v6867_v8 = vpop.f32.mrf.mxu1  ;;  %v2032_v21 = vrot.slane %v2031_v25, 4  ;;  %2456 = vst [vmem:[#allocation2 + $0x2a8] sm:$0xf] %v2360_v20  ;;  %v2027_v54 = vsel %vm7930_vm5, %v2022_v30, %v2026_v3  ;;  %v5863_v35 = vld [vmem:[%s7896_s6 + $0x98] sm:$0x1] }
 0x15a   : > { %5434 = vmatprep.mubr.bf16.mxu1 %v7671_v37  ;;  %v6868_v59 = vadd.f32 %v6867_v8, %v6866_v31  ;;  %2232 = vst [vmem:[#allocation2 + $0x2a4] sm:$0xf] %v2027_v54  ;;  %v2363_v28 = vsel %vm7912_vm4, %v2361_v52, %v2362_v44  ;;  %v2044_v16 = vrot.slane %v2042_v0, 5  ;;  %v2052_v2 = vshrl.u32 %v8902_v36, 16  ;;  %v7669_v3 = vld [vmem:[#allocation2 + $0x184] ss:$36 sps:$4 sm:$0xff]  }
 0x15b   : > { %v6754_v11 = vpop.f32.mrf.mxu0  ;;  %5266 = vmatmul.mubr.bf16.gmra.mxu0 %v7660_v7  ;;  %v3562_v60 = vadd.f32 %v8955_v47, %v6753_v42  ;;  %v6869_v7 = vpop.f32.mrf.mxu1  ;;  %v2037_v37 = vsel %vm7930_vm5, %v2032_v21, %v2036_v5  ;;  %2457 = vst [vmem:[#allocation2 + $0x2cc] sm:$0xf] %v2363_v28  ;;  %v2050_v15 = vrot.slane %v2048_v19, 5  ;;  %v7677_v42 = vld [vmem:[#allocation2 + $0x1d0] ss:$36 sps:$4 sm:$0xff]   ;;  %v2058_v20 = vshll.u32 %v5863_v35, 16 }
 0x15c   : > { %5273 = vmatprep.mubr.bf16.mxu0 %v7668_v22  ;;  %2233 = vst [vmem:[#allocation2 + $0x2c8] sm:$0xf] %v2037_v37  ;;  %v2045_v30 = vor.u32 %v2044_v16, %v2041_v14  ;;  %v2054_v5 = vrot.slane %v2052_v2, 4  ;;  %v5921_v8 = vrot.slane %v8899_v58, 9  ;;  %v7674_v52 = vld [vmem:[#allocation2 + $0x1c8] ss:$36 sps:$4 sm:$0xff]  }
 0x15d   : > { %v6755_v48 = vpop.f32.mrf.mxu0  ;;  %v9088_v39 = vadd.f32 %v6865_v50, %v3562_v60  ;;  %v6870_v25 = vpop.f32.mrf.mxu1  ;;  %v2366_v50 = vrot.slane %v8902_v36, 5  ;;  %v2060_v19 = vrot.slane %v2058_v20, 5  ;;  %v2063_v37 = vshrl.u32 %v8941_v34, 16 }
 0x15e   : > { %v6756_v22 = vadd.f32 %v6755_v48, %v6754_v11  ;;  %v6871_v21 = vadd.f32 %v6870_v25, %v6869_v7  ;;  %v2369_v11 = vrot.slane %v5863_v35, 5  ;;  %v2046_v54 = vrot.slane %v2045_v30, 4  ;;  %v5866_v30 = vld [vmem:[%s7896_s6 + $0xa4] sm:$0x1] }
 0x15f   : > { %v6757_v31 = vpop.f32.mrf.mxu0  ;;  %v2055_v48 = vor.u32 %v2054_v5, %v2050_v15  ;;  %v2367_v58 = vsel %vm7912_vm4, %v5921_v8, %v2366_v50  ;;  %v2368_v7 = vrot.slane %v2366_v50, 4  ;;  %v7672_v50 = vld [vmem:[#allocation2 + $0x1c4] ss:$36 sps:$4 sm:$0xff]  }
 0x160   : > { %v3567_v44 = vadd.f32 %v8955_v47, %v6756_v22  ;;  %v6872_v60 = vpop.f32.mrf.mxu1  ;;  %v2051_v35 = vsel %vm7930_vm5, %v2046_v54, %v2050_v15  ;;  %2458 = vst [vmem:[#allocation2 + $0x2f0] sm:$0xf] %v2367_v58  ;;  %v2065_v22 = vrot.slane %v2063_v37, 4  ;;  %v5922_v58 = vrot.slane %v8941_v34, 9 }
 0x161   : > { %v6758_v0 = vpop.f32.mrf.mxu0  ;;  %5435 = vmatmul.mubr.bf16.gmra.mxu1 %v7669_v3  ;;  %v2056_v2 = vrot.slane %v2055_v48, 4  ;;  %2234 = vst [vmem:[#allocation2 + $0x2ec] sm:$0xf] %v2051_v35  ;;  %v2370_v25 = vsel %vm7912_vm4, %v2368_v7, %v2369_v11  ;;  %v7683_v48 = vld [vmem:[#allocation2 + $0x218] ss:$36 sps:$4 sm:$0xff]   ;;  %v2376_v35 = vrot.slane %v5866_v30, 5 }
 0x162   : > { %v9094_v28 = vadd.f32 %v6868_v59, %v3567_v44  ;;  %v6759_v14 = vadd.f32 %v6758_v0, %v6757_v31  ;;  %v6873_v36 = vpop.f32.mrf.mxu1  ;;  %5442 = vmatprep.mubr.bf16.mxu1 %v7677_v42  ;;  %v2066_v59 = vshll.u32 %v8941_v34, 16  ;;  %2459 = vst [vmem:[#allocation2 + $0x314] sm:$0xf] %v2370_v25  ;;  %v7675_v0 = vld [vmem:[#allocation2 + $0x1cc] ss:$36 sps:$4 sm:$0xff]  }
 0x163   : > { %v6760_v16 = vpop.f32.mrf.mxu0  ;;  %5274 = vmatmul.mubr.bf16.gmra.mxu0 %v7666_v56  ;;  %v6874_v3 = vadd.f32 %v6873_v36, %v6872_v60  ;;  %v2072_v56 = vshll.u32 %v8944_v10, 16  ;;  %v2061_v15 = vsel %vm7930_vm5, %v2056_v2, %v2060_v19  ;;  %v2076_v60 = vshrl.u32 %v8944_v10, 16  ;;  %v7680_v36 = vld [vmem:[#allocation2 + $0x210] ss:$36 sps:$4 sm:$0xff]  }
 0x164   : > { %v3570_v31 = vadd.f32 %v8955_v47, %v6759_v14  ;;  %5281 = vmatprep.mubr.bf16.mxu0 %v7674_v52  ;;  %v6875_v5 = vpop.f32.mrf.mxu1  ;;  %v2068_v20 = vrot.slane %v2066_v59, 5  ;;  %2235 = vst [vmem:[#allocation2 + $0x310] sm:$0xf] %v2061_v15  ;;  %v2082_v14 = vshll.u32 %v5866_v30, 16  ;;  %v2373_v19 = vrot.slane %v8944_v10, 5 }
 0x165   : > { %v6761_v42 = vpop.f32.mrf.mxu0  ;;  %v2074_v52 = vrot.slane %v2072_v56, 5  ;;  %v2087_v10 = vshrl.u32 %v8962_v46, 16 }
 0x166   : > { %v9108_v8 = vadd.f32 %v6871_v21, %v3570_v31  ;;  %v6762_v44 = vadd.f32 %v6761_v42, %v6760_v16  ;;  %v6876_v54 = vpop.f32.mrf.mxu1  ;;  %v2069_v37 = vor.u32 %v2068_v20, %v2065_v22  ;;  %v2078_v16 = vrot.slane %v2076_v60, 4 }
 0x167   : > { %v6763_v11 = vpop.f32.mrf.mxu0  ;;  %v6877_v21 = vadd.f32 %v6876_v54, %v6875_v5  ;;  %v2084_v25 = vrot.slane %v2082_v14, 5  ;;  %v2374_v56 = vsel %vm7912_vm4, %v5922_v58, %v2373_v19  ;;  %v2375_v42 = vrot.slane %v2373_v19, 4 }
 0x168   : > { %v3575_v7 = vadd.f32 %v8955_v47, %v6762_v44  ;;  %v6878_v59 = vpop.f32.mrf.mxu1  ;;  %v2070_v31 = vrot.slane %v2069_v37, 4  ;;  %v2079_v34 = vor.u32 %v2078_v16, %v2074_v52  ;;  %2460 = vst [vmem:[#allocation2 + $0x338] sm:$0xf] %v2374_v56  ;;  %v2096_v60 = vshll.u32 %v8965_v6, 16  ;;  %v7681_v16 = vld [vmem:[#allocation2 + $0x214] ss:$36 sps:$4 sm:$0xff]  }
 0x169   : > { %v6764_v2 = vpop.f32.mrf.mxu0  ;;  %5443 = vmatmul.mubr.bf16.gmra.mxu1 %v7675_v0  ;;  %v2377_v44 = vsel %vm7912_vm4, %v2375_v42, %v2376_v35  ;;  %v2089_v37 = vrot.slane %v2087_v10, 4  ;;  %v2100_v42 = vshrl.u32 %v8965_v6, 16 }
 0x16a   : > { %v9116_v22 = vadd.f32 %v6874_v3, %v3575_v7  ;;  %v6765_v15 = vadd.f32 %v6764_v2, %v6763_v11  ;;  %v6879_v30 = vpop.f32.mrf.mxu1  ;;  %5450 = vmatprep.mubr.bf16.mxu1 %v7683_v48  ;;  %v2075_v20 = vsel %vm7930_vm5, %v2070_v31, %v2074_v52  ;;  %v2090_v3 = vshll.u32 %v8962_v46, 16  ;;  %2461 = vst [vmem:[#allocation2 + $0x35c] sm:$0xf] %v2377_v44  ;;  %v7678_v7 = vld [vmem:[#allocation2 + $0x20c] ss:$36 sps:$4 sm:$0xff]  }
 0x16b   : > { %v6766_v5 = vpop.f32.mrf.mxu0  ;;  %5282 = vmatmul.mubr.bf16.gmra.mxu0 %v7672_v50  ;;  %v6880_v11 = vadd.f32 %v6879_v30, %v6878_v59  ;;  %v2080_v54 = vrot.slane %v2079_v34, 4  ;;  %2236 = vst [vmem:[#allocation2 + $0x334] sm:$0xf] %v2075_v20  ;;  %v5869_v50 = vld [vmem:[%s7896_s6 + $0xb0] sm:$0x1]  ;;  %v2098_v2 = vrot.slane %v2096_v60, 5 }
 0x16c   : > { %v3578_v0 = vadd.f32 %v8955_v47, %v6765_v15  ;;  %5289 = vmatprep.mubr.bf16.mxu0 %v7680_v36  ;;  %v6881_v14 = vpop.f32.mrf.mxu1  ;;  %v2092_v58 = vrot.slane %v2090_v3, 5  ;;  %v7689_v36 = vld [vmem:[#allocation2 + $0x260] ss:$36 sps:$4 sm:$0xff]   ;;  %v2106_v15 = vshll.u32 %v5869_v50, 16  ;;  %v5923_v34 = vrot.slane %v8962_v46, 9 }
 0x16d   : > { %v6767_v48 = vpop.f32.mrf.mxu0  ;;  %v2085_v35 = vsel %vm7930_vm5, %v2080_v54, %v2084_v25  ;;  %v2380_v30 = vrot.slane %v8965_v6, 5  ;;  %v2383_v20 = vrot.slane %v5869_v50, 5  ;;  %v2102_v3 = vrot.slane %v2100_v42, 4 }
 0x16e   : > { %v9127_v52 = vadd.f32 %v6877_v21, %v3578_v0  ;;  %v6768_v19 = vadd.f32 %v6767_v48, %v6766_v5  ;;  %v6882_v59 = vpop.f32.mrf.mxu1  ;;  %2237 = vst [vmem:[#allocation2 + $0x358] sm:$0xf] %v2085_v35  ;;  %v2093_v56 = vor.u32 %v2092_v58, %v2089_v37  ;;  %v7686_v5 = vld [vmem:[#allocation2 + $0x258] ss:$36 sps:$4 sm:$0xff]   ;;  %v2108_v60 = vrot.slane %v2106_v15, 5 }
 0x16f   : > { %v6769_v31 = vpop.f32.mrf.mxu0  ;;  %v6883_v10 = vadd.f32 %v6882_v59, %v6881_v14  ;;  %v2111_v0 = vshrl.u32 %v8978_v17, 16  ;;  %v2381_v46 = vsel %vm7912_vm4, %v5923_v34, %v2380_v30  ;;  %v2382_v58 = vrot.slane %v2380_v30, 4  ;;  %v9141_v14 = vld [vmem:[%s7896_s6 + $0xbc] sm:$0x1] }
 0x170   : > { %v3583_v21 = vadd.f32 %v8955_v47, %v6768_v19  ;;  %v2094_v44 = vrot.slane %v2093_v56, 4  ;;  %v2103_v50 = vor.u32 %v2102_v3, %v2098_v2  ;;  %2462 = vst [vmem:[#allocation2 + $0x380] sm:$0xf] %v2381_v46  ;;  %v2120_v56 = vshll.u32 %v8981_v27, 16 }
 0x171   : > { %v6770_v25 = vpop.f32.mrf.mxu0  ;;  %v6884_v48 = vpop.f32.mrf.mxu1  ;;  %5451 = vmatmul.mubr.bf16.gmra.mxu1 %v7681_v16  ;;  %v2113_v35 = vrot.slane %v2111_v0, 4  ;;  %v2384_v59 = vsel %vm7912_vm4, %v2382_v58, %v2383_v20  ;;  %v2130_v34 = vshll.u32 %v9141_v14, 16  ;;  %v7684_v0 = vld [vmem:[#allocation2 + $0x254] ss:$36 sps:$4 sm:$0xff]   ;;  %v7695_v20 = vld [vmem:[#allocation2 + $0x2a8] ss:$36 sps:$4 sm:$0xff]  }
 0x172   : > { %v9136_v54 = vadd.f32 %v6880_v11, %v3583_v21  ;;  %v6771_v37 = vadd.f32 %v6770_v25, %v6769_v31  ;;  %5458 = vmatprep.mubr.bf16.mxu1 %v7689_v36  ;;  %v2099_v6 = vsel %vm7930_vm5, %v2094_v44, %v2098_v2  ;;  %v2114_v11 = vshll.u32 %v8978_v17, 16  ;;  %2463 = vst [vmem:[#allocation2 + $0x3a4] sm:$0xf] %v2384_v59 }
 0x173   : > { %v6772_v19 = vpop.f32.mrf.mxu0  ;;  %5290 = vmatmul.mubr.bf16.gmra.mxu0 %v7678_v7  ;;  %v6885_v16 = vpop.f32.mrf.mxu1  ;;  %2238 = vst [vmem:[#allocation2 + $0x37c] sm:$0xf] %v2099_v6  ;;  %v2124_v7 = vshrl.u32 %v8981_v27, 16  ;;  %v2104_v15 = vrot.slane %v2103_v50, 4  ;;  %v2122_v44 = vrot.slane %v2120_v56, 5 }
 0x174   : > { %v3586_v31 = vadd.f32 %v8955_v47, %v6771_v37  ;;  %5297 = vmatprep.mubr.bf16.mxu0 %v7686_v5  ;;  %v6886_v42 = vadd.f32 %v6885_v16, %v6884_v48  ;;  %v2116_v2 = vrot.slane %v2114_v11, 5  ;;  %v7687_v5 = vld [vmem:[#allocation2 + $0x25c] ss:$36 sps:$4 sm:$0xff]   ;;  %v2132_v48 = vrot.slane %v2130_v34, 5 }
 0x175   : > { %v6773_v36 = vpop.f32.mrf.mxu0  ;;  %v6887_v25 = vpop.f32.mrf.mxu1  ;;  %v2109_v37 = vsel %vm7930_vm5, %v2104_v15, %v2108_v60  ;;  %v2126_v58 = vrot.slane %v2124_v7, 4  ;;  %v7692_v11 = vld [vmem:[#allocation2 + $0x2a0] ss:$36 sps:$4 sm:$0xff]   ;;  %v2135_v60 = vshrl.u32 %v8989_v51, 16 }
 0x176   : > { %v9152_v21 = vadd.f32 %v6883_v10, %v3586_v31  ;;  %v6774_v30 = vadd.f32 %v6773_v36, %v6772_v19  ;;  %v2117_v46 = vor.u32 %v2116_v2, %v2113_v35  ;;  %2239 = vst [vmem:[#allocation2 + $0x3a0] sm:$0xf] %v2109_v37  ;;  %v5924_v10 = vrot.slane %v8978_v17, 9  ;;  %v9166_v17 = vld [vmem:[%s7896_s6 + $0xc8] sm:$0x1] }
 0x177   : > { %v6775_v3 = vpop.f32.mrf.mxu0  ;;  %v6888_v50 = vpop.f32.mrf.mxu1  ;;  %v2387_v19 = vrot.slane %v8981_v27, 5  ;;  %v2390_v31 = vrot.slane %v9141_v14, 5  ;;  %v2127_v36 = vor.u32 %v2126_v58, %v2122_v44 }
 0x178   : > { %v3591_v6 = vadd.f32 %v8955_v47, %v6774_v30  ;;  %v6889_v59 = vadd.f32 %v6888_v50, %v6887_v25  ;;  %v2118_v56 = vrot.slane %v2117_v46, 4  ;;  %v2137_v25 = vrot.slane %v2135_v60, 4  ;;  %v7701_v60 = vld [vmem:[#allocation2 + $0x2f0] ss:$36 sps:$4 sm:$0xff]  }
 0x179   : > { %v6776_v16 = vpop.f32.mrf.mxu0  ;;  %v7018_v15 = vpop.f32.mrf.mxu1  ;;  %5459 = vmatmul.mubr.bf16.gmra.mxu1 %v7687_v5  ;;  %v2388_v2 = vsel %vm7912_vm4, %v5924_v10, %v2387_v19  ;;  %v2389_v34 = vrot.slane %v2387_v19, 4  ;;  %v2128_v30 = vrot.slane %v2127_v36, 4  ;;  %v2144_v46 = vshll.u32 %v8993_v55, 16  ;;  %v7693_v10 = vld [vmem:[#allocation2 + $0x2a4] ss:$36 sps:$4 sm:$0xff]  }
 0x17a   : > { %v9161_v35 = vadd.f32 %v6886_v42, %v3591_v6  ;;  %v6777_v7 = vadd.f32 %v6776_v16, %v6775_v3  ;;  %5466 = vmatprep.mubr.bf16.mxu1 %v7695_v20  ;;  %v2123_v14 = vsel %vm7930_vm5, %v2118_v56, %v2122_v44  ;;  %2464 = vst [vmem:[#allocation2 + $0x3c8] sm:$0xf] %v2388_v2  ;;  %v2138_v42 = vshll.u32 %v8989_v51, 16  ;;  %v7690_v36 = vld [vmem:[#allocation2 + $0x29c] ss:$36 sps:$4 sm:$0xff]  }
 0x17b   : > { %v6906_v27 = vpop.f32.mrf.mxu0  ;;  %5298 = vmatmul.mubr.bf16.gmra.mxu0 %v7684_v0  ;;  %v7019_v5 = vpop.f32.mrf.mxu1  ;;  %2240 = vst [vmem:[#allocation2 + $0x3c4] sm:$0xf] %v2123_v14  ;;  %v2391_v37 = vsel %vm7912_vm4, %v2389_v34, %v2390_v31  ;;  %v2148_v0 = vshrl.u32 %v8993_v55, 16  ;;  %v2133_v44 = vsel %vm7930_vm5, %v2128_v30, %v2132_v48  ;;  %v2146_v19 = vrot.slane %v2144_v46, 5  ;;  %v7698_v2 = vld [vmem:[#allocation2 + $0x2e8] ss:$36 sps:$4 sm:$0xff]  }
 0x17c   : > { %v3594_v3 = vadd.f32 %v8955_v47, %v6777_v7  ;;  %5305 = vmatprep.mubr.bf16.mxu0 %v7692_v11  ;;  %v9176_v58 = vadd.f32 %v7019_v5, %v7018_v15  ;;  %2465 = vst [vmem:[#allocation2 + $0x3ec] sm:$0xf] %v2391_v37  ;;  %v2140_v6 = vrot.slane %v2138_v42, 5  ;;  %v2154_v47 = vshll.u32 %v9166_v17, 16  ;;  %2241 = vst [vmem:[#allocation2 + $0x3e8] sm:$0xf] %v2133_v44 }
 0x17d   : > { %v6907_v20 = vpop.f32.mrf.mxu0  ;;  %v7021_v11 = vpop.f32.mrf.mxu1  ;;  %v2150_v31 = vrot.slane %v2148_v0, 4  ;;  %v5925_v14 = vrot.slane %v8989_v51, 9  ;;  %v2397_v5 = vrot.slane %v9166_v17, 5 }
 0x17e   : > { %v9181_v50 = vadd.f32 %v6889_v59, %v3594_v3  ;;  %v6908_v16 = vadd.f32 %v6907_v20, %v6906_v27  ;;  %v2141_v7 = vor.u32 %v2140_v6, %v2137_v25  ;;  %v2156_v34 = vrot.slane %v2154_v47, 5 }
 0x17f   : > { %v6909_v56 = vpop.f32.mrf.mxu0  ;;  %v7022_v15 = vpop.f32.mrf.mxu1  ;;  %v2151_v48 = vor.u32 %v2150_v31, %v2146_v19  ;;  %v2394_v59 = vrot.slane %v8993_v55, 5  ;;  %v2159_v27 = vshrl.u32 %v9033_v4, 16  ;;  %v2162_v6 = vshll.u32 %v9033_v4, 16  ;;  %v5878_v31 = vld [vmem:[%s7896_s6 + $0xd4] sm:$0x1] }
 0x180   : > { %v9185_v42 = vadd.f32 %v7022_v15, %v7021_v11  ;;  %v2142_v3 = vrot.slane %v2141_v7, 4  ;;  %v3793_v55 = vadd.f32 %v6908_v16, %v8683_v38  ;;  %v2168_v16 = vshll.u32 %v9036_v23, 16  ;;  %v7699_v7 = vld [vmem:[#allocation2 + $0x2ec] ss:$36 sps:$4 sm:$0xff]  }
 0x181   : > { %v6910_v30 = vpop.f32.mrf.mxu0  ;;  %v7024_v46 = vpop.f32.mrf.mxu1  ;;  %5467 = vmatmul.mubr.bf16.gmra.mxu1 %v7693_v10  ;;  %v2152_v25 = vrot.slane %v2151_v48, 4  ;;  %v2395_v0 = vsel %vm7912_vm4, %v5925_v14, %v2394_v59  ;;  %v2396_v51 = vrot.slane %v2394_v59, 4  ;;  %v2161_v44 = vrot.slane %v2159_v27, 4  ;;  %v7707_v14 = vld [vmem:[#allocation2 + $0x338] ss:$36 sps:$4 sm:$0xff]  }
 0x182   : > { %v6911_v37 = vadd.f32 %v6910_v30, %v6909_v56  ;;  %5474 = vmatprep.mubr.bf16.mxu1 %v7701_v60  ;;  %v2147_v17 = vsel %vm7930_vm5, %v2142_v3, %v2146_v19  ;;  %2466 = vst [vmem:[#allocation2 + $0x410] sm:$0xf] %v2395_v0  ;;  %v2164_v56 = vrot.slane %v2162_v6, 5  ;;  %v2170_v15 = vrot.slane %v2168_v16, 5 }
 0x183   : > { %v6912_v20 = vpop.f32.mrf.mxu0  ;;  %5306 = vmatmul.mubr.bf16.gmra.mxu0 %v7690_v36  ;;  %v7025_v11 = vpop.f32.mrf.mxu1  ;;  %v2157_v10 = vsel %vm7930_vm5, %v2152_v25, %v2156_v34  ;;  %2242 = vst [vmem:[#allocation2 + $0x40c] sm:$0xf] %v2147_v17  ;;  %v2398_v38 = vsel %vm7912_vm4, %v2396_v51, %v2397_v5  ;;  %v7696_v34 = vld [vmem:[#allocation2 + $0x2e4] ss:$36 sps:$4 sm:$0xff]   ;;  %v2178_v30 = vshll.u32 %v5878_v31, 16  ;;  %v5926_v3 = vrot.slane %v9033_v4, 9 }
 0x184   : > { %v3796_v47 = vadd.f32 %v6911_v37, %v8699_v45  ;;  %5313 = vmatprep.mubr.bf16.mxu0 %v7698_v2  ;;  %v9208_v45 = vadd.f32 %v7025_v11, %v7024_v46  ;;  %2243 = vst [vmem:[#allocation2 + $0x430] sm:$0xf] %v2157_v10  ;;  %2467 = vst [vmem:[#allocation2 + $0x434] sm:$0xf] %v2398_v38  ;;  %v2172_v2 = vshrl.u32 %v9036_v23, 16  ;;  %v2401_v25 = vrot.slane %v9036_v23, 5 }
 0x185   : > { %v6913_v19 = vpop.f32.mrf.mxu0  ;;  %v7027_v60 = vpop.f32.mrf.mxu1  ;;  %v2165_v59 = vor.u32 %v2164_v56, %v2161_v44  ;;  %v7704_v37 = vld [vmem:[#allocation2 + $0x330] ss:$36 sps:$4 sm:$0xff]   ;;  %v2404_v0 = vrot.slane %v5878_v31, 5  ;;  %v2180_v6 = vrot.slane %v2178_v30, 5  ;;  %v7710_v30 = vld [vmem:[#allocation2 + $0x378] ss:$36 sps:$4 sm:$0xff]  }
 0x186   : > { %v6478_v36 = vpack.c.bf16 %v3796_v47, %v3793_v55  ;;  %v6914_v5 = vadd.f32 %v6913_v19, %v6912_v20  ;;  %v2174_v46 = vrot.slane %v2172_v2, 4  ;;  %v2402_v4 = vsel %vm7912_vm4, %v5926_v3, %v2401_v25 }
 0x187   : > { %v6915_v48 = vpop.f32.mrf.mxu0  ;;  %v7028_v27 = vpop.f32.mrf.mxu1  ;;  %v2166_v17 = vrot.slane %v2165_v59, 4  ;;  %v2403_v10 = vrot.slane %v2401_v25, 4  ;;  %2468 = vst [vmem:[#allocation2 + $0x458] sm:$0xf] %v2402_v4  ;;  %v7719_v4 = vld [vmem:[#allocation2 + $0x3c8] ss:$36 sps:$4 sm:$0xff]  }
 0x188   : > { %6479 = vst [vmem:[%s9206_s17] sm:$0xff] %v6478_v36   ;;  %v9214_v55 = vadd.f32 %v7028_v27, %v7027_v60  ;;  %v2175_v44 = vor.u32 %v2174_v46, %v2170_v15  ;;  %v3801_v38 = vadd.f32 %v6914_v5, %v8721_v40 }
 0x189   : > { %v6916_v51 = vpop.f32.mrf.mxu0  ;;  %v7030_v11 = vpop.f32.mrf.mxu1  ;;  %5475 = vmatmul.mubr.bf16.gmra.mxu1 %v7699_v7  ;;  %v2171_v23 = vsel %vm7930_vm5, %v2166_v17, %v2170_v15  ;;  %v2405_v56 = vsel %vm7912_vm4, %v2403_v10, %v2404_v0  ;;  %v7705_v15 = vld [vmem:[#allocation2 + $0x334] ss:$36 sps:$4 sm:$0xff]  }
 0x18a   : > { %v6917_v47 = vadd.f32 %v6916_v51, %v6915_v48  ;;  %5482 = vmatprep.mubr.bf16.mxu1 %v7707_v14  ;;  %v2176_v19 = vrot.slane %v2175_v44, 4  ;;  %2244 = vst [vmem:[#allocation2 + $0x454] sm:$0xf] %v2171_v23  ;;  %2469 = vst [vmem:[#allocation2 + $0x47c] sm:$0xf] %v2405_v56 }
 0x18b   : > { %v6918_v20 = vpop.f32.mrf.mxu0  ;;  %5314 = vmatmul.mubr.bf16.gmra.mxu0 %v7696_v34  ;;  %v7031_v16 = vpop.f32.mrf.mxu1  ;;  %v7713_v34 = vld [vmem:[#allocation2 + $0x380] ss:$36 sps:$4 sm:$0xff]   ;;  %v7708_v44 = vld [vmem:[#allocation2 + $0x374] ss:$36 sps:$4 sm:$0xff]  }
 0x18c   : > { %v3804_v31 = vadd.f32 %v6917_v47, %v8744_v43  ;;  %5321 = vmatprep.mubr.bf16.mxu0 %v7704_v37  ;;  %v9224_v60 = vadd.f32 %v7031_v16, %v7030_v11  ;;  %v2181_v40 = vsel %vm7930_vm5, %v2176_v19, %v2180_v6  ;;  %v7702_v43 = vld [vmem:[#allocation2 + $0x32c] ss:$36 sps:$4 sm:$0xff]   ;;  %v7711_v47 = vld [vmem:[#allocation2 + $0x37c] ss:$36 sps:$4 sm:$0xff]  }
 0x18d   : > { %v6919_v36 = vpop.f32.mrf.mxu0  ;;  %v7033_v2 = vpop.f32.mrf.mxu1  ;;  %2245 = vst [vmem:[#allocation2 + $0x478] sm:$0xf] %v2181_v40  ;;  %v7716_v23 = vld [vmem:[#allocation2 + $0x3c0] ss:$36 sps:$4 sm:$0xff]  }
 0x18e   : > { %v6483_v7 = vpack.c.bf16 %v3804_v31, %v3801_v38  ;;  %v6920_v14 = vadd.f32 %v6919_v36, %v6918_v20 }
 0x18f   : > { %v6921_v48 = vpop.f32.mrf.mxu0  ;;  %v7034_v59 = vpop.f32.mrf.mxu1 }
 0x190   : > { %6635 = vst [vmem:[%s9206_s17 + $0x8] sm:$0xff] %v6483_v7   ;;  %v9229_v3 = vadd.f32 %v7034_v59, %v7033_v2  ;;  %v3809_v57 = vadd.f32 %v6920_v14, %v8750_v18  ;;  %v7725_v14 = vld [vmem:[#allocation2 + $0x410] ss:$36 sps:$4 sm:$0xff]  }
 0x191   : > { %v6922_v41 = vpop.f32.mrf.mxu0  ;;  %v7036_v27 = vpop.f32.mrf.mxu1  ;;  %5483 = vmatmul.mubr.bf16.gmra.mxu1 %v7705_v15 }
 0x192   : > { %v6923_v5 = vadd.f32 %v6922_v41, %v6921_v48  ;;  %5490 = vmatprep.mubr.bf16.mxu1 %v7713_v34  ;;  %v7717_v48 = vld [vmem:[#allocation2 + $0x3c4] ss:$36 sps:$4 sm:$0xff]   ;;  %v7714_v34 = vld [vmem:[#allocation2 + $0x3bc] ss:$36 sps:$4 sm:$0xff]  }
 0x193   : > { %v6924_v37 = vpop.f32.mrf.mxu0  ;;  %5322 = vmatmul.mubr.bf16.gmra.mxu0 %v7702_v43  ;;  %v7037_v25 = vpop.f32.mrf.mxu1  ;;  %v7722_v41 = vld [vmem:[#allocation2 + $0x408] ss:$36 sps:$4 sm:$0xff]  }
 0x194   : > { %v3812_v46 = vadd.f32 %v6923_v5, %v8768_v61  ;;  %5329 = vmatprep.mubr.bf16.mxu0 %v7710_v30  ;;  %v9233_v51 = vadd.f32 %v7037_v25, %v7036_v27 }
 0x195   : > { %v6925_v0 = vpop.f32.mrf.mxu0  ;;  %v7039_v6 = vpop.f32.mrf.mxu1 }
 0x196   : > { %v6488_v17 = vpack.c.bf16 %v3812_v46, %v3809_v57  ;;  %v6926_v10 = vadd.f32 %v6925_v0, %v6924_v37 }
 0x197   : > { %v6927_v11 = vpop.f32.mrf.mxu0  ;;  %v7040_v20 = vpop.f32.mrf.mxu1 }
 0x198   : > { %6636 = vst [vmem:[%s9206_s17 + $0x10] sm:$0xff] %v6488_v17   ;;  %v9236_v31 = vadd.f32 %v7040_v20, %v7039_v6  ;;  %v3817_v19 = vadd.f32 %v6926_v10, %v8790_v26  ;;  %v7731_v10 = vld [vmem:[#allocation2 + $0x458] ss:$36 sps:$4 sm:$0xff]  }
 0x199   : > { %v6928_v38 = vpop.f32.mrf.mxu0  ;;  %v7042_v61 = vpop.f32.mrf.mxu1  ;;  %5491 = vmatmul.mubr.bf16.gmra.mxu1 %v7711_v47 }
 0x19a   : > { %v6929_v18 = vadd.f32 %v6928_v38, %v6927_v11  ;;  %5498 = vmatprep.mubr.bf16.mxu1 %v7719_v4  ;;  %v7723_v11 = vld [vmem:[#allocation2 + $0x40c] ss:$36 sps:$4 sm:$0xff]   ;;  %v7720_v4 = vld [vmem:[#allocation2 + $0x404] ss:$36 sps:$4 sm:$0xff]  }
 0x19b   : > { %v6930_v16 = vpop.f32.mrf.mxu0  ;;  %5330 = vmatmul.mubr.bf16.gmra.mxu0 %v7708_v44  ;;  %v7043_v36 = vpop.f32.mrf.mxu1  ;;  %v7728_v38 = vld [vmem:[#allocation2 + $0x450] ss:$36 sps:$4 sm:$0xff]  }
 0x19c   : > { %v3820_v56 = vadd.f32 %v6929_v18, %v8819_v33  ;;  %5337 = vmatprep.mubr.bf16.mxu0 %v7716_v23  ;;  %v9240_v2 = vadd.f32 %v7043_v36, %v7042_v61 }
 0x19d   : > { %v6931_v7 = vpop.f32.mrf.mxu0  ;;  %v7045_v40 = vpop.f32.mrf.mxu1 }
 0x19e   : > { %v6493_v15 = vpack.c.bf16 %v3820_v56, %v3817_v19  ;;  %v6932_v59 = vadd.f32 %v6931_v7, %v6930_v16 }
 0x19f   : > { %v6933_v43 = vpop.f32.mrf.mxu0  ;;  %v7046_v30 = vpop.f32.mrf.mxu1 }
 0x1a0   : > { %6637 = vst [vmem:[%s9206_s17 + $0x18] sm:$0xff] %v6493_v15   ;;  %v9243_v27 = vadd.f32 %v7046_v30, %v7045_v40  ;;  %v3825_v57 = vadd.f32 %v6932_v59, %v8828_v62 }
 0x1a1   : > { %v6934_v5 = vpop.f32.mrf.mxu0  ;;  %v7048_v33 = vpop.f32.mrf.mxu1  ;;  %5499 = vmatmul.mubr.bf16.gmra.mxu1 %v7717_v48 }
 0x1a2   : > { %v6935_v26 = vadd.f32 %v6934_v5, %v6933_v43  ;;  %5506 = vmatprep.mubr.bf16.mxu1 %v7725_v14  ;;  %v7729_v43 = vld [vmem:[#allocation2 + $0x454] ss:$36 sps:$4 sm:$0xff]   ;;  %v7726_v14 = vld [vmem:[#allocation2 + $0x44c] ss:$36 sps:$4 sm:$0xff]  }
 0x1a3   : > { %v6936_v37 = vpop.f32.mrf.mxu0  ;;  %5338 = vmatmul.mubr.bf16.gmra.mxu0 %v7714_v34  ;;  %v7049_v25 = vpop.f32.mrf.mxu1 }
 0x1a4   : > { %v3828_v46 = vadd.f32 %v6935_v26, %v8844_v1  ;;  %5345 = vmatprep.mubr.bf16.mxu0 %v7722_v41  ;;  %v9247_v17 = vadd.f32 %v7049_v25, %v7048_v33 }
 0x1a5   : > { %v6937_v0 = vpop.f32.mrf.mxu0  ;;  %v7051_v47 = vpop.f32.mrf.mxu1 }
 0x1a6   : > { %v6498_v6 = vpack.c.bf16 %v3828_v46, %v3825_v57  ;;  %v6938_v20 = vadd.f32 %v6937_v0, %v6936_v37 }
 0x1a7   : > { %v6939_v44 = vpop.f32.mrf.mxu0  ;;  %v7052_v23 = vpop.f32.mrf.mxu1 }
 0x1a8   : > { %6638 = vst [vmem:[%s9206_s17 + $0x20] sm:$0xff] %v6498_v6   ;;  %v9250_v61 = vadd.f32 %v7052_v23, %v7051_v47  ;;  %v3833_v19 = vadd.f32 %v6938_v20, %v8860_v9 }
 0x1a9   : > { %v6940_v18 = vpop.f32.mrf.mxu0  ;;  %v7054_v1 = vpop.f32.mrf.mxu1  ;;  %5507 = vmatmul.mubr.bf16.gmra.mxu1 %v7723_v11 }
 0x1aa   : > { %v6941_v62 = vadd.f32 %v6940_v18, %v6939_v44  ;;  %5514 = vmatprep.mubr.bf16.mxu1 %v7731_v10 }
 0x1ab   : > { %v6942_v16 = vpop.f32.mrf.mxu0  ;;  %5346 = vmatmul.mubr.bf16.gmra.mxu0 %v7720_v4  ;;  %v7055_v36 = vpop.f32.mrf.mxu1 }
 0x1ac   : > { %v3836_v56 = vadd.f32 %v6941_v62, %v8894_v49  ;;  %5353 = vmatprep.mubr.bf16.mxu0 %v7728_v38  ;;  %v9254_v15 = vadd.f32 %v7055_v36, %v7054_v1 }
 0x1ad   : > { %v6943_v7 = vpop.f32.mrf.mxu0  ;;  %v7057_v48 = vpop.f32.mrf.mxu1 }
 0x1ae   : > { %v6503_v40 = vpack.c.bf16 %v3836_v56, %v3833_v19  ;;  %v6944_v59 = vadd.f32 %v6943_v7, %v6942_v16 }
 0x1af   : > { %v6945_v34 = vpop.f32.mrf.mxu0  ;;  %v7058_v30 = vpop.f32.mrf.mxu1 }
 0x1b0   : > { %6639 = vst [vmem:[%s9206_s17 + $0x28] sm:$0xff] %v6503_v40   ;;  %v9257_v5 = vadd.f32 %v7058_v30, %v7057_v48  ;;  %v3841_v33 = vadd.f32 %v6944_v59, %v8910_v13 }
 0x1b1   : > { %v6946_v41 = vpop.f32.mrf.mxu0  ;;  %v7060_v26 = vpop.f32.mrf.mxu1  ;;  %5515 = vmatmul.mubr.bf16.gmra.mxu1 %v7729_v43 }
 0x1b2   : > { %v6947_v9 = vadd.f32 %v6946_v41, %v6945_v34 }
 0x1b3   : > { %v6948_v49 = vpop.f32.mrf.mxu0  ;;  %5354 = vmatmul.mubr.bf16.gmra.mxu0 %v7726_v14  ;;  %v7061_v57 = vpop.f32.mrf.mxu1 }
 0x1b4   : > { %v3844_v37 = vadd.f32 %v6947_v9, %v8925_v24  ;;  %v9261_v25 = vadd.f32 %v7061_v57, %v7060_v26 }
 0x1b5   : > { %v6949_v46 = vpop.f32.mrf.mxu0  ;;  %v7063_v6 = vpop.f32.mrf.mxu1 }
 0x1b6   : > { %v6508_v0 = vpack.c.bf16 %v3844_v37, %v3841_v33  ;;  %v6950_v11 = vadd.f32 %v6949_v46, %v6948_v49 }
 0x1b7   : > { %v6951_v47 = vpop.f32.mrf.mxu0  ;;  %v7064_v44 = vpop.f32.mrf.mxu1 }
 0x1b8   : > { %6640 = vst [vmem:[%s9206_s17 + $0x30] sm:$0xff] %v6508_v0   ;;  %v9264_v10 = vadd.f32 %v7064_v44, %v7063_v6  ;;  %v3849_v13 = vadd.f32 %v6950_v11, %v8936_v63 }
 0x1b9   : > { %v6952_v4 = vpop.f32.mrf.mxu0  ;;  %v7066_v23 = vpop.f32.mrf.mxu1 }
 0x1ba   : > { %v6953_v20 = vadd.f32 %v6952_v4, %v6951_v47  ;;  %v9433_v4 = vld [vmem:[#allocation5_spill] sm:$0xff] }
 0x1bb   : > { %v6954_v38 = vpop.f32.mrf.mxu0  ;;  %v7067_v18 = vpop.f32.mrf.mxu1 }
 0x1bc   : > { %v3852_v24 = vadd.f32 %v6953_v20, %v8972_v53  ;;  %v9268_v1 = vadd.f32 %v7067_v18, %v7066_v23  ;;  %v9431_v53 = vld [vmem:[#allocation3_spill] sm:$0xff] }
 0x1bd   : > { %v6955_v62 = vpop.f32.mrf.mxu0  ;;  %v7069_v19 = vpop.f32.mrf.mxu1 }
 0x1be   : > { %v6513_v16 = vpack.c.bf16 %v3852_v24, %v3849_v13  ;;  %v6956_v36 = vadd.f32 %v6955_v62, %v6954_v38 }
 0x1bf   : > { %v6957_v56 = vpop.f32.mrf.mxu0  ;;  %v7070_v7 = vpop.f32.mrf.mxu1 }
 0x1c0   : > { %6641 = vst [vmem:[%s9206_s17 + $0x38] sm:$0xff] %v6513_v16   ;;  %v9271_v48 = vadd.f32 %v7070_v7, %v7069_v19  ;;  %v3857_v63 = vadd.f32 %v6956_v36, %v8996_v12  ;;  %v9432_v12 = vld [vmem:[#allocation4_spill] sm:$0xff] }
 0x1c1   : > { %v6958_v40 = vpop.f32.mrf.mxu0  ;;  %v7072_v34 = vpop.f32.mrf.mxu1 }
 0x1c2   : > { %v6959_v43 = vadd.f32 %v6958_v40, %v6957_v56 }
 0x1c3   : > { %v6960_v14 = vpop.f32.mrf.mxu0  ;;  %v7073_v30 = vpop.f32.mrf.mxu1 }
 0x1c4   : > { %v3860_v59 = vadd.f32 %v6959_v43, %v9431_v53  ;;  %v9275_v9 = vadd.f32 %v7073_v30, %v7072_v34 }
 0x1c5   : > { %v6961_v41 = vpop.f32.mrf.mxu0  ;;  %v7075_v49 = vpop.f32.mrf.mxu1 }
 0x1c6   : > { %v6518_v26 = vpack.c.bf16 %v3860_v59, %v3857_v63  ;;  %v6962_v37 = vadd.f32 %v6961_v41, %v6960_v14  ;;  %v9434_v14 = vld [vmem:[#allocation6_spill] sm:$0xff] }
 0x1c7   : > { %v6963_v33 = vpop.f32.mrf.mxu0  ;;  %v7076_v57 = vpop.f32.mrf.mxu1 }
 0x1c8   : > { %6642 = vst [vmem:[%s9206_s17 + $0x40] sm:$0xff] %v6518_v26   ;;  %v9278_v0 = vadd.f32 %v7076_v57, %v7075_v49  ;;  %v3865_v44 = vadd.f32 %v6962_v37, %v9432_v12 }
 0x1c9   : > { %v6964_v46 = vpop.f32.mrf.mxu0  ;;  %v7078_v47 = vpop.f32.mrf.mxu1 }
 0x1ca   : > { %v6965_v6 = vadd.f32 %v6964_v46, %v6963_v33 }
 0x1cb   : > { %v6966_v11 = vpop.f32.mrf.mxu0  ;;  %v7079_v23 = vpop.f32.mrf.mxu1 }
 0x1cc   : > { %v3868_v20 = vadd.f32 %v6965_v6, %v9433_v4  ;;  %v9282_v13 = vadd.f32 %v7079_v23, %v7078_v47 }
 0x1cd   : > { %v6967_v38 = vpop.f32.mrf.mxu0  ;;  %v7081_v18 = vpop.f32.mrf.mxu1 }
 0x1ce   : > { %v6523_v24 = vpack.c.bf16 %v3868_v20, %v3865_v44  ;;  %v6968_v16 = vadd.f32 %v6967_v38, %v6966_v11 }
 0x1cf   : > { %v6969_v62 = vpop.f32.mrf.mxu0  ;;  %v7082_v19 = vpop.f32.mrf.mxu1 }
 0x1d0   : > { %6643 = vst [vmem:[%s9206_s17 + $0x48] sm:$0xff] %v6523_v24   ;;  %v9285_v36 = vadd.f32 %v7082_v19, %v7081_v18  ;;  %v3873_v34 = vadd.f32 %v6968_v16, %v9053_v32 }
 0x1d1   : > { %v6970_v56 = vpop.f32.mrf.mxu0  ;;  %v7084_v40 = vpop.f32.mrf.mxu1 }
 0x1d2   : > { %v6971_v7 = vadd.f32 %v6970_v56, %v6969_v62 }
 0x1d3   : > { %v6972_v43 = vpop.f32.mrf.mxu0  ;;  %v7085_v53 = vpop.f32.mrf.mxu1 }
 0x1d4   : > { %v3876_v63 = vadd.f32 %v6971_v7, %v9434_v14  ;;  %v9289_v30 = vadd.f32 %v7085_v53, %v7084_v40 }
 0x1d5   : > { %v6973_v59 = vpop.f32.mrf.mxu0  ;;  %v7087_v26 = vpop.f32.mrf.mxu1 }
 0x1d6   : > { %v6528_v41 = vpack.c.bf16 %v3876_v63, %v3873_v34  ;;  %v6974_v33 = vadd.f32 %v6973_v59, %v6972_v43 }
 0x1d7   : > { %v6975_v49 = vpop.f32.mrf.mxu0  ;;  %v7088_v37 = vpop.f32.mrf.mxu1 }
 0x1d8   : > { %6644 = vst [vmem:[%s9206_s17 + $0x50] sm:$0xff] %v6528_v41   ;;  %v9292_v46 = vadd.f32 %v7088_v37, %v7087_v26  ;;  %v3881_v32 = vadd.f32 %v6974_v33, %v9073_v29 }
 0x1d9   : > { %v6976_v57 = vpop.f32.mrf.mxu0  ;;  %v7090_v47 = vpop.f32.mrf.mxu1 }
 0x1da   : > { %v6977_v6 = vadd.f32 %v6976_v57, %v6975_v49 }
 0x1db   : > { %v6978_v11 = vpop.f32.mrf.mxu0  ;;  %v7091_v44 = vpop.f32.mrf.mxu1 }
 0x1dc   : > { %v3884_v12 = vadd.f32 %v6977_v6, %v9088_v39  ;;  %v9296_v20 = vadd.f32 %v7091_v44, %v7090_v47 }
 0x1dd   : > { %v6979_v4 = vpop.f32.mrf.mxu0  ;;  %v7093_v38 = vpop.f32.mrf.mxu1 }
 0x1de   : > { %v6533_v23 = vpack.c.bf16 %v3884_v12, %v3881_v32  ;;  %v6980_v18 = vadd.f32 %v6979_v4, %v6978_v11 }
 0x1df   : > { %v6981_v24 = vpop.f32.mrf.mxu0  ;;  %v7094_v62 = vpop.f32.mrf.mxu1 }
 0x1e0   : > { %6645 = vst [vmem:[%s9206_s17 + $0x58] sm:$0xff] %v6533_v23   ;;  %v9299_v19 = vadd.f32 %v7094_v62, %v7093_v38  ;;  %v3889_v29 = vadd.f32 %v6980_v18, %v9094_v28 }
 0x1e1   : > { %v6982_v16 = vpop.f32.mrf.mxu0  ;;  %v7096_v7 = vpop.f32.mrf.mxu1 }
 0x1e2   : > { %v6983_v56 = vadd.f32 %v6982_v16, %v6981_v24 }
 0x1e3   : > { %v6984_v40 = vpop.f32.mrf.mxu0  ;;  %v7097_v43 = vpop.f32.mrf.mxu1 }
 0x1e4   : > { %v3892_v39 = vadd.f32 %v6983_v56, %v9108_v8  ;;  %v9303_v14 = vadd.f32 %v7097_v43, %v7096_v7 }
 0x1e5   : > { %v6985_v34 = vpop.f32.mrf.mxu0  ;;  %v7099_v53 = vpop.f32.mrf.mxu1 }
 0x1e6   : > { %v6538_v63 = vpack.c.bf16 %v3892_v39, %v3889_v29  ;;  %v6986_v41 = vadd.f32 %v6985_v34, %v6984_v40 }
 0x1e7   : > { %v6987_v59 = vpop.f32.mrf.mxu0  ;;  %v7100_v26 = vpop.f32.mrf.mxu1 }
 0x1e8   : > { %6646 = vst [vmem:[%s9206_s17 + $0x60] sm:$0xff] %v6538_v63   ;;  %v9306_v33 = vadd.f32 %v7100_v26, %v7099_v53  ;;  %v3897_v28 = vadd.f32 %v6986_v41, %v9116_v22 }
 0x1e9   : > { %v6988_v49 = vpop.f32.mrf.mxu0  ;;  %v7102_v57 = vpop.f32.mrf.mxu1 }
 0x1ea   : > { %v6989_v37 = vadd.f32 %v6988_v49, %v6987_v59 }
 0x1eb   : > { %v6990_v6 = vpop.f32.mrf.mxu0  ;;  %v7103_v47 = vpop.f32.mrf.mxu1 }
 0x1ec   : > { %v3900_v8 = vadd.f32 %v6989_v37, %v9127_v52  ;;  %v9310_v32 = vadd.f32 %v7103_v47, %v7102_v57 }
 0x1ed   : > { %v6991_v11 = vpop.f32.mrf.mxu0  ;;  %v7105_v44 = vpop.f32.mrf.mxu1 }
 0x1ee   : > { %v6543_v12 = vpack.c.bf16 %v3900_v8, %v3897_v28  ;;  %v6992_v23 = vadd.f32 %v6991_v11, %v6990_v6 }
 0x1ef   : > { %v6993_v4 = vpop.f32.mrf.mxu0  ;;  %v7106_v38 = vpop.f32.mrf.mxu1 }
 0x1f0   : > { %6647 = vst [vmem:[%s9206_s17 + $0x68] sm:$0xff] %v6543_v12   ;;  %v9313_v18 = vadd.f32 %v7106_v38, %v7105_v44  ;;  %v3905_v22 = vadd.f32 %v6992_v23, %v9136_v54  ;;  %v9327_v12 = vld [vmem:[%s9421_s2] ss:$0 sm:$0xff] }
 0x1f1   : > { %v6994_v24 = vpop.f32.mrf.mxu0  ;;  %v7108_v16 = vpop.f32.mrf.mxu1  ;;  %v5075_v44 = vadd.f32 %v9327_v12, %v9176_v58 }
 0x1f2   : > { %v6995_v62 = vadd.f32 %v6994_v24, %v6993_v4 }
 0x1f3   : > { %v6996_v56 = vpop.f32.mrf.mxu0  ;;  %v7109_v7 = vpop.f32.mrf.mxu1 }
 0x1f4   : > { %v3908_v52 = vadd.f32 %v6995_v62, %v9152_v21  ;;  %v9317_v29 = vadd.f32 %v7109_v7, %v7108_v16 }
 0x1f5   : > { %v6997_v40 = vpop.f32.mrf.mxu0  ;;  %v7111_v43 = vpop.f32.mrf.mxu1 }
 0x1f6   : > { %v6548_v39 = vpack.c.bf16 %v3908_v52, %v3905_v22  ;;  %v6998_v63 = vadd.f32 %v6997_v40, %v6996_v56 }
 0x1f7   : > { %v6999_v34 = vpop.f32.mrf.mxu0  ;;  %v7112_v53 = vpop.f32.mrf.mxu1 }
 0x1f8   : > { %6648 = vst [vmem:[%s9206_s17 + $0x70] sm:$0xff] %v6548_v39   ;;  %v9320_v41 = vadd.f32 %v7112_v53, %v7111_v43  ;;  %v3913_v54 = vadd.f32 %v6998_v63, %v9161_v35  ;;  %v5078_v35 = vadd.f32 %v9327_v12, %v9185_v42  ;;  %v5083_v63 = vadd.f32 %v9327_v12, %v9208_v45 }
 0x1f9   : > { %v7000_v59 = vpop.f32.mrf.mxu0  ;;  %v7242_v49 = vpop.f32.mrf.mxu1 }
 0x1fa   : > { %v7001_v26 = vadd.f32 %v7000_v59, %v6999_v34 }
 0x1fb   : > { %v7130_v37 = vpop.f32.mrf.mxu0  ;;  %v7243_v57 = vpop.f32.mrf.mxu1 }
 0x1fc   : > { %v3916_v21 = vadd.f32 %v7001_v26, %v9181_v50  ;;  %v7244_v16 = vadd.f32 %v7243_v57, %v7242_v49  ;;  %v5086_v26 = vadd.f32 %v9327_v12, %v9214_v55 }
 0x1fd   : > { %v7131_v6 = vpop.f32.mrf.mxu0  ;;  %v7245_v47 = vpop.f32.mrf.mxu1 }
 0x1fe   : > { %v6553_v28 = vpack.c.bf16 %v3916_v21, %v3913_v54  ;;  %v7132_v8 = vadd.f32 %v7131_v6, %v7130_v37 }
 0x1ff   : > { %v7133_v11 = vpop.f32.mrf.mxu0  ;;  %v7246_v4 = vpop.f32.mrf.mxu1 }
 0x200   : > { %6649 = vst [vmem:[%s9206_s17 + $0x78] sm:$0xff] %v6553_v28   ;;  %v5236_v50 = vadd.f32 %v7132_v8, %v5075_v44  ;;  %v7247_v22 = vadd.f32 %v7246_v4, %v7245_v47 }
 0x201   : > { %v7134_v23 = vpop.f32.mrf.mxu0  ;;  %v7248_v24 = vpop.f32.mrf.mxu1 }
 0x202   : > { %v7135_v38 = vadd.f32 %v7134_v23, %v7133_v11  ;;  %v5397_v40 = vadd.f32 %v7244_v16, %v5236_v50 }
 0x203   : > { %v7136_v62 = vpop.f32.mrf.mxu0  ;;  %v7249_v52 = vpop.f32.mrf.mxu1 }
 0x204   : > { %v5239_v56 = vadd.f32 %v7135_v38, %v5078_v35  ;;  %v7250_v57 = vadd.f32 %v7249_v52, %v7248_v24  ;;  %v5091_v35 = vadd.f32 %v9327_v12, %v9224_v60 }
 0x205   : > { %v7137_v7 = vpop.f32.mrf.mxu0  ;;  %v7251_v58 = vpop.f32.mrf.mxu1 }
 0x206   : > { %v5400_v39 = vadd.f32 %v7247_v22, %v5239_v56  ;;  %v7138_v43 = vadd.f32 %v7137_v7, %v7136_v62  ;;  %v5094_v62 = vadd.f32 %v9327_v12, %v9229_v3 }
 0x207   : > { %v7139_v34 = vpop.f32.mrf.mxu0  ;;  %v7252_v42 = vpop.f32.mrf.mxu1 }
 0x208   : > { %v6558_v53 = vpack.c.bf16 %v5400_v39, %v5397_v40  ;;  %v5244_v49 = vadd.f32 %v7138_v43, %v5083_v63  ;;  %v7253_v28 = vadd.f32 %v7252_v42, %v7251_v58  ;;  %v5099_v42 = vadd.f32 %v9327_v12, %v9233_v51 }
 0x209   : > { %v7140_v59 = vpop.f32.mrf.mxu0  ;;  %v7254_v54 = vpop.f32.mrf.mxu1 }
 0x20a   : > { %6650 = vst [vmem:[%s9206_s17 + $0x80] sm:$0xff] %v6558_v53   ;;  %v7141_v37 = vadd.f32 %v7140_v59, %v7139_v34  ;;  %v5405_v11 = vadd.f32 %v7250_v57, %v5244_v49  ;;  %v5102_v49 = vadd.f32 %v9327_v12, %v9236_v31 }
 0x20b   : > { %v7142_v21 = vpop.f32.mrf.mxu0  ;;  %v7255_v8 = vpop.f32.mrf.mxu1 }
 0x20c   : > { %v5247_v6 = vadd.f32 %v7141_v37, %v5086_v26  ;;  %v7256_v52 = vadd.f32 %v7255_v8, %v7254_v54 }
 0x20d   : > { %v7143_v47 = vpop.f32.mrf.mxu0  ;;  %v7257_v4 = vpop.f32.mrf.mxu1 }
 0x20e   : > { %v5408_v44 = vadd.f32 %v7253_v28, %v5247_v6  ;;  %v7144_v45 = vadd.f32 %v7143_v47, %v7142_v21 }
 0x20f   : > { %v7145_v23 = vpop.f32.mrf.mxu0  ;;  %v7258_v50 = vpop.f32.mrf.mxu1 }
 0x210   : > { %v6563_v55 = vpack.c.bf16 %v5408_v44, %v5405_v11  ;;  %v5252_v24 = vadd.f32 %v7144_v45, %v5091_v35  ;;  %v7259_v40 = vadd.f32 %v7258_v50, %v7257_v4  ;;  %v5107_v35 = vadd.f32 %v9327_v12, %v9240_v2 }
 0x211   : > { %v7146_v38 = vpop.f32.mrf.mxu0  ;;  %v7260_v56 = vpop.f32.mrf.mxu1 }
 0x212   : > { %6651 = vst [vmem:[%s9206_s17 + $0x88] sm:$0xff] %v6563_v55   ;;  %v7147_v16 = vadd.f32 %v7146_v38, %v7145_v23  ;;  %v5413_v58 = vadd.f32 %v7256_v52, %v5252_v24  ;;  %v5110_v38 = vadd.f32 %v9327_v12, %v9243_v27 }
 0x213   : > { %v7148_v22 = vpop.f32.mrf.mxu0  ;;  %v7261_v39 = vpop.f32.mrf.mxu1 }
 0x214   : > { %v5255_v7 = vadd.f32 %v7147_v16, %v5094_v62  ;;  %v7262_v6 = vadd.f32 %v7261_v39, %v7260_v56 }
 0x215   : > { %v7149_v43 = vpop.f32.mrf.mxu0  ;;  %v7263_v63 = vpop.f32.mrf.mxu1 }
 0x216   : > { %v5416_v34 = vadd.f32 %v7259_v40, %v5255_v7  ;;  %v7150_v60 = vadd.f32 %v7149_v43, %v7148_v22 }
 0x217   : > { %v7151_v53 = vpop.f32.mrf.mxu0  ;;  %v7264_v59 = vpop.f32.mrf.mxu1 }
 0x218   : > { %v6568_v3 = vpack.c.bf16 %v5416_v34, %v5413_v58  ;;  %v5260_v37 = vadd.f32 %v7150_v60, %v5099_v42  ;;  %v7265_v8 = vadd.f32 %v7264_v59, %v7263_v63  ;;  %v5115_v63 = vadd.f32 %v9327_v12, %v9247_v17 }
 0x219   : > { %v7152_v26 = vpop.f32.mrf.mxu0  ;;  %v7266_v21 = vpop.f32.mrf.mxu1 }
 0x21a   : > { %6652 = vst [vmem:[%s9206_s17 + $0x90] sm:$0xff] %v6568_v3   ;;  %v7153_v54 = vadd.f32 %v7152_v26, %v7151_v53  ;;  %v5421_v44 = vadd.f32 %v7262_v6, %v5260_v37  ;;  %v5118_v3 = vadd.f32 %v9327_v12, %v9250_v61 }
 0x21b   : > { %v7154_v57 = vpop.f32.mrf.mxu0  ;;  %v7267_v47 = vpop.f32.mrf.mxu1 }
 0x21c   : > { %v5263_v28 = vadd.f32 %v7153_v54, %v5102_v49  ;;  %v7268_v22 = vadd.f32 %v7267_v47, %v7266_v21 }
 0x21d   : > { %v7155_v11 = vpop.f32.mrf.mxu0  ;;  %v7269_v4 = vpop.f32.mrf.mxu1 }
 0x21e   : > { %v5424_v45 = vadd.f32 %v7265_v8, %v5263_v28  ;;  %v7156_v51 = vadd.f32 %v7155_v11, %v7154_v57 }
 0x21f   : > { %v7157_v23 = vpop.f32.mrf.mxu0  ;;  %v7270_v55 = vpop.f32.mrf.mxu1 }
 0x220   : > { %v6573_v31 = vpack.c.bf16 %v5424_v45, %v5421_v44  ;;  %v5268_v62 = vadd.f32 %v7156_v51, %v5107_v35  ;;  %v7271_v7 = vadd.f32 %v7270_v55, %v7269_v4  ;;  %v5123_v45 = vadd.f32 %v9327_v12, %v9254_v15 }
 0x221   : > { %v7158_v50 = vpop.f32.mrf.mxu0  ;;  %v7272_v16 = vpop.f32.mrf.mxu1 }
 0x222   : > { %6653 = vst [vmem:[%s9206_s17 + $0x98] sm:$0xff] %v6573_v31   ;;  %v7159_v24 = vadd.f32 %v7158_v50, %v7157_v23  ;;  %v5429_v43 = vadd.f32 %v7268_v22, %v5268_v62  ;;  %v5126_v23 = vadd.f32 %v9327_v12, %v9257_v5 }
 0x223   : > { %v7160_v56 = vpop.f32.mrf.mxu0  ;;  %v7273_v40 = vpop.f32.mrf.mxu1 }
 0x224   : > { %v5271_v52 = vadd.f32 %v7159_v24, %v5110_v38  ;;  %v7274_v54 = vadd.f32 %v7273_v40, %v7272_v16 }
 0x225   : > { %v7161_v39 = vpop.f32.mrf.mxu0  ;;  %v7275_v34 = vpop.f32.mrf.mxu1 }
 0x226   : > { %v5432_v58 = vadd.f32 %v7271_v7, %v5271_v52  ;;  %v7162_v2 = vadd.f32 %v7161_v39, %v7160_v56  ;;  %v5131_v39 = vadd.f32 %v9327_v12, %v9261_v25 }
 0x227   : > { %v7163_v60 = vpop.f32.mrf.mxu0  ;;  %v7276_v53 = vpop.f32.mrf.mxu1 }
 0x228   : > { %v6578_v27 = vpack.c.bf16 %v5432_v58, %v5429_v43  ;;  %v5276_v59 = vadd.f32 %v7162_v2, %v5115_v63  ;;  %v7277_v57 = vadd.f32 %v7276_v53, %v7275_v34  ;;  %v5134_v2 = vadd.f32 %v9327_v12, %v9264_v10 }
 0x229   : > { %v7164_v42 = vpop.f32.mrf.mxu0  ;;  %v7278_v49 = vpop.f32.mrf.mxu1 }
 0x22a   : > { %6654 = vst [vmem:[%s9206_s17 + $0xa0] sm:$0xff] %v6578_v27   ;;  %v7165_v26 = vadd.f32 %v7164_v42, %v7163_v60  ;;  %v5437_v8 = vadd.f32 %v7274_v54, %v5276_v59 }
 0x22b   : > { %v7166_v37 = vpop.f32.mrf.mxu0  ;;  %v7279_v6 = vpop.f32.mrf.mxu1 }
 0x22c   : > { %v5279_v21 = vadd.f32 %v7165_v26, %v5118_v3  ;;  %v7280_v38 = vadd.f32 %v7279_v6, %v7278_v49 }
 0x22d   : > { %v7167_v28 = vpop.f32.mrf.mxu0  ;;  %v7281_v11 = vpop.f32.mrf.mxu1 }
 0x22e   : > { %v5440_v47 = vadd.f32 %v7277_v57, %v5279_v21  ;;  %v7168_v17 = vadd.f32 %v7167_v28, %v7166_v37  ;;  %v5139_v57 = vadd.f32 %v9327_v12, %v9268_v1 }
 0x22f   : > { %v7169_v44 = vpop.f32.mrf.mxu0  ;;  %v7282_v51 = vpop.f32.mrf.mxu1 }
 0x230   : > { %v6583_v61 = vpack.c.bf16 %v5440_v47, %v5437_v8  ;;  %v5284_v35 = vadd.f32 %v7168_v17, %v5123_v45  ;;  %v7283_v24 = vadd.f32 %v7282_v51, %v7281_v11  ;;  %v5142_v8 = vadd.f32 %v9327_v12, %v9271_v48 }
 0x231   : > { %v7170_v4 = vpop.f32.mrf.mxu0  ;;  %v7284_v55 = vpop.f32.mrf.mxu1 }
 0x232   : > { %6655 = vst [vmem:[%s9206_s17 + $0xa8] sm:$0xff] %v6583_v61   ;;  %v7171_v31 = vadd.f32 %v7170_v4, %v7169_v44  ;;  %v5445_v22 = vadd.f32 %v7280_v38, %v5284_v35  ;;  %v5147_v38 = vadd.f32 %v9327_v12, %v9275_v9 }
 0x233   : > { %v7172_v50 = vpop.f32.mrf.mxu0  ;;  %v7285_v16 = vpop.f32.mrf.mxu1 }
 0x234   : > { %v5287_v62 = vadd.f32 %v7171_v31, %v5126_v23  ;;  %v7286_v53 = vadd.f32 %v7285_v16, %v7284_v55  ;;  %v5150_v16 = vadd.f32 %v9327_v12, %v9278_v0 }
 0x235   : > { %v7173_v56 = vpop.f32.mrf.mxu0  ;;  %v7287_v7 = vpop.f32.mrf.mxu1 }
 0x236   : > { %v5448_v52 = vadd.f32 %v7283_v24, %v5287_v62  ;;  %v7174_v15 = vadd.f32 %v7173_v56, %v7172_v50 }
 0x237   : > { %v7175_v40 = vpop.f32.mrf.mxu0  ;;  %v7288_v43 = vpop.f32.mrf.mxu1 }
 0x238   : > { %v6588_v5 = vpack.c.bf16 %v5448_v52, %v5445_v22  ;;  %v5292_v34 = vadd.f32 %v7174_v15, %v5131_v39  ;;  %v7289_v3 = vadd.f32 %v7288_v43, %v7287_v7 }
 0x239   : > { %v7176_v58 = vpop.f32.mrf.mxu0  ;;  %v7290_v63 = vpop.f32.mrf.mxu1 }
 0x23a   : > { %6656 = vst [vmem:[%s9206_s17 + $0xb0] sm:$0xff] %v6588_v5   ;;  %v7177_v60 = vadd.f32 %v7176_v58, %v7175_v40  ;;  %v5453_v49 = vadd.f32 %v7286_v53, %v5292_v34 }
 0x23b   : > { %v7178_v27 = vpop.f32.mrf.mxu0  ;;  %v7291_v59 = vpop.f32.mrf.mxu1 }
 0x23c   : > { %v5295_v42 = vadd.f32 %v7177_v60, %v5134_v2  ;;  %v7292_v45 = vadd.f32 %v7291_v59, %v7290_v63  ;;  %v5155_v63 = vadd.f32 %v9327_v12, %v9282_v13 }
 0x23d   : > { %v7179_v26 = vpop.f32.mrf.mxu0  ;;  %v7293_v54 = vpop.f32.mrf.mxu1 }
 0x23e   : > { %v5456_v37 = vadd.f32 %v7289_v3, %v5295_v42  ;;  %v7180_v25 = vadd.f32 %v7179_v26, %v7178_v27  ;;  %v5158_v42 = vadd.f32 %v9327_v12, %v9285_v36 }
 0x23f   : > { %v7181_v21 = vpop.f32.mrf.mxu0  ;;  %v7294_v6 = vpop.f32.mrf.mxu1 }
 0x240   : > { %v6593_v10 = vpack.c.bf16 %v5456_v37, %v5453_v49  ;;  %v5300_v47 = vadd.f32 %v7180_v25, %v5139_v57  ;;  %v7295_v51 = vadd.f32 %v7294_v6, %v7293_v54 }
 0x241   : > { %v7182_v28 = vpop.f32.mrf.mxu0  ;;  %v7296_v11 = vpop.f32.mrf.mxu1 }
 0x242   : > { %6657 = vst [vmem:[%s9206_s17 + $0xb8] sm:$0xff] %v6593_v10   ;;  %v7183_v17 = vadd.f32 %v7182_v28, %v7181_v21  ;;  %v5461_v35 = vadd.f32 %v7292_v45, %v5300_v47  ;;  %v5163_v47 = vadd.f32 %v9327_v12, %v9289_v30 }
 0x243   : > { %v7184_v44 = vpop.f32.mrf.mxu0  ;;  %v7297_v4 = vpop.f32.mrf.mxu1 }
 0x244   : > { %v5303_v61 = vadd.f32 %v7183_v17, %v5142_v8  ;;  %v7298_v7 = vadd.f32 %v7297_v4, %v7296_v11 }
 0x245   : > { %v7185_v23 = vpop.f32.mrf.mxu0  ;;  %v7299_v55 = vpop.f32.mrf.mxu1 }
 0x246   : > { %v5464_v31 = vadd.f32 %v7295_v51, %v5303_v61  ;;  %v7186_v1 = vadd.f32 %v7185_v23, %v7184_v44  ;;  %v5166_v44 = vadd.f32 %v9327_v12, %v9292_v46 }
 0x247   : > { %v7187_v50 = vpop.f32.mrf.mxu0  ;;  %v7300_v62 = vpop.f32.mrf.mxu1 }
 0x248   : > { %v6598_v48 = vpack.c.bf16 %v5464_v31, %v5461_v35  ;;  %v5308_v56 = vadd.f32 %v7186_v1, %v5147_v38  ;;  %v7301_v39 = vadd.f32 %v7300_v62, %v7299_v55 }
 0x249   : > { %v7188_v24 = vpop.f32.mrf.mxu0  ;;  %v7302_v52 = vpop.f32.mrf.mxu1 }
 0x24a   : > { %6658 = vst [vmem:[%s9206_s17 + $0xc0] sm:$0xff] %v6598_v48   ;;  %v7189_v22 = vadd.f32 %v7188_v24, %v7187_v50  ;;  %v5469_v58 = vadd.f32 %v7298_v7, %v5308_v56  ;;  %v5171_v24 = vadd.f32 %v9327_v12, %v9296_v20 }
 0x24b   : > { %v7190_v15 = vpop.f32.mrf.mxu0  ;;  %v7303_v5 = vpop.f32.mrf.mxu1 }
 0x24c   : > { %v5311_v40 = vadd.f32 %v7189_v22, %v5150_v16  ;;  %v7304_v37 = vadd.f32 %v7303_v5, %v7302_v52  ;;  %v5174_v22 = vadd.f32 %v9327_v12, %v9299_v19 }
 0x24d   : > { %v7191_v43 = vpop.f32.mrf.mxu0  ;;  %v7305_v34 = vpop.f32.mrf.mxu1 }
 0x24e   : > { %v5472_v2 = vadd.f32 %v7301_v39, %v5311_v40  ;;  %v7192_v9 = vadd.f32 %v7191_v43, %v7190_v15 }
 0x24f   : > { %v7193_v60 = vpop.f32.mrf.mxu0  ;;  %v7306_v27 = vpop.f32.mrf.mxu1 }
 0x250   : > { %v6603_v0 = vpack.c.bf16 %v5472_v2, %v5469_v58  ;;  %v5316_v3 = vadd.f32 %v7192_v9, %v5155_v63  ;;  %v7307_v54 = vadd.f32 %v7306_v27, %v7305_v34 }
 0x251   : > { %v7194_v53 = vpop.f32.mrf.mxu0  ;;  %v7308_v26 = vpop.f32.mrf.mxu1 }
 0x252   : > { %6659 = vst [vmem:[%s9206_s17 + $0xc8] sm:$0xff] %v6603_v0   ;;  %v7195_v59 = vadd.f32 %v7194_v53, %v7193_v60  ;;  %v5477_v10 = vadd.f32 %v7304_v37, %v5316_v3  ;;  %v5179_v0 = vadd.f32 %v9327_v12, %v9303_v14 }
 0x253   : > { %v7196_v49 = vpop.f32.mrf.mxu0  ;;  %v7309_v21 = vpop.f32.mrf.mxu1 }
 0x254   : > { %v5319_v25 = vadd.f32 %v7195_v59, %v5158_v42  ;;  %v7310_v23 = vadd.f32 %v7309_v21, %v7308_v26  ;;  %v5182_v42 = vadd.f32 %v9327_v12, %v9306_v33 }
 0x255   : > { %v7197_v57 = vpop.f32.mrf.mxu0  ;;  %v7311_v28 = vpop.f32.mrf.mxu1 }
 0x256   : > { %v5480_v6 = vadd.f32 %v7307_v54, %v5319_v25  ;;  %v7198_v13 = vadd.f32 %v7197_v57, %v7196_v49 }
 0x257   : > { %v7199_v8 = vpop.f32.mrf.mxu0  ;;  %v7312_v17 = vpop.f32.mrf.mxu1 }
 0x258   : > { %v6608_v36 = vpack.c.bf16 %v5480_v6, %v5477_v10  ;;  %v5324_v45 = vadd.f32 %v7198_v13, %v5163_v47  ;;  %v7313_v31 = vadd.f32 %v7312_v17, %v7311_v28  ;;  %v5190_v17 = vadd.f32 %v9327_v12, %v9313_v18 }
 0x259   : > { %v7200_v11 = vpop.f32.mrf.mxu0  ;;  %v7314_v51 = vpop.f32.mrf.mxu1  ;;  %v5195_v18 = vadd.f32 %v9327_v12, %v9317_v29 }
 0x25a   : > { %6660 = vst [vmem:[%s9206_s17 + $0xd0] sm:$0xff] %v6608_v36   ;;  %v7201_v61 = vadd.f32 %v7200_v11, %v7199_v8  ;;  %v5485_v50 = vadd.f32 %v7310_v23, %v5324_v45  ;;  %v5187_v8 = vadd.f32 %v9327_v12, %v9310_v32 }
 0x25b   : > { %v7202_v4 = vpop.f32.mrf.mxu0  ;;  %v7315_v1 = vpop.f32.mrf.mxu1 }
 0x25c   : > { %v5327_v35 = vadd.f32 %v7201_v61, %v5166_v44  ;;  %v7316_v39 = vadd.f32 %v7315_v1, %v7314_v51 }
 0x25d   : > { %v7203_v55 = vpop.f32.mrf.mxu0  ;;  %v7317_v48 = vpop.f32.mrf.mxu1 }
 0x25e   : > { %v5488_v38 = vadd.f32 %v7313_v31, %v5327_v35  ;;  %v7204_v30 = vadd.f32 %v7203_v55, %v7202_v4 }
 0x25f   : > { %v7205_v62 = vpop.f32.mrf.mxu0  ;;  %v7318_v16 = vpop.f32.mrf.mxu1 }
 0x260   : > { %v6613_v46 = vpack.c.bf16 %v5488_v38, %v5485_v50  ;;  %v5332_v52 = vadd.f32 %v7204_v30, %v5171_v24  ;;  %v7319_v43 = vadd.f32 %v7318_v16, %v7317_v48  ;;  %v5198_v24 = vadd.f32 %v9327_v12, %v9320_v41 }
 0x261   : > { %v7206_v56 = vpop.f32.mrf.mxu0  ;;  %v7320_v7 = vpop.f32.mrf.mxu1 }
 0x262   : > { %6661 = vst [vmem:[%s9206_s17 + $0xd8] sm:$0xff] %v6613_v46   ;;  %v7207_v15 = vadd.f32 %v7206_v56, %v7205_v62  ;;  %v5493_v9 = vadd.f32 %v7316_v39, %v5332_v52 }
 0x263   : > { %v7208_v40 = vpop.f32.mrf.mxu0  ;;  %v7321_v58 = vpop.f32.mrf.mxu1 }
 0x264   : > { %v5335_v5 = vadd.f32 %v7207_v15, %v5174_v22  ;;  %v7322_v37 = vadd.f32 %v7321_v58, %v7320_v7 }
 0x265   : > { %v7209_v2 = vpop.f32.mrf.mxu0  ;;  %v7323_v60 = vpop.f32.mrf.mxu1 }
 0x266   : > { %v5496_v34 = vadd.f32 %v7319_v43, %v5335_v5  ;;  %v7210_v20 = vadd.f32 %v7209_v2, %v7208_v40 }
 0x267   : > { %v7211_v63 = vpop.f32.mrf.mxu0  ;;  %v7324_v27 = vpop.f32.mrf.mxu1 }
 0x268   : > { %v6618_v19 = vpack.c.bf16 %v5496_v34, %v5493_v9  ;;  %v5340_v3 = vadd.f32 %v7210_v20, %v5179_v0  ;;  %v7325_v54 = vadd.f32 %v7324_v27, %v7323_v60 }
 0x269   : > { %v7212_v53 = vpop.f32.mrf.mxu0  ;;  %v7326_v26 = vpop.f32.mrf.mxu1 }
 0x26a   : > { %6662 = vst [vmem:[%s9206_s17 + $0xe0] sm:$0xff] %v6618_v19   ;;  %v7213_v59 = vadd.f32 %v7212_v53, %v7211_v63  ;;  %v5501_v10 = vadd.f32 %v7322_v37, %v5340_v3 }
 0x26b   : > { %v7214_v49 = vpop.f32.mrf.mxu0  ;;  %v7327_v21 = vpop.f32.mrf.mxu1 }
 0x26c   : > { %v5343_v25 = vadd.f32 %v7213_v59, %v5182_v42  ;;  %v7328_v51 = vadd.f32 %v7327_v21, %v7326_v26 }
 0x26d   : > { %v7215_v57 = vpop.f32.mrf.mxu0  ;;  %v7329_v13 = vpop.f32.mrf.mxu1 }
 0x26e   : > { %v5504_v6 = vadd.f32 %v7325_v54, %v5343_v25  ;;  %v7216_v14 = vadd.f32 %v7215_v57, %v7214_v49 }
 0x26f   : > { %v7217_v28 = vpop.f32.mrf.mxu0  ;;  %v7330_v47 = vpop.f32.mrf.mxu1 }
 0x270   : > { %v6623_v33 = vpack.c.bf16 %v5504_v6, %v5501_v10  ;;  %v5348_v11 = vadd.f32 %v7216_v14, %v5187_v8  ;;  %v7331_v23 = vadd.f32 %v7330_v47, %v7329_v13 }
 0x271   : > { %v7218_v36 = vpop.f32.mrf.mxu0  ;;  %v7332_v45 = vpop.f32.mrf.mxu1 }
 0x272   : > { %6663 = vst [vmem:[%s9206_s17 + $0xe8] sm:$0xff] %v6623_v33   ;;  %v7219_v44 = vadd.f32 %v7218_v36, %v7217_v28  ;;  %v5509_v1 = vadd.f32 %v7328_v51, %v5348_v11 }
 0x273   : > { %v7220_v61 = vpop.f32.mrf.mxu0  ;;  %v7333_v35 = vpop.f32.mrf.mxu1 }
 0x274   : > { %v5351_v4 = vadd.f32 %v7219_v44, %v5190_v17  ;;  %v7334_v56 = vadd.f32 %v7333_v35, %v7332_v45 }
 0x275   : > { %v7221_v31 = vpop.f32.mrf.mxu0  ;;  %v7335_v50 = vpop.f32.mrf.mxu1 }
 0x276   : > { %v5512_v55 = vadd.f32 %v7331_v23, %v5351_v4  ;;  %v7222_v32 = vadd.f32 %v7221_v31, %v7220_v61 }
 0x277   : > { %v7223_v38 = vpop.f32.mrf.mxu0  ;;  %v7336_v62 = vpop.f32.mrf.mxu1 }
 0x278   : > { %v6628_v30 = vpack.c.bf16 %v5512_v55, %v5509_v1  ;;  %v5356_v46 = vadd.f32 %v7222_v32, %v5195_v18  ;;  %v7337_v52 = vadd.f32 %v7336_v62, %v7335_v50 }
 0x279   : > { %v7224_v48 = vpop.f32.mrf.mxu0 }
 0x27a   : > { %6664 = vst [vmem:[%s9206_s17 + $0xf0] sm:$0xff] %v6628_v30   ;;  %v7225_v16 = vadd.f32 %v7224_v48, %v7223_v38  ;;  %v5517_v15 = vadd.f32 %v7334_v56, %v5356_v46 }
 0x27c   : > { %v5359_v22 = vadd.f32 %v7225_v16, %v5198_v24 }
 0x27e   : > { %v5520_v7 = vadd.f32 %v7337_v52, %v5359_v22 }
 0x280   : > { %v6633_v40 = vpack.c.bf16 %v5520_v7, %v5517_v15 }
 0x282   : > { %6665 = vst [vmem:[%s9206_s17 + $0xf8] sm:$0xff] %v6633_v40  }
 0x283 PF: > { %s13_s14 = sadd.s32 1, %s7756_s14   ;;  %s9435_s12 = smov %s7752_s13 }
 0x284   : > { %p10_p5 = scmp.ge.s32.totalorder %s13_s14, 4   ;;  %s9436_s13 = smov %s9438_s15 }
 0x286   :  { %12 = sbr.rel (!%p10_p5) target bundleno = 2 (0x2), region = 67 }

</bundles_post_ra>
